<compile_context>
chip_gen: v7x
topology: tpu7x:2x2x1
jax: 0.10.0
libtpu: 0.0.40
codegen_flags: <defaults>
</compile_context>

<pallas_src>
import math

import numpy as np
import jax
import jax.numpy as jnp
from jax.experimental import pallas as pl
from jax.experimental.pallas import tpu as pltpu

TB = 32  # images per grid step (tunable; keep a multiple of 8)


# ----------------------------------------------------------------------------
# Fused Pallas kernel: whole Cifar10Net forward for one batch tile
# ----------------------------------------------------------------------------
def cifar10net_kernel(x_ref, w1_ref, b1_ref, w2_ref, b2_ref,
                      fw1_ref, fb1_ref, fw2_ref, fb2_ref, fw3_ref, fb3_ref,
                      o_ref):
    tb = x_ref.shape[0]
    f32 = jnp.float32
    x = x_ref[...]                                                   # (tb,34,128) bf16

    # ---- conv1 (3x3, 3->16) + relu : one bf16 MXU matmul vs Toeplitz weight ----
    # Input lanes = 4*w + c (c padded 3->4).  LHS row (b,h) = input rows h..h+2
    # concatenated on lanes -> K = 384.  Output lanes = d*160 + j*16 + co with
    # w_out = 3*j + d, padded 480 -> 512 (zero weight columns).
    x3 = jnp.concatenate([x[:, ky:ky + 32, :] for ky in range(3)], axis=-1)   # (tb,32,384)
    y = jnp.dot(x3.reshape(tb * 32, 384), w1_ref[...],
                preferred_element_type=f32)
    y = jnp.maximum(y + b1_ref[...], 0.0).reshape(tb, 32, 512)       # rows 30,31 garbage

    # ---- pool1: MaxPool2d(3), stride 3 ----
    # Height: m3[:, h] = max(y[h], y[h+1], y[h+2]) via 2 maxima on big
    # unit-stride slabs; only rows {0,3,...,27} are consumed below, so the
    # garbage conv rows 30,31 never reach a used value.
    m3 = jnp.maximum(jnp.maximum(y[:, 0:30, :], y[:, 1:31, :]), y[:, 2:32, :])  # (tb,30,512)
    # Width: thanks to the (d, j, co) column order this is a max over three
    # contiguous 160-lane blocks (pad lanes 480:512 are ignored).
    wp = jnp.maximum(jnp.maximum(m3[:, :, 0:160], m3[:, :, 160:320]),
                     m3[:, :, 320:480])                              # (tb,30,160)
    # Pooled row jr lives at m3/wp row 3*jr; pick the 10 rows and append the 6
    # zero-pad rows in the same concatenate -> sublane-aligned 16-row buffer.
    h1 = jnp.concatenate([wp[:, 3 * jr:3 * jr + 1, :] for jr in range(10)]
                         + [jnp.zeros((tb, 6, 160), f32)], axis=1)   # (tb,16,160)

    # ---- conv2 (4x4, 16->64) + relu ----
    # Output lanes = w_out*64 + co, padded 448 -> 512.
    x2 = jnp.concatenate([h1[:, ky:ky + 8, :] for ky in range(4)], axis=-1)   # (tb,8,640)
    y2 = jnp.dot(x2.reshape(tb * 8, 640).astype(jnp.bfloat16), w2_ref[...],
                 preferred_element_type=f32)
    y2 = jnp.maximum(y2 + b2_ref[...], 0.0).reshape(tb, 8, 512)      # rows >=7 garbage

    # ---- pool2: MaxPool2d(4) on 7x7 -> single window (rows 0..3, w_out 0..3) ----
    rmax = jnp.maximum(jnp.maximum(y2[:, 0:1, :], y2[:, 1:2, :]),
                       jnp.maximum(y2[:, 2:3, :], y2[:, 3:4, :]))[:, 0, :]    # (tb,512)
    a = jnp.maximum(rmax[:, 0:128], rmax[:, 128:256])                # 128-aligned max
    flat = jnp.maximum(a, pltpu.roll(a, shift=64, axis=1))           # (tb,128); lanes 0..63
    # hold the pooled value, lanes 64..127 duplicate it (fc1 rows 64.. are zero).

    # ---- fc1 -> fc2 -> fc3 -> masked log_softmax (all lane-dense / padded) ----
    h = jnp.maximum(jnp.dot(flat.astype(jnp.bfloat16), fw1_ref[...],
                            preferred_element_type=f32) + fb1_ref[...], 0.0)  # (tb,384)
    h = jnp.maximum(jnp.dot(h.astype(jnp.bfloat16), fw2_ref[...],
                            preferred_element_type=f32) + fb2_ref[...], 0.0)  # (tb,256)
    z = jnp.dot(h.astype(jnp.bfloat16), fw3_ref[...],
                preferred_element_type=f32) + fb3_ref[...]                    # (tb,128)

    lane = jax.lax.broadcasted_iota(jnp.int32, z.shape, 1)
    zm = jnp.where(lane < 10, z, -1e30)                              # mask padded logits (f32)
    m = jnp.max(zm, axis=-1, keepdims=True)
    lse = jnp.log(jnp.sum(jnp.exp(zm - m), axis=-1, keepdims=True)) + m
    o_ref[...] = z - lse


# ----------------------------------------------------------------------------
# pallas_call wrapper
# ----------------------------------------------------------------------------
def _pallas_forward(xm, p, tb):
    n_pad = xm.shape[0]
    grid = (n_pad // tb,)

    def full(shape):
        nd = len(shape)
        return pl.BlockSpec(shape, lambda i, _nd=nd: (0,) * _nd)

    return pl.pallas_call(
        cifar10net_kernel,
        out_shape=jax.ShapeDtypeStruct((n_pad, 128), jnp.float32),
        grid_spec=pltpu.PrefetchScalarGridSpec(
            num_scalar_prefetch=0,
            grid=grid,
            in_specs=[
                pl.BlockSpec((tb, 34, 128), lambda i: (i, 0, 0)),   # input tile (bf16)
                full((384, 512)), full((1, 512)),                   # conv1 Toeplitz (bf16) + bias
                full((640, 512)), full((1, 512)),                   # conv2 Toeplitz (bf16) + bias
                full((128, 384)), full((1, 384)),                   # fc1 (in padded 64->128)
                full((384, 256)), full((1, 256)),                   # fc2 (out padded 192->256)
                full((256, 128)), full((1, 128)),                   # fc3 (10 -> 128 lanes)
            ],
            out_specs=pl.BlockSpec((tb, 128), lambda i: (i, 0)),
        ),
        compiler_params=pltpu.CompilerParams(
            dimension_semantics=("parallel",),
            # ~10 MiB actually used at TB=32; 48 MiB cap is safe on v7x (64 MiB
            # physical) and gives headroom to raise TB on v5e/v6e (128 MiB).
            vmem_limit_bytes=48 * 1024 * 1024,
        ),
    )(xm, p["w1"], p["b1"], p["w2"], p["b2"],
      p["fw1"], p["fb1"], p["fw2"], p["fb2"], p["fw3"], p["fb3"])


def preprocess_inputs(x_nchw):
    """NCHW f32 -> lane-dense (N, 34, 128) bf16.  For serving, run this once in
    the input pipeline instead of per forward call."""
    n = x_nchw.shape[0]
    x = jnp.transpose(x_nchw, (0, 2, 3, 1)).astype(jnp.float32)      # NCHW -> NHWC
    x = jnp.pad(x, ((0, 0), (0, 2), (0, 0), (0, 1)))                 # H 32->34, C 3->4
    return x.reshape(n, 34, 128).astype(jnp.bfloat16)                # merge (W, C)


def cifar10net_forward_preprocessed(xm, p, tile_b=TB):
    n = xm.shape[0]
    n8 = ((n + 7) // 8) * 8
    tb = max(8, (min(tile_b, n8) // 8) * 8)      # multiple of 8, never larger than the batch
    n_pad = ((n + tb - 1) // tb) * tb
    if n_pad != n:
        xm = jnp.pad(xm, ((0, n_pad - n), (0, 0), (0, 0)))
    out = _pallas_forward(xm, p, tb)                                 # (n_pad, 128)
    return out[:n, :10]


def cifar10net_forward(x_nchw, p, tile_b=TB):
    return cifar10net_forward_preprocessed(preprocess_inputs(x_nchw), p, tile_b)


# ----------------------------------------------------------------------------
# Parameter init (mirrors the PyTorch init scheme) + Toeplitz packing
# ----------------------------------------------------------------------------
def init_raw_params(key):
    ks = jax.random.split(key, 10)

    def unif(k, shape, bound):
        return jax.random.uniform(k, shape, jnp.float32, -bound, bound)

    w1 = unif(ks[0], (3, 3, 3, 16), math.sqrt(6.0 / (27 + 144)))     # xavier_uniform, HWIO
    b1 = unif(ks[1], (16,), 1.0 / math.sqrt(27.0))
    w2 = unif(ks[2], (4, 4, 16, 64), 1.0 / math.sqrt(256.0))         # kaiming-uniform(a=sqrt5), HWIO
    b2 = unif(ks[3], (64,), 1.0 / math.sqrt(256.0))
    fw1 = unif(ks[4], (64, 384), 1.0 / math.sqrt(64.0))
    fb1 = unif(ks[5], (384,), 1.0 / math.sqrt(64.0))
    fw2 = unif(ks[6], (384, 192), 1.0 / math.sqrt(384.0))
    fb2 = unif(ks[7], (192,), 1.0 / math.sqrt(384.0))
    fw3 = unif(ks[8], (192, 10), 1.0 / math.sqrt(192.0))
    fb3 = unif(ks[9], (10,), 1.0 / math.sqrt(192.0))
    return dict(w1_hwio=w1, b1=b1, w2_hwio=w2, b2=b2,
                fw1=fw1, fb1=fb1, fw2=fw2, fb2=fb2, fw3=fw3, fb3=fb3)


def pack_params(raw):
    """Pack conv weights as Toeplitz ('lowered conv') matmul weights, pad every
    matmul output width to a multiple of 128 lanes, cast weights to bf16."""
    w1 = np.asarray(raw["w1_hwio"], np.float32)   # (3,3,3,16)
    b1 = np.asarray(raw["b1"], np.float32)
    w2 = np.asarray(raw["w2_hwio"], np.float32)   # (4,4,16,64)
    b2 = np.asarray(raw["b2"], np.float32)

    # conv1: rows = ky*128 + 4*w_in + c ; cols = d*160 + j*16 + co (w_out=3j+d); pad 480->512
    big_w1 = np.zeros((3 * 128, 512), np.float32)
    for ky in range(3):
        for kx in range(3):
            for wo in range(30):
                j, d = wo // 3, wo % 3
                col = d * 160 + j * 16
                row = ky * 128 + 4 * (wo + kx)
                big_w1[row:row + 3, col:col + 16] = w1[ky, kx]
    big_b1 = np.zeros((512,), np.float32)
    big_b1[:480] = np.tile(b1, 30)

    # conv2: rows = ky*160 + 16*w_in + c ; cols = w_out*64 + co ; pad 448->512
    big_w2 = np.zeros((640, 512), np.float32)
    for ky in range(4):
        for kx in range(4):
            for wo in range(7):
                row = ky * 160 + 16 * (wo + kx)
                col = wo * 64
                big_w2[row:row + 16, col:col + 64] = w2[ky, kx]
    big_b2 = np.zeros((512,), np.float32)
    big_b2[:448] = np.tile(b2, 7)

    # fc1: pad input 64 -> 128 rows (extra lanes of `flat` get zero weight)
    fw1 = np.zeros((128, 384), np.float32)
    fw1[:64] = np.asarray(raw["fw1"], np.float32)
    # fc2: pad output 192 -> 256 lanes
    fw2 = np.zeros((384, 256), np.float32)
    fw2[:, :192] = np.asarray(raw["fw2"], np.float32)
    fb2 = np.zeros((256,), np.float32)
    fb2[:192] = np.asarray(raw["fb2"], np.float32)
    # fc3: pad input 192 -> 256 rows and output 10 -> 128 lanes
    fw3 = np.zeros((256, 128), np.float32)
    fw3[:192, :10] = np.asarray(raw["fw3"], np.float32)
    fb3 = np.zeros((128,), np.float32)
    fb3[:10] = np.asarray(raw["fb3"], np.float32)

    bf = jnp.bfloat16
    return {
        "w1": jnp.asarray(big_w1, bf), "b1": jnp.asarray(big_b1).reshape(1, 512),
        "w2": jnp.asarray(big_w2, bf), "b2": jnp.asarray(big_b2).reshape(1, 512),
        "fw1": jnp.asarray(fw1, bf), "fb1": jnp.asarray(raw["fb1"]).reshape(1, 384),
        "fw2": jnp.asarray(fw2, bf), "fb2": jnp.asarray(fb2).reshape(1, 256),
        "fw3": jnp.asarray(fw3, bf), "fb3": jnp.asarray(fb3).reshape(1, 128),
    }


# ----------------------------------------------------------------------------
# Plain-JAX reference (for correctness check only)
# ----------------------------------------------------------------------------
def reference_forward(x_nchw, raw):
    hp = jax.lax.Precision.HIGHEST
    x = x_nchw.astype(jnp.float32)
    y = jax.lax.conv_general_dilated(
        x, raw["w1_hwio"], (1, 1), "VALID",
        dimension_numbers=("NCHW", "HWIO", "NCHW"), precision=hp)
    y = jnp.maximum(y + raw["b1"][None, :, None, None], 0.0)
    y = jax.lax.reduce_window(y, -jnp.inf, jax.lax.max,
                              (1, 1, 3, 3), (1, 1, 3, 3), "VALID")
    y = jax.lax.conv_general_dilated(
        y, raw["w2_hwio"], (1, 1), "VALID",
        dimension_numbers=("NCHW", "HWIO", "NCHW"), precision=hp)
    y = jnp.maximum(y + raw["b2"][None, :, None, None], 0.0)
    y = jax.lax.reduce_window(y, -jnp.inf, jax.lax.max,
                              (1, 1, 4, 4), (1, 1, 4, 4), "VALID")
    y = y.reshape(y.shape[0], -1)
    y = jnp.maximum(jnp.dot(y, raw["fw1"], precision=hp) + raw["fb1"], 0.0)
    y = jnp.maximum(jnp.dot(y, raw["fw2"], precision=hp) + raw["fb2"], 0.0)
    z = jnp.dot(y, raw["fw3"], precision=hp) + raw["fb3"]
    return jax.nn.log_softmax(z, axis=-1)


def _round_bf16(a):
    return jnp.asarray(a, jnp.bfloat16).astype(jnp.float32)


if __name__ == "__main__":
    key = jax.random.PRNGKey(0)
    k_x, k_p = jax.random.split(key)

    raw = init_raw_params(k_p)
    params = pack_params(raw)

    # Reference uses the same bf16-rounded weights/input (the kernel stores
    # weights in bf16); reference arithmetic stays f32 HIGHEST.
    raw_ref = dict(raw)
    for k in ("w1_hwio", "w2_hwio", "fw1", "fw2", "fw3"):
        raw_ref[k] = _round_bf16(raw[k])
    ref_fn = jax.jit(reference_forward)

    fwd = jax.jit(cifar10net_forward)

    # CIFAR-10 shaped inputs (NCHW); 32x32 is required by fc1 = Linear(64*1*1, 384).
    x_small = jax.random.normal(k_x, (2, 3, 32, 32), dtype=jnp.float32)
    out_small = jax.block_until_ready(fwd(x_small, params))
    assert out_small.shape == (2, 10)

    # Larger batch exercising the TB=32 tile with 2 grid steps.
    x_big = jax.random.normal(jax.random.PRNGKey(1), (64, 3, 32, 32), dtype=jnp.float32)
    out_big = jax.block_until_ready(fwd(x_big, params))
    assert out_big.shape == (64, 10)

    for x_t, out_t in ((x_small, out_small), (x_big, out_big)):
        assert bool(jnp.all(jnp.isfinite(out_t)))
        # log_softmax rows exponentiate-sum to 1
        assert jnp.allclose(jnp.sum(jnp.exp(out_t), axis=1), 1.0, atol=1e-4)
        ref = jax.block_until_ready(ref_fn(_round_bf16(x_t), raw_ref))
        assert float(jnp.max(jnp.abs(out_t - ref))) < 3e-2

    print("KERNEL_OK")
</pallas_src>

<mosaic_0001>
module attributes {stable_mosaic.version = 11 : i64} {
  func.func @cifar10net_kernel(%arg0: i32, %arg1: memref<8x34x128xbf16, #tpu.memory_space<vmem>>, %arg2: memref<384x512xbf16, #tpu.memory_space<vmem>>, %arg3: memref<1x512xf32, #tpu.memory_space<vmem>>, %arg4: memref<640x512xbf16, #tpu.memory_space<vmem>>, %arg5: memref<1x512xf32, #tpu.memory_space<vmem>>, %arg6: memref<128x384xbf16, #tpu.memory_space<vmem>>, %arg7: memref<1x384xf32, #tpu.memory_space<vmem>>, %arg8: memref<384x256xbf16, #tpu.memory_space<vmem>>, %arg9: memref<1x256xf32, #tpu.memory_space<vmem>>, %arg10: memref<256x128xbf16, #tpu.memory_space<vmem>>, %arg11: memref<1x128xf32, #tpu.memory_space<vmem>>, %arg12: memref<8x128xf32, #tpu.memory_space<vmem>>) attributes {dimension_semantics = [#tpu.dimension_semantics<parallel>], iteration_bounds = array<i64: 1>, scalar_prefetch = 0 : i64, scratch_operands = 0 : i64, tpu.core_type = #tpu.core_type<tc>, window_params = [{transform_indices = @transform_0, window_bounds = array<i64: 8, 34, 128>}, {pipeline_mode = #tpu.pipeline_mode<synchronous>, transform_indices = @transform_1, window_bounds = array<i64: 384, 512>}, {pipeline_mode = #tpu.pipeline_mode<synchronous>, transform_indices = @transform_2, window_bounds = array<i64: 1, 512>}, {pipeline_mode = #tpu.pipeline_mode<synchronous>, transform_indices = @transform_3, window_bounds = array<i64: 640, 512>}, {pipeline_mode = #tpu.pipeline_mode<synchronous>, transform_indices = @transform_4, window_bounds = array<i64: 1, 512>}, {pipeline_mode = #tpu.pipeline_mode<synchronous>, transform_indices = @transform_5, window_bounds = array<i64: 128, 384>}, {pipeline_mode = #tpu.pipeline_mode<synchronous>, transform_indices = @transform_6, window_bounds = array<i64: 1, 384>}, {pipeline_mode = #tpu.pipeline_mode<synchronous>, transform_indices = @transform_7, window_bounds = array<i64: 384, 256>}, {pipeline_mode = #tpu.pipeline_mode<synchronous>, transform_indices = @transform_8, window_bounds = array<i64: 1, 256>}, {pipeline_mode = #tpu.pipeline_mode<synchronous>, transform_indices = @transform_9, window_bounds = array<i64: 256, 128>}, {pipeline_mode = #tpu.pipeline_mode<synchronous>, transform_indices = @transform_10, window_bounds = array<i64: 1, 128>}, {transform_indices = @transform_11, window_bounds = array<i64: 8, 128>}]} {
    %c0 = arith.constant 0 : index
    %c0_0 = arith.constant 0 : index
    %c0_1 = arith.constant 0 : index
    %0 = vector.load %arg1[%c0, %c0_0, %c0_1] : memref<8x34x128xbf16, #tpu.memory_space<vmem>>, vector<8x34x128xbf16>
    %1 = vector.extract_strided_slice %0 {offsets = [0, 0, 0], sizes = [8, 32, 128], strides = [1, 1, 1]} : vector<8x34x128xbf16> to vector<8x32x128xbf16>
    %2 = vector.extract_strided_slice %0 {offsets = [0, 1, 0], sizes = [8, 32, 128], strides = [1, 1, 1]} : vector<8x34x128xbf16> to vector<8x32x128xbf16>
    %3 = vector.extract_strided_slice %0 {offsets = [0, 2, 0], sizes = [8, 32, 128], strides = [1, 1, 1]} : vector<8x34x128xbf16> to vector<8x32x128xbf16>
    %4 = tpu.concatenate %1, %2, %3 in 2 : vector<8x32x128xbf16>, vector<8x32x128xbf16>, vector<8x32x128xbf16> -> vector<8x32x384xbf16>
    %5 = vector.shape_cast %4 : vector<8x32x384xbf16> to vector<256x384xbf16>
    %c0_2 = arith.constant 0 : index
    %c0_3 = arith.constant 0 : index
    %6 = vector.load %arg2[%c0_2, %c0_3] : memref<384x512xbf16, #tpu.memory_space<vmem>>, vector<384x512xbf16>
    %cst = arith.constant dense<0.000000e+00> : vector<256x512xf32>
    %7 = tpu.matmul %5, %6, %cst {dimension_numbers = #tpu.dot_dimension_numbers<[1], [0], [0], [1], [0, 0, 1, 1], [], []>} : vector<256x384xbf16>, vector<384x512xbf16>, vector<256x512xf32> -> vector<256x512xf32>
    %c0_4 = arith.constant 0 : index
    %c0_5 = arith.constant 0 : index
    %8 = vector.load %arg3[%c0_4, %c0_5] : memref<1x512xf32, #tpu.memory_space<vmem>>, vector<1x512xf32>
    %9 = vector.broadcast %8 : vector<1x512xf32> to vector<256x512xf32>
    %10 = arith.addf %7, %9 : vector<256x512xf32>
    %cst_6 = arith.constant 0.000000e+00 : f32
    %11 = vector.broadcast %cst_6 : f32 to vector<256x512xf32>
    %12 = arith.maximumf %10, %11 : vector<256x512xf32>
    %13 = vector.shape_cast %12 : vector<256x512xf32> to vector<8x32x512xf32>
    %14 = vector.extract_strided_slice %13 {offsets = [0, 0, 0], sizes = [8, 30, 512], strides = [1, 1, 1]} : vector<8x32x512xf32> to vector<8x30x512xf32>
    %15 = vector.extract_strided_slice %13 {offsets = [0, 1, 0], sizes = [8, 30, 512], strides = [1, 1, 1]} : vector<8x32x512xf32> to vector<8x30x512xf32>
    %16 = arith.maximumf %14, %15 : vector<8x30x512xf32>
    %17 = vector.extract_strided_slice %13 {offsets = [0, 2, 0], sizes = [8, 30, 512], strides = [1, 1, 1]} : vector<8x32x512xf32> to vector<8x30x512xf32>
    %18 = arith.maximumf %16, %17 : vector<8x30x512xf32>
    %19 = vector.extract_strided_slice %18 {offsets = [0, 0, 0], sizes = [8, 30, 160], strides = [1, 1, 1]} : vector<8x30x512xf32> to vector<8x30x160xf32>
    %20 = vector.extract_strided_slice %18 {offsets = [0, 0, 160], sizes = [8, 30, 160], strides = [1, 1, 1]} : vector<8x30x512xf32> to vector<8x30x160xf32>
    %21 = arith.maximumf %19, %20 : vector<8x30x160xf32>
    %22 = vector.extract_strided_slice %18 {offsets = [0, 0, 320], sizes = [8, 30, 160], strides = [1, 1, 1]} : vector<8x30x512xf32> to vector<8x30x160xf32>
    %23 = arith.maximumf %21, %22 : vector<8x30x160xf32>
    %24 = vector.extract_strided_slice %23 {offsets = [0, 0, 0], sizes = [8, 1, 160], strides = [1, 1, 1]} : vector<8x30x160xf32> to vector<8x1x160xf32>
    %25 = vector.extract_strided_slice %23 {offsets = [0, 3, 0], sizes = [8, 1, 160], strides = [1, 1, 1]} : vector<8x30x160xf32> to vector<8x1x160xf32>
    %26 = vector.extract_strided_slice %23 {offsets = [0, 6, 0], sizes = [8, 1, 160], strides = [1, 1, 1]} : vector<8x30x160xf32> to vector<8x1x160xf32>
    %27 = vector.extract_strided_slice %23 {offsets = [0, 9, 0], sizes = [8, 1, 160], strides = [1, 1, 1]} : vector<8x30x160xf32> to vector<8x1x160xf32>
    %28 = vector.extract_strided_slice %23 {offsets = [0, 12, 0], sizes = [8, 1, 160], strides = [1, 1, 1]} : vector<8x30x160xf32> to vector<8x1x160xf32>
    %29 = vector.extract_strided_slice %23 {offsets = [0, 15, 0], sizes = [8, 1, 160], strides = [1, 1, 1]} : vector<8x30x160xf32> to vector<8x1x160xf32>
    %30 = vector.extract_strided_slice %23 {offsets = [0, 18, 0], sizes = [8, 1, 160], strides = [1, 1, 1]} : vector<8x30x160xf32> to vector<8x1x160xf32>
    %31 = vector.extract_strided_slice %23 {offsets = [0, 21, 0], sizes = [8, 1, 160], strides = [1, 1, 1]} : vector<8x30x160xf32> to vector<8x1x160xf32>
    %32 = vector.extract_strided_slice %23 {offsets = [0, 24, 0], sizes = [8, 1, 160], strides = [1, 1, 1]} : vector<8x30x160xf32> to vector<8x1x160xf32>
    %33 = vector.extract_strided_slice %23 {offsets = [0, 27, 0], sizes = [8, 1, 160], strides = [1, 1, 1]} : vector<8x30x160xf32> to vector<8x1x160xf32>
    %cst_7 = arith.constant 0.000000e+00 : f32
    %34 = vector.broadcast %cst_7 : f32 to vector<8x6x160xf32>
    %35 = tpu.concatenate %24, %25, %26, %27, %28, %29, %30, %31, %32, %33, %34 in 1 : vector<8x1x160xf32>, vector<8x1x160xf32>, vector<8x1x160xf32>, vector<8x1x160xf32>, vector<8x1x160xf32>, vector<8x1x160xf32>, vector<8x1x160xf32>, vector<8x1x160xf32>, vector<8x1x160xf32>, vector<8x1x160xf32>, vector<8x6x160xf32> -> vector<8x16x160xf32>
    %36 = vector.extract_strided_slice %35 {offsets = [0, 0, 0], sizes = [8, 8, 160], strides = [1, 1, 1]} : vector<8x16x160xf32> to vector<8x8x160xf32>
    %37 = vector.extract_strided_slice %35 {offsets = [0, 1, 0], sizes = [8, 8, 160], strides = [1, 1, 1]} : vector<8x16x160xf32> to vector<8x8x160xf32>
    %38 = vector.extract_strided_slice %35 {offsets = [0, 2, 0], sizes = [8, 8, 160], strides = [1, 1, 1]} : vector<8x16x160xf32> to vector<8x8x160xf32>
    %39 = vector.extract_strided_slice %35 {offsets = [0, 3, 0], sizes = [8, 8, 160], strides = [1, 1, 1]} : vector<8x16x160xf32> to vector<8x8x160xf32>
    %40 = tpu.concatenate %36, %37, %38, %39 in 2 : vector<8x8x160xf32>, vector<8x8x160xf32>, vector<8x8x160xf32>, vector<8x8x160xf32> -> vector<8x8x640xf32>
    %41 = vector.shape_cast %40 : vector<8x8x640xf32> to vector<64x640xf32>
    %42 = arith.truncf %41 : vector<64x640xf32> to vector<64x640xbf16>
    %c0_8 = arith.constant 0 : index
    %c0_9 = arith.constant 0 : index
    %43 = vector.load %arg4[%c0_8, %c0_9] : memref<640x512xbf16, #tpu.memory_space<vmem>>, vector<640x512xbf16>
    %cst_10 = arith.constant dense<0.000000e+00> : vector<64x512xf32>
    %44 = tpu.matmul %42, %43, %cst_10 {dimension_numbers = #tpu.dot_dimension_numbers<[1], [0], [0], [1], [0, 0, 1, 1], [], []>} : vector<64x640xbf16>, vector<640x512xbf16>, vector<64x512xf32> -> vector<64x512xf32>
    %c0_11 = arith.constant 0 : index
    %c0_12 = arith.constant 0 : index
    %45 = vector.load %arg5[%c0_11, %c0_12] : memref<1x512xf32, #tpu.memory_space<vmem>>, vector<1x512xf32>
    %46 = vector.broadcast %45 : vector<1x512xf32> to vector<64x512xf32>
    %47 = arith.addf %44, %46 : vector<64x512xf32>
    %cst_13 = arith.constant 0.000000e+00 : f32
    %48 = vector.broadcast %cst_13 : f32 to vector<64x512xf32>
    %49 = arith.maximumf %47, %48 : vector<64x512xf32>
    %50 = vector.shape_cast %49 : vector<64x512xf32> to vector<8x8x512xf32>
    %51 = vector.extract_strided_slice %50 {offsets = [0, 0, 0], sizes = [8, 1, 512], strides = [1, 1, 1]} : vector<8x8x512xf32> to vector<8x1x512xf32>
    %52 = vector.extract_strided_slice %50 {offsets = [0, 1, 0], sizes = [8, 1, 512], strides = [1, 1, 1]} : vector<8x8x512xf32> to vector<8x1x512xf32>
    %53 = arith.maximumf %51, %52 : vector<8x1x512xf32>
    %54 = vector.extract_strided_slice %50 {offsets = [0, 2, 0], sizes = [8, 1, 512], strides = [1, 1, 1]} : vector<8x8x512xf32> to vector<8x1x512xf32>
    %55 = vector.extract_strided_slice %50 {offsets = [0, 3, 0], sizes = [8, 1, 512], strides = [1, 1, 1]} : vector<8x8x512xf32> to vector<8x1x512xf32>
    %56 = arith.maximumf %54, %55 : vector<8x1x512xf32>
    %57 = arith.maximumf %53, %56 : vector<8x1x512xf32>
    %58 = vector.shape_cast %57 : vector<8x1x512xf32> to vector<8x512xf32>
    %59 = vector.extract_strided_slice %58 {offsets = [0, 0], sizes = [8, 128], strides = [1, 1]} : vector<8x512xf32> to vector<8x128xf32>
    %60 = vector.extract_strided_slice %58 {offsets = [0, 128], sizes = [8, 128], strides = [1, 1]} : vector<8x512xf32> to vector<8x128xf32>
    %61 = arith.maximumf %59, %60 : vector<8x128xf32>
    %c64_i32 = arith.constant 64 : i32
    %62 = tpu.dynamic_rotate %61 by %c64_i32 dim 1 : vector<8x128xf32>, i32 -> vector<8x128xf32>
    %63 = arith.maximumf %61, %62 : vector<8x128xf32>
    %64 = arith.truncf %63 : vector<8x128xf32> to vector<8x128xbf16>
    %c0_14 = arith.constant 0 : index
    %c0_15 = arith.constant 0 : index
    %65 = vector.load %arg6[%c0_14, %c0_15] : memref<128x384xbf16, #tpu.memory_space<vmem>>, vector<128x384xbf16>
    %cst_16 = arith.constant dense<0.000000e+00> : vector<8x384xf32>
    %66 = tpu.matmul %64, %65, %cst_16 {dimension_numbers = #tpu.dot_dimension_numbers<[1], [0], [0], [1], [0, 0, 1, 1], [], []>} : vector<8x128xbf16>, vector<128x384xbf16>, vector<8x384xf32> -> vector<8x384xf32>
    %c0_17 = arith.constant 0 : index
    %c0_18 = arith.constant 0 : index
    %67 = vector.load %arg7[%c0_17, %c0_18] : memref<1x384xf32, #tpu.memory_space<vmem>>, vector<1x384xf32>
    %68 = vector.broadcast %67 : vector<1x384xf32> to vector<8x384xf32>
    %69 = arith.addf %66, %68 : vector<8x384xf32>
    %cst_19 = arith.constant 0.000000e+00 : f32
    %70 = vector.broadcast %cst_19 : f32 to vector<8x384xf32>
    %71 = arith.maximumf %69, %70 : vector<8x384xf32>
    %72 = arith.truncf %71 : vector<8x384xf32> to vector<8x384xbf16>
    %c0_20 = arith.constant 0 : index
    %c0_21 = arith.constant 0 : index
    %73 = vector.load %arg8[%c0_20, %c0_21] : memref<384x256xbf16, #tpu.memory_space<vmem>>, vector<384x256xbf16>
    %cst_22 = arith.constant dense<0.000000e+00> : vector<8x256xf32>
    %74 = tpu.matmul %72, %73, %cst_22 {dimension_numbers = #tpu.dot_dimension_numbers<[1], [0], [0], [1], [0, 0, 1, 1], [], []>} : vector<8x384xbf16>, vector<384x256xbf16>, vector<8x256xf32> -> vector<8x256xf32>
    %c0_23 = arith.constant 0 : index
    %c0_24 = arith.constant 0 : index
    %75 = vector.load %arg9[%c0_23, %c0_24] : memref<1x256xf32, #tpu.memory_space<vmem>>, vector<1x256xf32>
    %76 = vector.broadcast %75 : vector<1x256xf32> to vector<8x256xf32>
    %77 = arith.addf %74, %76 : vector<8x256xf32>
    %cst_25 = arith.constant 0.000000e+00 : f32
    %78 = vector.broadcast %cst_25 : f32 to vector<8x256xf32>
    %79 = arith.maximumf %77, %78 : vector<8x256xf32>
    %80 = arith.truncf %79 : vector<8x256xf32> to vector<8x256xbf16>
    %c0_26 = arith.constant 0 : index
    %c0_27 = arith.constant 0 : index
    %81 = vector.load %arg10[%c0_26, %c0_27] : memref<256x128xbf16, #tpu.memory_space<vmem>>, vector<256x128xbf16>
    %cst_28 = arith.constant dense<0.000000e+00> : vector<8x128xf32>
    %82 = tpu.matmul %80, %81, %cst_28 {dimension_numbers = #tpu.dot_dimension_numbers<[1], [0], [0], [1], [0, 0, 1, 1], [], []>} : vector<8x256xbf16>, vector<256x128xbf16>, vector<8x128xf32> -> vector<8x128xf32>
    %c0_29 = arith.constant 0 : index
    %c0_30 = arith.constant 0 : index
    %83 = vector.load %arg11[%c0_29, %c0_30] : memref<1x128xf32, #tpu.memory_space<vmem>>, vector<1x128xf32>
    %84 = vector.broadcast %83 : vector<1x128xf32> to vector<8x128xf32>
    %85 = arith.addf %82, %84 : vector<8x128xf32>
    %86 = tpu.iota {dimensions = array<i32: 1>} : vector<8x128xi32>
    %c10_i32 = arith.constant 10 : i32
    %87 = vector.broadcast %c10_i32 : i32 to vector<8x128xi32>
    %88 = arith.cmpi slt, %86, %87 : vector<8x128xi32>
    %cst_31 = arith.constant -1.000000e+30 : f32
    %89 = vector.broadcast %cst_31 : f32 to vector<8x128xf32>
    %90 = arith.select %88, %85, %89 : vector<8x128xi1>, vector<8x128xf32>
    %cst_32 = arith.constant dense<0xFF800000> : vector<8xf32>
    %91 = vector.multi_reduction <maximumf>, %90, %cst_32 [1] : vector<8x128xf32> to vector<8xf32>
    %92 = vector.shape_cast %91 : vector<8xf32> to vector<8x1xf32>
    %93 = vector.broadcast %92 : vector<8x1xf32> to vector<8x128xf32>
    %94 = arith.subf %90, %93 : vector<8x128xf32>
    %95 = math.exp %94 : vector<8x128xf32>
    %cst_33 = arith.constant dense<0.000000e+00> : vector<8xf32>
    %96 = vector.multi_reduction <add>, %95, %cst_33 [1] : vector<8x128xf32> to vector<8xf32>
    %97 = vector.shape_cast %96 : vector<8xf32> to vector<8x1xf32>
    %98 = math.log %97 : vector<8x1xf32>
    %99 = arith.addf %98, %92 : vector<8x1xf32>
    %100 = vector.broadcast %99 : vector<8x1xf32> to vector<8x128xf32>
    %101 = arith.subf %85, %100 : vector<8x128xf32>
    %c0_34 = arith.constant 0 : index
    %c0_35 = arith.constant 0 : index
    %102 = vector.load %arg12[%c0_34, %c0_35] : memref<8x128xf32, #tpu.memory_space<vmem>>, vector<8x128xf32>
    tpu.vector_store %arg12[%c0_34, %c0_35], %101 {strides = array<i32>} : memref<8x128xf32, #tpu.memory_space<vmem>>, vector<8x128xf32>,
    return
  }
  func.func @transform_0(%arg0: i32) -> (i32, i32, i32) {
    %c0_i32 = arith.constant 0 : i32
    %c0_i32_0 = arith.constant 0 : i32
    %c0_i32_1 = arith.constant 0 : i32
    return %arg0, %c0_i32, %c0_i32_0 : i32, i32, i32
  }
  func.func @transform_1(%arg0: i32) -> (i32, i32) {
    %c0_i32 = arith.constant 0 : i32
    %c0_i32_0 = arith.constant 0 : i32
    %c0_i32_1 = arith.constant 0 : i32
    return %c0_i32, %c0_i32_0 : i32, i32
  }
  func.func @transform_2(%arg0: i32) -> (i32, i32) {
    %c0_i32 = arith.constant 0 : i32
    %c0_i32_0 = arith.constant 0 : i32
    %c0_i32_1 = arith.constant 0 : i32
    return %c0_i32, %c0_i32_0 : i32, i32
  }
  func.func @transform_3(%arg0: i32) -> (i32, i32) {
    %c0_i32 = arith.constant 0 : i32
    %c0_i32_0 = arith.constant 0 : i32
    %c0_i32_1 = arith.constant 0 : i32
    return %c0_i32, %c0_i32_0 : i32, i32
  }
  func.func @transform_4(%arg0: i32) -> (i32, i32) {
    %c0_i32 = arith.constant 0 : i32
    %c0_i32_0 = arith.constant 0 : i32
    %c0_i32_1 = arith.constant 0 : i32
    return %c0_i32, %c0_i32_0 : i32, i32
  }
  func.func @transform_5(%arg0: i32) -> (i32, i32) {
    %c0_i32 = arith.constant 0 : i32
    %c0_i32_0 = arith.constant 0 : i32
    %c0_i32_1 = arith.constant 0 : i32
    return %c0_i32, %c0_i32_0 : i32, i32
  }
  func.func @transform_6(%arg0: i32) -> (i32, i32) {
    %c0_i32 = arith.constant 0 : i32
    %c0_i32_0 = arith.constant 0 : i32
    %c0_i32_1 = arith.constant 0 : i32
    return %c0_i32, %c0_i32_0 : i32, i32
  }
  func.func @transform_7(%arg0: i32) -> (i32, i32) {
    %c0_i32 = arith.constant 0 : i32
    %c0_i32_0 = arith.constant 0 : i32
    %c0_i32_1 = arith.constant 0 : i32
    return %c0_i32, %c0_i32_0 : i32, i32
  }
  func.func @transform_8(%arg0: i32) -> (i32, i32) {
    %c0_i32 = arith.constant 0 : i32
    %c0_i32_0 = arith.constant 0 : i32
    %c0_i32_1 = arith.constant 0 : i32
    return %c0_i32, %c0_i32_0 : i32, i32
  }
  func.func @transform_9(%arg0: i32) -> (i32, i32) {
    %c0_i32 = arith.constant 0 : i32
    %c0_i32_0 = arith.constant 0 : i32
    %c0_i32_1 = arith.constant 0 : i32
    return %c0_i32, %c0_i32_0 : i32, i32
  }
  func.func @transform_10(%arg0: i32) -> (i32, i32) {
    %c0_i32 = arith.constant 0 : i32
    %c0_i32_0 = arith.constant 0 : i32
    %c0_i32_1 = arith.constant 0 : i32
    return %c0_i32, %c0_i32_0 : i32, i32
  }
  func.func @transform_11(%arg0: i32) -> (i32, i32) {
    %c0_i32 = arith.constant 0 : i32
    %c0_i32_0 = arith.constant 0 : i32
    return %arg0, %c0_i32 : i32, i32
  }
}

</mosaic_0001>

<bundles_post_ra>
// kernel: cifar10net_forward.1
= control target key start
LH: loop header
LB: loop body
LE: loop exit
PB: predicated region body
PF: predicated region fallthrough
CT: control target
= control target key end

     0   :  { %16 = vsyncpa [#allocation3], 0  ;;  %s12198_s0 = inlined_call_operand.vmem [shape: bf16[8,34,128], index: 0, kind: input, shape index: {}]   ;;  %s12199_s1 = inlined_call_operand.vmem [shape: bf16[384,512], index: 1, kind: input, shape index: {}]   ;;  %s12200_s2 = inlined_call_operand.vmem [shape: f32[1,512], index: 2, kind: input, shape index: {}]   ;;  %s12201_s3 = inlined_call_operand.hbm [shape: bf16[640,512], index: 3, kind: input, shape index: {}]   ;;  %s12202_s4 = inlined_call_operand.vmem [shape: f32[1,512], index: 4, kind: input, shape index: {}]   ;;  %s12203_s5 = inlined_call_operand.hbm [shape: bf16[128,384], index: 5, kind: input, shape index: {}]   ;;  %s12204_s6 = inlined_call_operand.vmem [shape: f32[1,384], index: 6, kind: input, shape index: {}]   ;;  %s12205_s7 = inlined_call_operand.vmem [shape: bf16[384,256], index: 7, kind: input, shape index: {}]   ;;  %s12206_s8 = inlined_call_operand.vmem [shape: f32[1,256], index: 8, kind: input, shape index: {}]   ;;  %s12207_s9 = inlined_call_operand.hbm [shape: bf16[256,128], index: 9, kind: input, shape index: {}]   ;;  %s12208_s10 = inlined_call_operand.vmem [shape: f32[1,128], index: 10, kind: input, shape index: {}]   ;;  %s12209_s11 = inlined_call_operand.vmem [shape: f32[8,128], index: 11, kind: output, shape index: {}]  }
   0x1   :  { %17 = vsyncpa [#allocation5], 0  ;;  %s7954_s17 = smov [#allocation4]   ;;  %s7884_s21 = scalar_lea.hbm %s12203_s5, 3072 }
   0x2   :  { %s43_s18 = sshll.u32 %s7954_s17, 4  ;;  %p7885_p0 = scmp.ne.s32.totalorder %s12203_s5, %s7884_s21  ;;  %s44_s18 = int_to_ptr.vmem [resolvable:$true] %s43_s18 }
   0x3   :  { %p7888_p1 = scmp.lt.u32.totalorder %s7884_s21, %s12203_s5 }
   0x5   :  { %p7890_p2 = pnand %p7888_p1, %p7885_p0 }
   0x7   :  { %7893 = shalt.err (!%p7890_p2)
}
   0x8   :  { %s7894_s26 = scalar_lea.vmem %s44_s18, 3072  ;;  %p7899_p4 = scmp.lt.s32.totalorder %s44_s18, %s44_s18 }
   0x9   :  { %p7895_p3 = scmp.ne.s32.totalorder %s44_s18, %s7894_s26  ;;  %p7900_p5 = scmp.lt.s32.totalorder %s7894_s26, %s7894_s26 }
   0xb   :  { %p7901_p6 = por %p7900_p5, %p7899_p4 }
   0xd   :  { %p7902_p7 = pnand %p7901_p6, %p7895_p3 }
   0xf   :  { %7905 = shalt.err (!%p7902_p7)
}
  0x10   :  { %s7955_s27 = smov 192   ;;  %s7956_s28 = smov 12  }
  0x11   :  { %49 = dma.hbm_to_vmem [thread:$0]  %s12203_s5, 3072, %s44_s18, [#allocation5], %s7955_s27, %s7955_s27, %s7956_s28  }
  0x12   :  { %s7957_s12 = smov [#allocation2]   ;;  %s7906_s16 = scalar_lea.hbm %s12201_s3, 20480 }
  0x13   :  { %s29_s13 = sshll.u32 %s7957_s12, 4  ;;  %p7907_p8 = scmp.ne.s32.totalorder %s12201_s3, %s7906_s16  ;;  %s30_s13 = int_to_ptr.vmem [resolvable:$true] %s29_s13 }
  0x14   :  { %p7910_p9 = scmp.lt.u32.totalorder %s7906_s16, %s12201_s3 }
  0x16   :  { %p7912_p10 = pnand %p7910_p9, %p7907_p8 }
  0x18   :  { %7915 = shalt.err (!%p7912_p10)
}
  0x19   :  { %s7916_s22 = scalar_lea.vmem %s30_s13, 20480  ;;  %p7921_p12 = scmp.lt.s32.totalorder %s30_s13, %s30_s13 }
  0x1a   :  { %p7917_p11 = scmp.ne.s32.totalorder %s30_s13, %s7916_s22  ;;  %p7922_p13 = scmp.lt.s32.totalorder %s7916_s22, %s7916_s22 }
  0x1c   :  { %p7923_p0 = por %p7922_p13, %p7921_p12 }
  0x1e   :  { %p7924_p1 = pnand %p7923_p0, %p7917_p11 }
  0x20   :  { %7927 = shalt.err (!%p7924_p1)
}
  0x21   :  { %s7958_s5 = smov 256   ;;  %s7959_s18 = smov 16  }
  0x22   :  { %35 = dma.hbm_to_vmem [thread:$0]  %s12201_s3, 20480, %s30_s13, [#allocation3], %s7958_s5, %s7958_s5, %s7959_s18  }
  0x23   :  { %s7960_s25 = smov [#allocation6]   ;;  %s7928_s29 = scalar_lea.hbm %s12207_s9, 2048 }
  0x24   :  { %s61_s26 = sshll.u32 %s7960_s25, 4  ;;  %p7929_p2 = scmp.ne.s32.totalorder %s12207_s9, %s7928_s29  ;;  %s62_s26 = int_to_ptr.vmem [resolvable:$true] %s61_s26 }
  0x25   :  { %p7932_p3 = scmp.lt.u32.totalorder %s7928_s29, %s12207_s9 }
  0x27   :  { %p7934_p4 = pnand %p7932_p3, %p7929_p2 }
  0x29   :  { %7937 = shalt.err (!%p7934_p4)
}
  0x2a   :  { %s7938_s16 = scalar_lea.vmem %s62_s26, 2048  ;;  %p7943_p6 = scmp.lt.s32.totalorder %s62_s26, %s62_s26 }
  0x2b   :  { %p7939_p5 = scmp.ne.s32.totalorder %s62_s26, %s7938_s16  ;;  %p7944_p7 = scmp.lt.s32.totalorder %s7938_s16, %s7938_s16 }
  0x2d   :  { %p7945_p8 = por %p7944_p7, %p7943_p6 }
  0x2f   :  { %p7946_p9 = pnand %p7945_p8, %p7939_p5 }
  0x31   :  { %7949 = shalt.err (!%p7946_p9)
}
  0x32   :  { %s7961_s3 = smov 64   ;;  %s7962_s13 = smov 4  }
  0x33   :  { %67 = dma.hbm_to_vmem [thread:$0]  %s12207_s9, 2048, %s62_s26, [#allocation5], %s7961_s3, %s7961_s3, %s7962_s13  }
  0x34   :  { %7950 = dma.done.wait [#allocation3], 20480  }
  0x35   :  { %7951 = vsyncadd [#allocation3], 4294946816 }
  0x36   :  { %7952 = dma.done.wait [#allocation5], 5120  }
  0x37   :  { %7953 = vsyncadd [#allocation5], 4294962176  ;;  %v7472_v0 = vld [vmem:[%s12199_s1 + $0x4] ss:$16 sps:$4 sm:$0xff]   ;;  %v7474_v1 = vld [vmem:[%s12199_s1 + $0xc] ss:$16 sps:$4 sm:$0xff]  }
  0x38   :  { %1072 = vmatprep.subr.bf16.mxu0 %v7472_v0  ;;  %v7476_v2 = vld [vmem:[%s12199_s1] ss:$16 sps:$4 sm:$0xff]   ;;  %v7477_v3 = vld [vmem:[%s12199_s1 + $0x8] ss:$16 sps:$4 sm:$0xff]   ;;  %1458 = vmatprep.subr.bf16.mxu1 %v7474_v1  ;;  %v7478_v4 = vld [vmem:[%s12199_s1 + $0x24] ss:$16 sps:$4 sm:$0xff]  }
  0x39   :  { %1073 = vmatpush1.bf16.msra.mxu0 %v7476_v2  ;;  %1459 = vmatpush1.bf16.msra.mxu1 %v7477_v3  ;;  %v7480_v5 = vld [vmem:[%s12199_s1 + $0x2c] ss:$16 sps:$4 sm:$0xff]   ;;  %v7482_v6 = vld [vmem:[%s12199_s1 + $0x20] ss:$16 sps:$4 sm:$0xff]   ;;  %v7483_v7 = vld [vmem:[%s12199_s1 + $0x28] ss:$16 sps:$4 sm:$0xff]  }
  0x3a   :  { %1074 = vmatprep.subr.bf16.mxu0 %v7478_v4  ;;  %1460 = vmatprep.subr.bf16.mxu1 %v7480_v5  ;;  %v7484_v8 = vld [vmem:[%s12199_s1 + $0x44] ss:$16 sps:$4 sm:$0xff]   ;;  %v7486_v9 = vld [vmem:[%s12199_s1 + $0x4c] ss:$16 sps:$4 sm:$0xff]   ;;  %v7488_v10 = vld [vmem:[%s12199_s1 + $0x40] ss:$16 sps:$4 sm:$0xff]  }
  0x3b   :  { %v7489_v11 = vld [vmem:[%s12199_s1 + $0x48] ss:$16 sps:$4 sm:$0xff]   ;;  %v7490_v12 = vld [vmem:[%s12199_s1 + $0x64] ss:$16 sps:$4 sm:$0xff]   ;;  %v7492_v13 = vld [vmem:[%s12199_s1 + $0x6c] ss:$16 sps:$4 sm:$0xff]  }
  0x3c   :  { %v7494_v14 = vld [vmem:[%s12199_s1 + $0x60] ss:$16 sps:$4 sm:$0xff]   ;;  %v7495_v15 = vld [vmem:[%s12199_s1 + $0x68] ss:$16 sps:$4 sm:$0xff]   ;;  %v7496_v16 = vld [vmem:[%s12199_s1 + $0x84] ss:$16 sps:$4 sm:$0xff]  }
  0x3d   :  { %1075 = vmatpush1.bf16.msra.mxu0 %v7482_v6  ;;  %1461 = vmatpush1.bf16.msra.mxu1 %v7483_v7  ;;  %v7498_v17 = vld [vmem:[%s12199_s1 + $0x8c] ss:$16 sps:$4 sm:$0xff]   ;;  %v7500_v18 = vld [vmem:[%s12199_s1 + $0x80] ss:$16 sps:$4 sm:$0xff]   ;;  %v7501_v19 = vld [vmem:[%s12199_s1 + $0x88] ss:$16 sps:$4 sm:$0xff]  }
  0x3e   :  { %1076 = vmatprep.subr.bf16.mxu0 %v7484_v8  ;;  %1462 = vmatprep.subr.bf16.mxu1 %v7486_v9  ;;  %v7502_v20 = vld [vmem:[%s12199_s1 + $0xa4] ss:$16 sps:$4 sm:$0xff]   ;;  %v7504_v21 = vld [vmem:[%s12199_s1 + $0xac] ss:$16 sps:$4 sm:$0xff]   ;;  %v7506_v22 = vld [vmem:[%s12199_s1 + $0xa0] ss:$16 sps:$4 sm:$0xff]  }
  0x3f   :  { %v7507_v23 = vld [vmem:[%s12199_s1 + $0xa8] ss:$16 sps:$4 sm:$0xff]   ;;  %v7508_v24 = vld [vmem:[%s12199_s1 + $0xc4] ss:$16 sps:$4 sm:$0xff]   ;;  %v7510_v25 = vld [vmem:[%s12199_s1 + $0xcc] ss:$16 sps:$4 sm:$0xff]  }
  0x40   :  { %v7512_v26 = vld [vmem:[%s12199_s1 + $0xc0] ss:$16 sps:$4 sm:$0xff]   ;;  %v7513_v27 = vld [vmem:[%s12199_s1 + $0xc8] ss:$16 sps:$4 sm:$0xff]   ;;  %v7514_v28 = vld [vmem:[%s12199_s1 + $0xe4] ss:$16 sps:$4 sm:$0xff]  }
  0x41   :  { %1077 = vmatpush1.bf16.msra.mxu0 %v7488_v10  ;;  %1463 = vmatpush1.bf16.msra.mxu1 %v7489_v11  ;;  %v7516_v29 = vld [vmem:[%s12199_s1 + $0xec] ss:$16 sps:$4 sm:$0xff]   ;;  %v7518_v30 = vld [vmem:[%s12199_s1 + $0xe0] ss:$16 sps:$4 sm:$0xff]   ;;  %v7519_v31 = vld [vmem:[%s12199_s1 + $0xe8] ss:$16 sps:$4 sm:$0xff]  }
  0x42   :  { %1078 = vmatprep.subr.bf16.mxu0 %v7490_v12  ;;  %1464 = vmatprep.subr.bf16.mxu1 %v7492_v13  ;;  %v7520_v32 = vld [vmem:[%s12199_s1 + $0x104] ss:$16 sps:$4 sm:$0xff]   ;;  %v7522_v33 = vld [vmem:[%s12199_s1 + $0x10c] ss:$16 sps:$4 sm:$0xff]   ;;  %v7524_v34 = vld [vmem:[%s12199_s1 + $0x100] ss:$16 sps:$4 sm:$0xff]  }
  0x43   :  { %v7525_v35 = vld [vmem:[%s12199_s1 + $0x108] ss:$16 sps:$4 sm:$0xff]   ;;  %v7526_v36 = vld [vmem:[%s12199_s1 + $0x124] ss:$16 sps:$4 sm:$0xff]   ;;  %v7528_v37 = vld [vmem:[%s12199_s1 + $0x12c] ss:$16 sps:$4 sm:$0xff]  }
  0x44   :  { %v7530_v38 = vld [vmem:[%s12199_s1 + $0x120] ss:$16 sps:$4 sm:$0xff]   ;;  %v7531_v39 = vld [vmem:[%s12199_s1 + $0x128] ss:$16 sps:$4 sm:$0xff]   ;;  %v7532_v40 = vld [vmem:[%s12199_s1 + $0x144] ss:$16 sps:$4 sm:$0xff]  }
  0x45   :  { %1079 = vmatpush1.bf16.msra.mxu0 %v7494_v14  ;;  %1465 = vmatpush1.bf16.msra.mxu1 %v7495_v15  ;;  %v7534_v41 = vld [vmem:[%s12199_s1 + $0x14c] ss:$16 sps:$4 sm:$0xff]   ;;  %v7536_v42 = vld [vmem:[%s12199_s1 + $0x140] ss:$16 sps:$4 sm:$0xff]   ;;  %v7537_v43 = vld [vmem:[%s12199_s1 + $0x148] ss:$16 sps:$4 sm:$0xff]  }
  0x46   :  { %1080 = vmatprep.subr.bf16.mxu0 %v7496_v16  ;;  %1466 = vmatprep.subr.bf16.mxu1 %v7498_v17  ;;  %v7538_v44 = vld [vmem:[%s12199_s1 + $0x164] ss:$16 sps:$4 sm:$0xff]   ;;  %v7540_v45 = vld [vmem:[%s12199_s1 + $0x16c] ss:$16 sps:$4 sm:$0xff]   ;;  %v7542_v46 = vld [vmem:[%s12199_s1 + $0x160] ss:$16 sps:$4 sm:$0xff]  }
  0x47   :  { %v7543_v47 = vld [vmem:[%s12199_s1 + $0x168] ss:$16 sps:$4 sm:$0xff]   ;;  %v8213_v48 = vld [vmem:[%s12198_s0] sm:$0xff]   ;;  %vm240_vm0 = vsmask.f32 7424  ;;  %vm417_vm1 = vcmask 1046528  }
  0x48   :  { %v8218_v49 = vld [vmem:[%s12198_s0 + $0x8] sm:$0xff]   ;;  %v7544_v50 = vld [vmem:[%s12199_s1 + $0x184] ss:$16 sps:$4 sm:$0xff]   ;;  %v242_v52 = vshrl.u32 %v8213_v48, 16  ;;  %v244_v53 = vshll.u32 %v8213_v48, 16  ;;  %v8290_v15 = vld [vmem:[%s12198_s0 + $0x1c] sm:$0xff]  }
  0x49   :  { %1081 = vmatpush1.bf16.msra.mxu0 %v7500_v18  ;;  %1467 = vmatpush1.bf16.msra.mxu1 %v7501_v19  ;;  %v7546_v51 = vld [vmem:[%s12199_s1 + $0x18c] ss:$16 sps:$4 sm:$0xff]   ;;  %v249_v54 = vshll.u32 %v8218_v49, 16  ;;  %v7548_v55 = vld [vmem:[%s12199_s1 + $0x180] ss:$16 sps:$4 sm:$0xff]   ;;  %v8266_v6 = vld [vmem:[%s12198_s0 + $0x14] sm:$0xff]  }
  0x4a   :  { %1082 = vmatprep.subr.bf16.mxu0 %v7502_v20  ;;  %1468 = vmatprep.subr.bf16.mxu1 %v7504_v21  ;;  %v7549_v56 = vld [vmem:[%s12199_s1 + $0x188] ss:$16 sps:$4 sm:$0xff]   ;;  %v7550_v57 = vld [vmem:[%s12199_s1 + $0x1a4] ss:$16 sps:$4 sm:$0xff]   ;;  %v7552_v58 = vld [vmem:[%s12199_s1 + $0x1ac] ss:$16 sps:$4 sm:$0xff]  }
  0x4b   :  { %v246_v59 = vrot.slane %v244_v53, 1  ;;  %v251_v60 = vrot.slane %v249_v54, 1  ;;  %v7554_v62 = vld [vmem:[%s12199_s1 + $0x1a0] ss:$16 sps:$4 sm:$0xff]   ;;  %v7555_v63 = vld [vmem:[%s12199_s1 + $0x1a8] ss:$16 sps:$4 sm:$0xff]  }
  0x4c   :  { %v7556_v1 = vld [vmem:[%s12199_s1 + $0x1c4] ss:$16 sps:$4 sm:$0xff]   ;;  %v7558_v2 = vld [vmem:[%s12199_s1 + $0x1cc] ss:$16 sps:$4 sm:$0xff]   ;;  %v7560_v3 = vld [vmem:[%s12199_s1 + $0x1c0] ss:$16 sps:$4 sm:$0xff]  }
  0x4d   :  { %1083 = vmatpush1.bf16.msra.mxu0 %v7506_v22  ;;  %1469 = vmatpush1.bf16.msra.mxu1 %v7507_v23  ;;  %v247_v61 = vor.u32 %v246_v59, %v242_v52  ;;  %v7576_v4 = vld [vmem:[%s12198_s0 + $0x10] ss:$0 sps:$4 sm:$0x11]   ;;  %v7561_v5 = vld [vmem:[%s12199_s1 + $0x1c8] ss:$16 sps:$4 sm:$0xff]   ;;  %v253_v9 = vshrl.u32 %v8218_v49, 16 }
  0x4e   :  { %1084 = vmatprep.subr.bf16.mxu0 %v7508_v24  ;;  %1470 = vmatprep.subr.bf16.mxu1 %v7510_v25  ;;  %v7562_v7 = vld [vmem:[%s12199_s1 + $0x1e4] ss:$16 sps:$4 sm:$0xff]   ;;  %v7564_v8 = vld [vmem:[%s12199_s1 + $0x1ec] ss:$16 sps:$4 sm:$0xff]   ;;  %v257_v10 = vshll.u32 %v7576_v4, 16  ;;  %v264_v16 = vshll.u32 %v8266_v6, 16 }
  0x4f   :  { %v252_v0 = vsel %vm240_vm0, %v247_v61, %v251_v60  ;;  %v7566_v11 = vld [vmem:[%s12199_s1 + $0x1e0] ss:$16 sps:$4 sm:$0xff]   ;;  %v7567_v12 = vld [vmem:[%s12199_s1 + $0x1e8] ss:$16 sps:$4 sm:$0xff]   ;;  %v7572_v13 = vld [vmem:[%s12199_s1 + $0x204] ss:$16 sps:$4 sm:$0xff]   ;;  %v255_v17 = vor.u32 %v253_v9, %v251_v60 }
  0x50   :  { %1104 = vmatprep.mubr.bf16.mxu0 %v252_v0  ;;  %1490 = vmatprep.mubr.bf16.mxu1 %v252_v0  ;;  %v7575_v14 = vld [vmem:[%s12199_s1 + $0x20c] ss:$16 sps:$4 sm:$0xff]   ;;  %v259_v18 = vrot.slane %v257_v10, 1  ;;  %v7570_v19 = vld [vmem:[%s12199_s1 + $0x200] ss:$16 sps:$4 sm:$0xff]   ;;  %v262_v21 = vshrl.u32 %v8266_v6, 16 }
  0x51   :  { %1085 = vmatpush1.bf16.msra.mxu0 %v7512_v26  ;;  %1471 = vmatpush1.bf16.msra.mxu1 %v7513_v27  ;;  %v7573_v20 = vld [vmem:[%s12199_s1 + $0x208] ss:$16 sps:$4 sm:$0xff]   ;;  %v269_v22 = vshll.u32 %v8290_v15, 16  ;;  %v266_v23 = vrot.slane %v264_v16, 1  ;;  %v7581_v24 = vld [vmem:[%s12199_s1 + $0x224] ss:$16 sps:$4 sm:$0xff]  }
  0x52   :  { %1086 = vmatprep.subr.bf16.mxu0 %v7514_v28  ;;  %1472 = vmatprep.subr.bf16.mxu1 %v7516_v29  ;;  %v7584_v25 = vld [vmem:[%s12199_s1 + $0x22c] ss:$16 sps:$4 sm:$0xff]   ;;  %v260_v26 = vsel %vm240_vm0, %v255_v17, %v259_v18  ;;  %v7579_v27 = vld [vmem:[%s12199_s1 + $0x220] ss:$16 sps:$4 sm:$0xff]   ;;  %v7582_v28 = vld [vmem:[%s12199_s1 + $0x228] ss:$16 sps:$4 sm:$0xff]  }
  0x53   :  { %v8317_v29 = vld [vmem:[%s12198_s0 + $0x24] ss:$0 sps:$4 sm:$0x11]   ;;  %v423_v59 = vrot.slane %v8266_v6, 1  ;;  %v7620_v0 = vld [vmem:[%s12199_s1 + $0x2ac] ss:$16 sps:$4 sm:$0xff]  }
  0x54   :  { %v7608_v54 = vld [vmem:[%s12199_s1 + $0x284] ss:$16 sps:$4 sm:$0xff]   ;;  %v8416_v10 = vld [vmem:[%s12198_s0 + $0x3c] sm:$0xff]   ;;  %v7627_v16 = vld [vmem:[%s12199_s1 + $0x2c8] ss:$16 sps:$4 sm:$0xff]   ;;  %vm2581_vm2 = vcmask 1045504  }
  0x55   :  { %1087 = vmatpush1.bf16.msra.mxu0 %v7518_v30  ;;  %1473 = vmatpush1.bf16.msra.mxu1 %v7519_v31  ;;  %v7590_v30 = vld [vmem:[%s12199_s1 + $0x244] ss:$16 sps:$4 sm:$0xff]   ;;  %v418_v31 = vrot.slane %v8213_v48, 1  ;;  %vm3254_vm3 = vcmask 785408   ;;  %vm3575_vm4 = vcmask 523264   ;;  %vm4024_vm5 = vcmask 1040384  }
  0x56   :  { %1088 = vmatprep.subr.bf16.mxu0 %v7520_v32  ;;  %1474 = vmatprep.subr.bf16.mxu1 %v7522_v33  ;;  %v271_v32 = vrot.slane %v269_v22, 1  ;;  %v267_v33 = vor.u32 %v266_v23, %v262_v21  ;;  %v7635_v17 = vld [vmem:[%s12199_s1 + $0x2e4] ss:$16 sps:$4 sm:$0xff]   ;;  %v7633_v21 = vld [vmem:[%s12199_s1 + $0x2e0] ss:$16 sps:$4 sm:$0xff]   ;;  %vm4041_vm6 = vcmask 1041408  }
  0x57   :  { %v7636_v22 = vld [vmem:[%s12199_s1 + $0x2e8] ss:$16 sps:$4 sm:$0xff]   ;;  %vm4058_vm7 = vcmask 1042432   ;;  %vm4075_vm8 = vcmask 1043456   ;;  %vm4092_vm9 = vcmask 1044480   ;;  %s7965_s9 = smov 32  }
  0x58   :  { %vm4285_vm10 = vcmask 261120   ;;  %vm5434_vm11 = vcmask 1041409   ;;  %vm5437_vm12 = vcmask 1042434   ;;  %vm5440_vm13 = vcmask 1043459  }
  0x59   :  { %1089 = vmatpush1.bf16.msra.mxu0 %v7524_v34  ;;  %1475 = vmatpush1.bf16.msra.mxu1 %v7525_v35  ;;  %v7593_v34 = vld [vmem:[%s12199_s1 + $0x24c] ss:$16 sps:$4 sm:$0xff]   ;;  %v419_v35 = vrot.slane %v8218_v49, 1  ;;  %vm5443_vm14 = vcmask 1044484   ;;  %vm5446_vm15 = vcmask 1045509  }
  0x5a   :  { %1090 = vmatprep.subr.bf16.mxu0 %v7526_v36  ;;  %1476 = vmatprep.subr.bf16.mxu1 %v7528_v37  ;;  %v421_v36 = vrot.slane %v7576_v4, 1  ;;  %v273_v37 = vshrl.u32 %v8290_v15, 16 }
  0x5d   :  { %1091 = vmatpush1.bf16.msra.mxu0 %v7530_v38  ;;  %1477 = vmatpush1.bf16.msra.mxu1 %v7531_v39  ;;  %v277_v38 = vshll.u32 %v8317_v29, 16  ;;  %v8334_v39 = vld [vmem:[%s12198_s0 + $0x28] sm:$0xff]  }
  0x5e   :  { %1092 = vmatprep.subr.bf16.mxu0 %v7532_v40  ;;  %1478 = vmatprep.subr.bf16.mxu1 %v7534_v41  ;;  %v8337_v40 = vsel %vm417_vm1, %v418_v31, %v419_v35  ;;  %v8340_v41 = vsel %vm417_vm1, %v419_v35, %v421_v36  ;;  %v282_v52 = vshrl.u32 %v8334_v39, 16  ;;  %v284_v53 = vshll.u32 %v8334_v39, 16 }
  0x60   :  { %v286_v61 = vrot.slane %v284_v53, 1 }
  0x61   :  { %1093 = vmatpush1.bf16.msra.mxu0 %v7536_v42  ;;  %1479 = vmatpush1.bf16.msra.mxu1 %v7537_v43  ;;  %v7588_v42 = vld [vmem:[%s12199_s1 + $0x240] ss:$16 sps:$4 sm:$0xff]   ;;  %v7591_v43 = vld [vmem:[%s12199_s1 + $0x248] ss:$16 sps:$4 sm:$0xff]  }
  0x62   :  { %1094 = vmatprep.subr.bf16.mxu0 %v7538_v44  ;;  %1480 = vmatprep.subr.bf16.mxu1 %v7540_v45  ;;  %v272_v44 = vsel %vm240_vm0, %v267_v33, %v271_v32  ;;  %v7599_v45 = vld [vmem:[%s12199_s1 + $0x264] ss:$16 sps:$4 sm:$0xff]  }
  0x65   :  { %1095 = vmatpush1.bf16.msra.mxu0 %v7542_v46  ;;  %1481 = vmatpush1.bf16.msra.mxu1 %v7543_v47  ;;  %v7602_v46 = vld [vmem:[%s12199_s1 + $0x26c] ss:$16 sps:$4 sm:$0xff]   ;;  %v8360_v47 = vld [vmem:[%s12198_s0 + $0x30] sm:$0xff]  }
  0x66   :  { %1096 = vmatprep.subr.bf16.mxu0 %v7544_v50  ;;  %1482 = vmatprep.subr.bf16.mxu1 %v7546_v51  ;;  %v7597_v50 = vld [vmem:[%s12199_s1 + $0x260] ss:$16 sps:$4 sm:$0xff]   ;;  %v275_v51 = vor.u32 %v273_v37, %v271_v32  ;;  %v293_v9 = vshrl.u32 %v8360_v47, 16  ;;  %v429_v23 = vrot.slane %v8360_v47, 1 }
  0x67   :  { %v7603_v32 = vld [vmem:[%s12198_s0 + $0x4c] ss:$0 sps:$4 sm:$0x11]   ;;  %v8468_v37 = vld [vmem:[%s12198_s0 + $0x50] sm:$0xff]  }
  0x69   :  { %1097 = vmatpush1.bf16.msra.mxu0 %v7548_v55  ;;  %1483 = vmatpush1.bf16.msra.mxu1 %v7549_v56  ;;  %v7611_v55 = vld [vmem:[%s12199_s1 + $0x28c] ss:$16 sps:$4 sm:$0xff]   ;;  %v289_v56 = vshll.u32 %v8360_v47, 16 }
  0x6a   :  { %1098 = vmatprep.subr.bf16.mxu0 %v7550_v57  ;;  %1484 = vmatprep.subr.bf16.mxu1 %v7552_v58  ;;  %v7606_v57 = vld [vmem:[%s12199_s1 + $0x280] ss:$16 sps:$4 sm:$0xff]   ;;  %v7609_v58 = vld [vmem:[%s12199_s1 + $0x288] ss:$16 sps:$4 sm:$0xff]  }
  0x6d   :  { %1099 = vmatpush1.bf16.msra.mxu0 %v7554_v62  ;;  %1485 = vmatpush1.bf16.msra.mxu1 %v7555_v63  ;;  %v7617_v62 = vld [vmem:[%s12199_s1 + $0x2a4] ss:$16 sps:$4 sm:$0xff]   ;;  %v424_v63 = vrot.slane %v8290_v15, 1 }
  0x6e   :  { %1100 = vmatprep.subr.bf16.mxu0 %v7556_v1  ;;  %1486 = vmatprep.subr.bf16.mxu1 %v7558_v2  ;;  %v291_v1 = vrot.slane %v289_v56, 1  ;;  %v7594_v2 = vld [vmem:[%s12198_s0 + $0x38] ss:$0 sps:$4 sm:$0x11]   ;;  %v436_v56 = vrot.slane %v7603_v32, 1 }
  0x6f   :  { %v8401_v4 = vsel %vm417_vm1, %v423_v59, %v424_v63  ;;  %v431_v33 = vrot.slane %v7594_v2, 1  ;;  %v8503_v59 = vld [vmem:[%s12198_s0 + $0x6c] sm:$0xff]  }
  0x71   :  { %1101 = vmatpush1.bf16.msra.mxu0 %v7560_v3  ;;  %1487 = vmatpush1.bf16.msra.mxu1 %v7561_v5  ;;  %v7615_v3 = vld [vmem:[%s12199_s1 + $0x2a0] ss:$16 sps:$4 sm:$0xff]   ;;  %v287_v5 = vor.u32 %v286_v61, %v282_v52  ;;  %v8463_v36 = vsel %vm417_vm1, %v429_v23, %v431_v33  ;;  %v322_v52 = vshrl.u32 %v8468_v37, 16 }
  0x72   :  { %1102 = vmatprep.subr.bf16.mxu0 %v7562_v7  ;;  %1488 = vmatprep.subr.bf16.mxu1 %v7564_v8  ;;  %v7626_v7 = vld [vmem:[%s12199_s1 + $0x2c4] ss:$16 sps:$4 sm:$0xff]   ;;  %v7629_v8 = vld [vmem:[%s12199_s1 + $0x2cc] ss:$16 sps:$4 sm:$0xff]  }
  0x75   :  { %1103 = vmatpush1.bf16.msra.mxu0 %v7566_v11  ;;  %1489 = vmatpush1.bf16.msra.mxu1 %v7567_v12  ;;  %v426_v11 = vrot.slane %v8317_v29, 1  ;;  %v292_v12 = vsel %vm240_vm0, %v287_v5, %v291_v1  ;;  %v302_v29 = vshrl.u32 %v8416_v10, 16  ;;  %v349_v5 = vshll.u32 %v8503_v59, 16 }
  0x76   :  { %1265 = vmatprep.subr.bf16.mxu0 %v7572_v13  ;;  %1651 = vmatprep.subr.bf16.mxu1 %v7575_v14  ;;  %v297_v13 = vshll.u32 %v7594_v2, 16  ;;  %v7624_v14 = vld [vmem:[%s12199_s1 + $0x2c0] ss:$16 sps:$4 sm:$0xff]  }
  0x77   :  { %v8430_v18 = vsel %vm417_vm1, %v424_v63, %v426_v11  ;;  %v8527_v11 = vld [vmem:[%s12198_s0 + $0x78] sm:$0xff]  }
  0x78   :  { %1105 = vmatmul.mubr.bf16.vlgmr.msra.gmra.mrb[0].mxu0 %v8213_v48  ;;  %1491 = vmatmul.mubr.bf16.vlgmr.msra.gmra.mrb[0].mxu1 %v8213_v48  ;;  %v279_v48 = vrot.slane %v277_v38, 1 }
  0x79   :  { %1266 = vmatpush1.bf16.msra.mxu0 %v7570_v19  ;;  %1652 = vmatpush1.bf16.msra.mxu1 %v7573_v20  ;;  %v8437_v19 = vld [vmem:[%s12198_s0 + $0x44] sm:$0xff]   ;;  %v7638_v20 = vld [vmem:[%s12199_s1 + $0x2ec] ss:$16 sps:$4 sm:$0xff]  }
  0x7a   :  { %1114 = vmatprep.mubr.bf16.mxu0 %v260_v26  ;;  %1500 = vmatprep.mubr.bf16.mxu1 %v260_v26  ;;  %v280_v60 = vsel %vm240_vm0, %v275_v51, %v279_v48  ;;  %v304_v26 = vshll.u32 %v8416_v10, 16  ;;  %v309_v31 = vshll.u32 %v8437_v19, 16 }
  0x7b   :  { %1267 = vmatprep.subr.bf16.mxu0 %v7581_v24  ;;  %1653 = vmatprep.subr.bf16.mxu1 %v7584_v25  ;;  %v295_v24 = vor.u32 %v293_v9, %v291_v1  ;;  %v299_v25 = vrot.slane %v297_v13, 1 }
  0x7c   :  { %v311_v35 = vrot.slane %v309_v31, 1 }
  0x7d   :  { %1268 = vmatpush1.bf16.msra.mxu0 %v7579_v27  ;;  %1654 = vmatpush1.bf16.msra.mxu1 %v7582_v28  ;;  %v300_v28 = vsel %vm240_vm0, %v295_v24, %v299_v25 }
  0x7e   :  { %1269 = vmatprep.subr.bf16.mxu0 %v7590_v30  ;;  %1655 = vmatprep.subr.bf16.mxu1 %v7593_v34  ;;  %v306_v30 = vrot.slane %v304_v26, 1 }
  0x80   :  { %1115 = vmatmul.mubr.bf16.gmra.mrb[4].mxu0 %v8218_v49  ;;  %1501 = vmatmul.mubr.bf16.gmra.mrb[4].mxu1 %v8218_v49  ;;  %v7600_v49 = vld [vmem:[%s12199_s1 + $0x268] ss:$16 sps:$4 sm:$0xff]   ;;  %v307_v34 = vor.u32 %v306_v30, %v302_v29  ;;  %v8555_v30 = vld [vmem:[%s12198_s0 + $0x8c] sm:$0xff]  }
  0x81   :  { %1124 = vmatprep.mubr.bf16.mxu0 %v272_v44  ;;  %1510 = vmatprep.mubr.bf16.mxu1 %v272_v44  ;;  %v433_v44 = vrot.slane %v8416_v10, 1 }
  0x82   :  { %1270 = vmatpush1.bf16.msra.mxu0 %v7588_v42  ;;  %1656 = vmatpush1.bf16.msra.mxu1 %v7591_v43  ;;  %v312_v38 = vsel %vm240_vm0, %v307_v34, %v311_v35  ;;  %v317_v42 = vshll.u32 %v7603_v32, 16  ;;  %v8477_v43 = vld [vmem:[%s12198_s0 + $0x58] sm:$0xff]  }
  0x83   :  { %1271 = vmatprep.subr.bf16.mxu0 %v7599_v45  ;;  %1657 = vmatprep.subr.bf16.mxu1 %v7602_v46  ;;  %v434_v45 = vrot.slane %v8437_v19, 1  ;;  %v8563_v32 = vld [vmem:[%s12198_s0 + $0x94] sm:$0xff]  }
  0x84   :  { %v319_v48 = vrot.slane %v317_v42, 1 }
  0x85   :  { %v8483_v51 = vsel %vm417_vm1, %v433_v44, %v434_v45  ;;  %v389_v44 = vshll.u32 %v8563_v32, 16 }
  0x86   :  { %1272 = vmatpush1.bf16.msra.mxu0 %v7597_v50  ;;  %1658 = vmatpush1.bf16.msra.mxu1 %v7600_v49  ;;  %v324_v50 = vshll.u32 %v8468_v37, 16  ;;  %v329_v49 = vshll.u32 %v8477_v43, 16 }
  0x87   :  { %1273 = vmatprep.subr.bf16.mxu0 %v7608_v54  ;;  %1659 = vmatprep.subr.bf16.mxu1 %v7611_v55  ;;  %v8491_v54 = vld [vmem:[%s12198_s0 + $0x60] ss:$0 sps:$4 sm:$0x11]   ;;  %v8496_v55 = vld [vmem:[%s12198_s0 + $0x64] sm:$0xff]  }
  0x88   :  { %1125 = vmatmul.mubr.bf16.gmra.mrb[8].mxu0 %v8266_v6  ;;  %1511 = vmatmul.mubr.bf16.gmra.mrb[8].mxu1 %v8266_v6  ;;  %v7618_v6 = vld [vmem:[%s12199_s1 + $0x2a8] ss:$16 sps:$4 sm:$0xff]   ;;  %v326_v53 = vrot.slane %v324_v50, 1  ;;  %v337_v61 = vshll.u32 %v8491_v54, 16  ;;  %v342_v2 = vshrl.u32 %v8496_v55, 16 }
  0x89   :  { %1134 = vmatprep.mubr.bf16.mxu0 %v280_v60  ;;  %1520 = vmatprep.mubr.bf16.mxu1 %v280_v60  ;;  %v8506_v60 = vsel %vm417_vm1, %v434_v45, %v436_v56 }
  0x8a   :  { %1274 = vmatpush1.bf16.msra.mxu0 %v7606_v57  ;;  %1660 = vmatpush1.bf16.msra.mxu1 %v7609_v58  ;;  %v327_v57 = vor.u32 %v326_v53, %v322_v52  ;;  %v331_v58 = vrot.slane %v329_v49, 1  ;;  %v339_v1 = vrot.slane %v337_v61, 1 }
  0x8b   :  { %1275 = vmatprep.subr.bf16.mxu0 %v7617_v62  ;;  %1661 = vmatprep.subr.bf16.mxu1 %v7620_v0  ;;  %v344_v62 = vshll.u32 %v8496_v55, 16  ;;  %v333_v0 = vshrl.u32 %v8477_v43, 16 }
  0x8c   :  { %v332_v63 = vsel %vm240_vm0, %v327_v57, %v331_v58  ;;  %v12212_v57 = vmov 0  }
  0x8e   :  { %1276 = vmatpush1.bf16.msra.mxu0 %v7615_v3  ;;  %1662 = vmatpush1.bf16.msra.mxu1 %v7618_v6  ;;  %v346_v3 = vrot.slane %v344_v62, 1  ;;  %v335_v6 = vor.u32 %v333_v0, %v331_v58  ;;  %v453_v62 = vrot.slane %v8555_v30, 1 }
  0x8f   :  { %1277 = vmatprep.subr.bf16.mxu0 %v7626_v7  ;;  %1663 = vmatprep.subr.bf16.mxu1 %v7629_v8  ;;  %v8522_v8 = vld [vmem:[%s12198_s0 + $0x74] ss:$0 sps:$4 sm:$0x11]  }
  0x90   :  { %1135 = vmatmul.mubr.bf16.gmra.mrb[12].mxu0 %v8290_v15  ;;  %1521 = vmatmul.mubr.bf16.gmra.mrb[12].mxu1 %v8290_v15  ;;  %v428_v15 = vrot.slane %v8334_v39, 1  ;;  %v340_v7 = vsel %vm240_vm0, %v335_v6, %v339_v1  ;;  %v347_v9 = vor.u32 %v346_v3, %v342_v2  ;;  %v12210_v3 = vlaneseq }
  0x91   :  { %1144 = vmatprep.mubr.bf16.mxu0 %v292_v12  ;;  %1530 = vmatprep.mubr.bf16.mxu1 %v292_v12  ;;  %v8532_v12 = vld [vmem:[%s12198_s0 + $0x80] sm:$0xff]  }
  0x92   :  { %1278 = vmatpush1.bf16.msra.mxu0 %v7624_v14  ;;  %1664 = vmatpush1.bf16.msra.mxu1 %v7627_v16  ;;  %v8452_v27 = vsel %vm417_vm1, %v428_v15, %v429_v23  ;;  %v353_v14 = vshrl.u32 %v8503_v59, 16  ;;  %v357_v16 = vshll.u32 %v8522_v8, 16  ;;  %v362_v23 = vshrl.u32 %v8527_v11, 16 }
  0x93   :  { %1279 = vmatprep.subr.bf16.mxu0 %v7635_v17  ;;  %1665 = vmatprep.subr.bf16.mxu1 %v7638_v20  ;;  %v364_v20 = vshll.u32 %v8527_v11, 16  ;;  %v373_v26 = vshrl.u32 %v8532_v12, 16  ;;  %v449_v58 = vrot.slane %v8532_v12, 1 }
  0x95   :  { %v366_v24 = vrot.slane %v364_v20, 1 }
  0x96   :  { %1280 = vmatpush1.bf16.msra.mxu0 %v7633_v21  ;;  %1666 = vmatpush1.bf16.msra.mxu1 %v7636_v22  ;;  %v369_v21 = vshll.u32 %v8532_v12, 16  ;;  %v8544_v22 = vld [vmem:[%s12198_s0 + $0x88] ss:$0 sps:$4 sm:$0x11]  }
  0x97   :  { %v367_v29 = vor.u32 %v366_v24, %v362_v23 }
  0x98   :  { %1145 = vmatmul.mubr.bf16.gmra.mrb[16].mxu0 %v8334_v39  ;;  %1531 = vmatmul.mubr.bf16.gmra.mrb[16].mxu1 %v8334_v39  ;;  %v313_v39 = vshrl.u32 %v8437_v19, 16  ;;  %v371_v25 = vrot.slane %v369_v21, 1 }
  0x99   :  { %1154 = vmatprep.mubr.bf16.mxu0 %v300_v28  ;;  %1540 = vmatprep.mubr.bf16.mxu1 %v300_v28  ;;  %v377_v28 = vshll.u32 %v8544_v22, 16 }
  0x9a   :  { %v315_v46 = vor.u32 %v313_v39, %v311_v35  ;;  %v372_v31 = vsel %vm240_vm0, %v367_v29, %v371_v25  ;;  %v375_v33 = vor.u32 %v373_v26, %v371_v25  ;;  %v384_v35 = vshll.u32 %v8555_v30, 16 }
  0x9b   :  { %v379_v34 = vrot.slane %v377_v28, 1  ;;  %v382_v39 = vshrl.u32 %v8555_v30, 16 }
  0x9c   :  { %v386_v42 = vrot.slane %v384_v35, 1 }
  0x9e   :  { %v387_v45 = vor.u32 %v386_v42, %v382_v39 }
  0xa0   :  { %1155 = vmatmul.mubr.bf16.gmra.mrb[20].mxu0 %v8360_v47  ;;  %1541 = vmatmul.mubr.bf16.gmra.mrb[20].mxu1 %v8360_v47  ;;  %v320_v47 = vsel %vm240_vm0, %v315_v46, %v319_v48  ;;  %v391_v46 = vrot.slane %v389_v44, 1  ;;  %v8574_v48 = vld [vmem:[%s12198_s0 + $0x9c] ss:$0 sps:$4 sm:$0x11]  }
  0xa1   :  { %1164 = vmatprep.mubr.bf16.mxu0 %v312_v38  ;;  %1550 = vmatprep.mubr.bf16.mxu1 %v312_v38  ;;  %v380_v38 = vsel %vm240_vm0, %v375_v33, %v379_v34  ;;  %v397_v52 = vshll.u32 %v8574_v48, 16  ;;  %v456_v1 = vrot.slane %v8574_v48, 1 }
  0xa2   :  { %v392_v50 = vsel %vm240_vm0, %v387_v45, %v391_v46 }
  0xa3   :  { %v399_v49 = vrot.slane %v397_v52, 1 }
  0xa8   :  { %1165 = vmatmul.mubr.bf16.gmra.mrb[24].mxu0 %v8416_v10  ;;  %1551 = vmatmul.mubr.bf16.gmra.mrb[24].mxu1 %v8416_v10  ;;  %v351_v10 = vrot.slane %v349_v5, 1  ;;  %v8656_v5 = vshrl.u32 %v12210_v3, 7 }
  0xa9   :  { %1174 = vmatprep.mubr.bf16.mxu0 %v320_v47  ;;  %1560 = vmatprep.mubr.bf16.mxu1 %v320_v47  ;;  %v393_v47 = vshrl.u32 %v8563_v32, 16 }
  0xaa   :  { %v352_v13 = vsel %vm240_vm0, %v347_v9, %v351_v10  ;;  %v355_v17 = vor.u32 %v353_v14, %v351_v10  ;;  %12309 = vst [vmem:[#allocation9_spill] sm:$0xff] %v8656_v5  ;;  %v8659_v6 = vsub.s32 0, %v8656_v5  ;;  %v8666_v9 = vsub.s32 1, %v8656_v5 }
  0xab   :  { %v395_v53 = vor.u32 %v393_v47, %v391_v46  ;;  %v586_v10 = vsub.s32 3, %v8656_v5 }
  0xac   :  { %12310 = vst [vmem:[#allocation10_spill] sm:$0xff] %v8659_v6  ;;  %12311 = vst [vmem:[#allocation11_spill] sm:$0xff] %v8666_v9 }
  0xad   :  { %v400_v56 = vsel %vm240_vm0, %v395_v53, %v399_v49 }
  0xb0   :  { %1175 = vmatmul.mubr.bf16.gmra.mrb[28].mxu0 %v8437_v19  ;;  %1561 = vmatmul.mubr.bf16.gmra.mrb[28].mxu1 %v8437_v19  ;;  %v359_v19 = vrot.slane %v357_v16, 1 }
  0xb1   :  { %1184 = vmatprep.mubr.bf16.mxu0 %v332_v63  ;;  %1570 = vmatprep.mubr.bf16.mxu1 %v332_v63  ;;  %v454_v63 = vrot.slane %v8563_v32, 1 }
  0xb2   :  { %v360_v15 = vsel %vm240_vm0, %v355_v17, %v359_v19  ;;  %vm5449_vm0 = vcmask 1046534  }
  0xb3   :  { %v455_v0 = vsel %vm417_vm1, %v453_v62, %v454_v63  ;;  %v457_v2 = vsel %vm417_vm1, %v454_v63, %v456_v1 }
  0xb8   :  { %1185 = vmatmul.mubr.bf16.gmra.mrb[32].mxu0 %v8468_v37  ;;  %1571 = vmatmul.mubr.bf16.gmra.mrb[32].mxu1 %v8468_v37 }
  0xb9   :  { %1194 = vmatprep.mubr.bf16.mxu0 %v340_v7  ;;  %1580 = vmatprep.mubr.bf16.mxu1 %v340_v7  ;;  %v12211_v7 = vsub.s32 2, %v8656_v5 }
  0xc0   :  { %1195 = vmatmul.mubr.bf16.gmra.mrb[36].mxu0 %v8477_v43  ;;  %1581 = vmatmul.mubr.bf16.gmra.mrb[36].mxu1 %v8477_v43 }
  0xc1   :  { %1204 = vmatprep.mubr.bf16.mxu0 %v352_v13  ;;  %1590 = vmatprep.mubr.bf16.mxu1 %v352_v13 }
  0xc8   :  { %1205 = vmatmul.mubr.bf16.gmra.mrb[40].mxu0 %v8496_v55  ;;  %1591 = vmatmul.mubr.bf16.gmra.mrb[40].mxu1 %v8496_v55 }
  0xc9   :  { %1214 = vmatprep.mubr.bf16.mxu0 %v360_v15  ;;  %1600 = vmatprep.mubr.bf16.mxu1 %v360_v15 }
  0xd0   :  { %1215 = vmatmul.mubr.bf16.gmra.mrb[44].mxu0 %v8503_v59  ;;  %1601 = vmatmul.mubr.bf16.gmra.mrb[44].mxu1 %v8503_v59 }
  0xd1   :  { %1224 = vmatprep.mubr.bf16.mxu0 %v372_v31  ;;  %1610 = vmatprep.mubr.bf16.mxu1 %v372_v31 }
  0xd8   :  { %1225 = vmatmul.mubr.bf16.gmra.mrb[48].mxu0 %v8527_v11  ;;  %1611 = vmatmul.mubr.bf16.gmra.mrb[48].mxu1 %v8527_v11 }
  0xd9   :  { %1234 = vmatprep.mubr.bf16.mxu0 %v380_v38  ;;  %1620 = vmatprep.mubr.bf16.mxu1 %v380_v38 }
  0xe0   :  { %1235 = vmatmul.mubr.bf16.gmra.mrb[52].mxu0 %v8532_v12  ;;  %1621 = vmatmul.mubr.bf16.gmra.mrb[52].mxu1 %v8532_v12 }
  0xe1   :  { %1244 = vmatprep.mubr.bf16.mxu0 %v392_v50  ;;  %1630 = vmatprep.mubr.bf16.mxu1 %v392_v50 }
  0xe8   :  { %1245 = vmatmul.mubr.bf16.gmra.mrb[56].mxu0 %v8555_v30  ;;  %1631 = vmatmul.mubr.bf16.gmra.mrb[56].mxu1 %v8555_v30 }
  0xe9   :  { %1254 = vmatprep.mubr.bf16.mxu0 %v400_v56  ;;  %1640 = vmatprep.mubr.bf16.mxu1 %v400_v56 }
  0xf0   :  { %1255 = vmatmul.mubr.bf16.gmra.mrb[60].mxu0 %v8563_v32  ;;  %1641 = vmatmul.mubr.bf16.gmra.mrb[60].mxu1 %v8563_v32 }
  0xf1   :  { %1297 = vmatprep.mubr.bf16.mxu0 %v12212_v57  ;;  %1683 = vmatprep.mubr.bf16.mxu1 %v12212_v57 }
  0xf8   :  { %1298 = vmatmul.mubr.bf16.vlgmr.msra.gmra.mrb[0].mxu0 %v8337_v40  ;;  %1684 = vmatmul.mubr.bf16.vlgmr.msra.gmra.mrb[0].mxu1 %v8337_v40  ;;  %v438_v40 = vrot.slane %v8468_v37, 1  ;;  %v444_v37 = vrot.slane %v8503_v59, 1 }
  0xf9   :  { %1307 = vmatprep.mubr.bf16.mxu0 %v12212_v57  ;;  %1693 = vmatprep.mubr.bf16.mxu1 %v12212_v57 }
 0x100   :  { %1308 = vmatmul.mubr.bf16.gmra.mrb[4].mxu0 %v8340_v41  ;;  %1694 = vmatmul.mubr.bf16.gmra.mrb[4].mxu1 %v8340_v41  ;;  %v439_v41 = vrot.slane %v8477_v43, 1 }
 0x101   :  { %1317 = vmatprep.mubr.bf16.mxu0 %v12212_v57  ;;  %1703 = vmatprep.mubr.bf16.mxu1 %v12212_v57 }
 0x108   :  { %1318 = vmatmul.mubr.bf16.gmra.mrb[8].mxu0 %v8401_v4  ;;  %1704 = vmatmul.mubr.bf16.gmra.mrb[8].mxu1 %v8401_v4  ;;  %v440_v4 = vsel %vm417_vm1, %v438_v40, %v439_v41 }
 0x109   :  { %1327 = vmatprep.mubr.bf16.mxu0 %v12212_v57  ;;  %1713 = vmatprep.mubr.bf16.mxu1 %v12212_v57 }
 0x110   :  { %1328 = vmatmul.mubr.bf16.gmra.mrb[12].mxu0 %v8430_v18  ;;  %1714 = vmatmul.mubr.bf16.gmra.mrb[12].mxu1 %v8430_v18  ;;  %v441_v18 = vrot.slane %v8491_v54, 1 }
 0x111   :  { %1337 = vmatprep.mubr.bf16.mxu0 %v12212_v57  ;;  %1723 = vmatprep.mubr.bf16.mxu1 %v12212_v57 }
 0x118   :  { %1338 = vmatmul.mubr.bf16.gmra.mrb[16].mxu0 %v8452_v27  ;;  %1724 = vmatmul.mubr.bf16.gmra.mrb[16].mxu1 %v8452_v27  ;;  %v442_v27 = vsel %vm417_vm1, %v439_v41, %v441_v18 }
 0x119   :  { %1347 = vmatprep.mubr.bf16.mxu0 %v12212_v57  ;;  %1733 = vmatprep.mubr.bf16.mxu1 %v12212_v57 }
 0x120   :  { %1348 = vmatmul.mubr.bf16.gmra.mrb[20].mxu0 %v8463_v36  ;;  %1734 = vmatmul.mubr.bf16.gmra.mrb[20].mxu1 %v8463_v36  ;;  %v443_v36 = vrot.slane %v8496_v55, 1  ;;  %v448_v55 = vrot.slane %v8527_v11, 1 }
 0x121   :  { %1357 = vmatprep.mubr.bf16.mxu0 %v12212_v57  ;;  %1743 = vmatprep.mubr.bf16.mxu1 %v12212_v57 }
 0x122   :  { %v445_v43 = vsel %vm417_vm1, %v443_v36, %v444_v37  ;;  %v450_v59 = vsel %vm417_vm1, %v448_v55, %v449_v58 }
 0x128   :  { %1358 = vmatmul.mubr.bf16.gmra.mrb[24].mxu0 %v8483_v51  ;;  %1744 = vmatmul.mubr.bf16.gmra.mrb[24].mxu1 %v8483_v51  ;;  %v446_v51 = vrot.slane %v8522_v8, 1  ;;  %v570_v8 = vld [vmem:[%s12200_s2] sm:$0xf]  ;;  %s7964_s2 = smov 96  }
 0x129   :  { %1367 = vmatprep.mubr.bf16.mxu0 %v12212_v57  ;;  %1753 = vmatprep.mubr.bf16.mxu1 %v12212_v57  ;;  %v8670_v11 = vrot.slane %v570_v8, %v8659_v6  ;;  %v8674_v12 = vrot.slane %v570_v8, %v12211_v7  ;;  %v8677_v13 = vrot.slane %v570_v8, %v8666_v9 }
 0x12a   :  { %v447_v54 = vsel %vm417_vm1, %v444_v37, %v446_v51  ;;  %v8679_v14 = vrot.slane %v570_v8, %v586_v10 }
 0x130   :  { %1368 = vmatmul.mubr.bf16.gmra.mrb[28].mxu0 %v8506_v60  ;;  %1754 = vmatmul.mubr.bf16.gmra.mrb[28].mxu1 %v8506_v60  ;;  %v451_v60 = vrot.slane %v8544_v22, 1 }
 0x131   :  { %1377 = vmatprep.mubr.bf16.mxu0 %v12212_v57  ;;  %1763 = vmatprep.mubr.bf16.mxu1 %v12212_v57 }
 0x132   :  { %v452_v61 = vsel %vm417_vm1, %v449_v58, %v451_v60 }
 0x138   :  { %1378 = vmatmul.mubr.bf16.gmra.mrb[32].mxu0 %v440_v4  ;;  %1764 = vmatmul.mubr.bf16.gmra.mrb[32].mxu1 %v440_v4 }
 0x139   :  { %1387 = vmatprep.mubr.bf16.mxu0 %v12212_v57  ;;  %1773 = vmatprep.mubr.bf16.mxu1 %v12212_v57 }
 0x140   :  { %1388 = vmatmul.mubr.bf16.gmra.mrb[36].mxu0 %v442_v27  ;;  %1774 = vmatmul.mubr.bf16.gmra.mrb[36].mxu1 %v442_v27 }
 0x141   :  { %1397 = vmatprep.mubr.bf16.mxu0 %v12212_v57  ;;  %1783 = vmatprep.mubr.bf16.mxu1 %v12212_v57 }
 0x148   :  { %1398 = vmatmul.mubr.bf16.gmra.mrb[40].mxu0 %v445_v43  ;;  %1784 = vmatmul.mubr.bf16.gmra.mrb[40].mxu1 %v445_v43 }
 0x149   :  { %1407 = vmatprep.mubr.bf16.mxu0 %v12212_v57  ;;  %1793 = vmatprep.mubr.bf16.mxu1 %v12212_v57 }
 0x150   :  { %1408 = vmatmul.mubr.bf16.gmra.mrb[44].mxu0 %v447_v54  ;;  %1794 = vmatmul.mubr.bf16.gmra.mrb[44].mxu1 %v447_v54 }
 0x151   :  { %1417 = vmatprep.mubr.bf16.mxu0 %v12212_v57  ;;  %1803 = vmatprep.mubr.bf16.mxu1 %v12212_v57 }
 0x158   :  { %1418 = vmatmul.mubr.bf16.gmra.mrb[48].mxu0 %v450_v59  ;;  %1804 = vmatmul.mubr.bf16.gmra.mrb[48].mxu1 %v450_v59 }
 0x159   :  { %1427 = vmatprep.mubr.bf16.mxu0 %v12212_v57  ;;  %1813 = vmatprep.mubr.bf16.mxu1 %v12212_v57 }
 0x160   :  { %1428 = vmatmul.mubr.bf16.gmra.mrb[52].mxu0 %v452_v61  ;;  %1814 = vmatmul.mubr.bf16.gmra.mrb[52].mxu1 %v452_v61 }
 0x161   :  { %1437 = vmatprep.mubr.bf16.mxu0 %v12212_v57  ;;  %1823 = vmatprep.mubr.bf16.mxu1 %v12212_v57 }
 0x168   :  { %1438 = vmatmul.mubr.bf16.gmra.mrb[56].mxu0 %v455_v0  ;;  %1824 = vmatmul.mubr.bf16.gmra.mrb[56].mxu1 %v455_v0 }
 0x169   :  { %1447 = vmatprep.mubr.bf16.mxu0 %v12212_v57  ;;  %1833 = vmatprep.mubr.bf16.mxu1 %v12212_v57 }
 0x170   :  { %1448 = vmatmul.mubr.bf16.gmra.mrb[60].mxu0 %v457_v2  ;;  %1834 = vmatmul.mubr.bf16.gmra.mrb[60].mxu1 %v457_v2 }
 0x171   :  { %5730 = vmatprep.mubr.bf16.mxu1 %v12212_v57 }
 0x1cb   :  { %v1299_v16 = vpop.f32.mrb[0].mxu0  ;;  %v1685_v17 = vpop.f32.mrb[0].mxu1 }
 0x1cc   :  { %v6708_v19 = vadd.f32 %v1299_v16, %v8670_v11  ;;  %v6772_v20 = vadd.f32 %v1685_v17, %v8674_v12  ;;  %v1301_v21 = vpop.f32.mrb[1].mxu0  ;;  %v1687_v22 = vpop.f32.mrb[1].mxu1 }
 0x1cd   :  { %v6709_v15 = vadd.f32 %v1301_v21, %v8677_v13  ;;  %v6773_v23 = vadd.f32 %v1687_v22, %v8679_v14  ;;  %v1303_v24 = vpop.f32.mrb[2].mxu0  ;;  %v1689_v25 = vpop.f32.mrb[2].mxu1 }
 0x1ce   :  { %v8685_v26 = vmax.f32 %v6708_v19, 0.0  ;;  %v8687_v28 = vmax.f32 %v6772_v20, 0.0  ;;  %v6710_v29 = vadd.f32 %v1303_v24, %v8670_v11  ;;  %v6774_v30 = vadd.f32 %v1689_v25, %v8674_v12  ;;  %v1305_v31 = vpop.f32.mrb[3].mxu0  ;;  %v1691_v32 = vpop.f32.mrb[3].mxu1 }
 0x1cf   :  { %v8691_v33 = vmax.f32 %v6709_v15, 0.0  ;;  %v8693_v34 = vmax.f32 %v6773_v23, 0.0  ;;  %v6711_v35 = vadd.f32 %v1305_v31, %v8677_v13  ;;  %v6775_v38 = vadd.f32 %v1691_v32, %v8679_v14 }
 0x1d0   :  { %12312 = vst [vmem:[#allocation12_spill] sm:$0xff] %v8685_v26  ;;  %v2101_v39 = vrot.slane %v8685_v26, 1  ;;  %v2582_v42 = vrot.slane %v8685_v26, 2  ;;  %v2107_v44 = vrot.slane %v8687_v28, 1  ;;  %v2588_v45 = vrot.slane %v8687_v28, 2 }
 0x1d1   :  { %v8701_v46 = vmax.f32 %v6710_v29, 0.0  ;;  %v8703_v48 = vmax.f32 %v6774_v30, 0.0  ;;  %v8705_v50 = vmax.f32 %v6711_v35, 0.0  ;;  %v8707_v47 = vmax.f32 %v6775_v38, 0.0 }
 0x1d2   :  { %v2104_v52 = vrot.slane %v8691_v33, 1  ;;  %v2585_v53 = vrot.slane %v8691_v33, 2  ;;  %v2110_v49 = vrot.slane %v8693_v34, 1  ;;  %v2591_v56 = vrot.slane %v8693_v34, 2 }
 0x1d3   :  { %12313 = vst [vmem:[#allocation13_spill] sm:$0xff] %v8701_v46  ;;  %v1309_v40 = vpop.f32.mrb[4].mxu0  ;;  %v1695_v41 = vpop.f32.mrb[4].mxu1  ;;  %v2102_v4 = vrot.slane %v8701_v46, 1  ;;  %v2583_v18 = vrot.slane %v8701_v46, 2  ;;  %v12216_v27 = vrot.slane %v8703_v48, 1 }
 0x1d4   :  { %v12218_v36 = vrot.slane %v8703_v48, 2  ;;  %v1311_v37 = vpop.f32.mrb[5].mxu0  ;;  %v1697_v43 = vpop.f32.mrb[5].mxu1  ;;  %v12219_v51 = vrot.slane %v8705_v50, 1  ;;  %v12217_v54 = vrot.slane %v8705_v50, 2  ;;  %v12221_v55 = vrot.slane %v8707_v47, 1 }
 0x1d5   :  { %v12220_v58 = vrot.slane %v8707_v47, 2  ;;  %v1313_v59 = vpop.f32.mrb[6].mxu0  ;;  %v1699_v60 = vpop.f32.mrb[6].mxu1  ;;  %v8722_v61 = vsel %vm417_vm1, %v2101_v39, %v2102_v4  ;;  %v8725_v62 = vsel %vm2581_vm2, %v2582_v42, %v2583_v18  ;;  %v6712_v63 = vadd.f32 %v1309_v40, %v8670_v11 }
 0x1d6   :  { %12314 = vst [vmem:[#allocation14_spill] sm:$0xff] %v8722_v61  ;;  %12315 = vst [vmem:[#allocation15_spill] sm:$0xff] %v8725_v62  ;;  %v6776_v0 = vadd.f32 %v1695_v41, %v8674_v12  ;;  %v1315_v1 = vpop.f32.mrb[7].mxu0  ;;  %v1701_v2 = vpop.f32.mrb[7].mxu1  ;;  %v6713_v10 = vadd.f32 %v1311_v37, %v8677_v13  ;;  %v6777_v16 = vadd.f32 %v1697_v43, %v8679_v14  ;;  %v12334_v6 = vrot.slane %v8703_v48, 2 }
 0x1d7   :  { %v6714_v17 = vadd.f32 %v1313_v59, %v8670_v11  ;;  %v8734_v19 = vmax.f32 %v6712_v63, 0.0  ;;  %v6778_v21 = vadd.f32 %v1699_v60, %v8674_v12  ;;  %v6715_v22 = vadd.f32 %v1315_v1, %v8677_v13 }
 0x1d8   :  { %v8736_v20 = vmax.f32 %v6776_v0, 0.0  ;;  %v8740_v15 = vmax.f32 %v6713_v10, 0.0  ;;  %v8742_v23 = vmax.f32 %v6777_v16, 0.0  ;;  %v6779_v25 = vadd.f32 %v1701_v2, %v8679_v14 }
 0x1d9   :  { %12316 = vst [vmem:[#allocation16_spill] sm:$0xff] %v8734_v19  ;;  %v1856_v24 = vmax.f32 %v6714_v17, 0.0  ;;  %v2113_v29 = vrot.slane %v8734_v19, 1  ;;  %v2594_v30 = vrot.slane %v8734_v19, 2  ;;  %v8761_v2 = vmax.f32 %v6778_v21, 0.0 }
 0x1da   :  { %v8763_v10 = vmax.f32 %v6715_v22, 0.0  ;;  %v8765_v16 = vmax.f32 %v6779_v25, 0.0 }
 0x1db   :  { %v1319_v40 = vpop.f32.mrb[8].mxu0  ;;  %v1705_v41 = vpop.f32.mrb[8].mxu1  ;;  %v8754_v37 = vsel %vm417_vm1, %v2102_v4, %v2113_v29  ;;  %v8757_v43 = vsel %vm2581_vm2, %v2583_v18, %v2594_v30  ;;  %v2121_v59 = vrot.slane %v1856_v24, 1  ;;  %v2602_v60 = vrot.slane %v1856_v24, 2 }
 0x1dc   :  { %12317 = vst [vmem:[#allocation17_spill] sm:$0xff] %v8754_v37  ;;  %12318 = vst [vmem:[#allocation18_spill] sm:$0xff] %v8757_v43  ;;  %v1321_v63 = vpop.f32.mrb[9].mxu0  ;;  %v1707_v0 = vpop.f32.mrb[9].mxu1  ;;  %v6716_v57 = vadd.f32 %v1319_v40, %v8670_v11  ;;  %v12214_v22 = vrot.slane %v8761_v2, 1  ;;  %v12215_v1 = vrot.slane %v8763_v10, 1  ;;  %v6780_v21 = vadd.f32 %v1705_v41, %v8674_v12 }
 0x1dd   :  { %v1323_v17 = vpop.f32.mrb[10].mxu0  ;;  %v1709_v3 = vpop.f32.mrb[10].mxu1  ;;  %v8768_v4 = vsel %vm417_vm1, %v2113_v29, %v2121_v59  ;;  %v2465_v18 = vmax.f32 %v1856_v24, %v2121_v59  ;;  %v8771_v7 = vsel %vm2581_vm2, %v2594_v30, %v2602_v60  ;;  %v2109_v41 = vsel %vm417_vm1, %v2107_v44, %v12216_v27 }
 0x1de   :  { %12319 = vst [vmem:[#allocation19_spill] sm:$0xff] %v8768_v4  ;;  %12320 = vst [vmem:[#allocation20_spill] sm:$0xff] %v8771_v7  ;;  %v1325_v8 = vpop.f32.mrb[11].mxu0  ;;  %v1711_v42 = vpop.f32.mrb[11].mxu1  ;;  %v8783_v30 = vmax.f32 %v6716_v57, 0.0  ;;  %v8788_v40 = vmax.f32 %v8761_v2, %v12214_v22  ;;  %v8793_v59 = vmax.f32 %v8763_v10, %v12215_v1  ;;  %v6781_v57 = vadd.f32 %v1707_v0, %v8679_v14 }
 0x1df   :  { %v8779_v39 = vmax.f32 %v2465_v18, %v2602_v60  ;;  %v6717_v60 = vadd.f32 %v1321_v63, %v8677_v13  ;;  %v2106_v22 = vsel %vm417_vm1, %v2104_v52, %v12219_v51  ;;  %v8805_v25 = vmax.f32 %v6780_v21, 0.0 }
 0x1e0   :  { %12322 = vst [vmem:[#allocation22_spill] sm:$0xff] %v8783_v30  ;;  %v2129_v18 = vrot.slane %v8783_v30, 1  ;;  %v2610_v29 = vrot.slane %v8783_v30, 2  ;;  %v2454_v63 = vmax.f32 %v8691_v33, %v2106_v22  ;;  %v8817_v32 = vmax.f32 %v6781_v57, 0.0 }
 0x1e1   :  { %12321 = vst [vmem:[#allocation21_spill] sm:$0xff] %v8779_v39  ;;  %v8807_v1 = vmax.f32 %v6717_v60, 0.0  ;;  %v2455_v38 = vmax.f32 %v8687_v28, %v2109_v41  ;;  %v2587_v52 = vsel %vm2581_vm2, %v2585_v53, %v12217_v54  ;;  %v2590_v44 = vsel %vm2581_vm2, %v2588_v45, %v12218_v36 }
 0x1e2   :  { %v8840_v54 = vmax.f32 %v2454_v63, %v2587_v52  ;;  %v6718_v57 = vadd.f32 %v1323_v17, %v8670_v11  ;;  %v6782_v41 = vadd.f32 %v1709_v3, %v8674_v12  ;;  %v6719_v27 = vadd.f32 %v1325_v8, %v8677_v13 }
 0x1e3   :  { %v1329_v24 = vpop.f32.mrb[12].mxu0  ;;  %v8815_v0 = vpop.f32.mrb[12].mxu1  ;;  %v2936_v45 = vmax.f32 %v2455_v38, %v2590_v44  ;;  %v6783_v51 = vadd.f32 %v1711_v42, %v8679_v14  ;;  %v2112_v38 = vsel %vm417_vm1, %v2110_v49, %v12221_v55  ;;  %v2593_v17 = vsel %vm2581_vm2, %v2591_v56, %v12220_v58 }
 0x1e4   :  { %v1331_v21 = vpop.f32.mrb[13].mxu0  ;;  %v1717_v22 = vpop.f32.mrb[13].mxu1  ;;  %12323 = vst [vmem:[#allocation23_spill] sm:$0xff] %v8840_v54  ;;  %v12324_v3 = vrot.slane %v8740_v15, 1  ;;  %v12325_v8 = vrot.slane %v8705_v50, 1  ;;  %v8866_v63 = vmax.f32 %v6718_v57, 0.0  ;;  %v2456_v49 = vmax.f32 %v8693_v34, %v2112_v38 }
 0x1e5   :  { %v8834_v31 = vpop.f32.mrb[14].mxu0  ;;  %v8836_v33 = vpop.f32.mrb[14].mxu1  ;;  %v7032_v35 = vpack.i.bf16 %v2936_v45, %v8840_v54  ;;  %v8868_v52 = vmax.f32 %v6782_v41, 0.0  ;;  %v8870_v44 = vmax.f32 %v6719_v27, 0.0  ;;  %v8872_v28 = vmax.f32 %v6783_v51, 0.0 }
 0x1e6   :  { %v8842_v36 = vpop.f32.mrb[15].mxu0  ;;  %v8844_v60 = vpop.f32.mrb[15].mxu1  ;;  %v2116_v42 = vsel %vm417_vm1, %v12325_v8, %v12324_v3  ;;  %12326 = vst [vmem:[#allocation24_spill] sm:$0xff] %v8866_v63  ;;  %v12327_v56 = vrot.slane %v8736_v20, 1  ;;  %v12328_v53 = vrot.slane %v8703_v48, 1  ;;  %v12329_v41 = vrot.slane %v8740_v15, 2 }
 0x1e7   :  { %7033 = vrot.lane.b32.xlu0 %v7032_v35, %s7964_s2  ;;  %v2458_v57 = vmax.f32 %v8705_v50, %v2116_v42  ;;  %v12330_v27 = vrot.slane %v8705_v50, 2  ;;  %v2130_v3 = vrot.slane %v8866_v63, 1  ;;  %v2611_v35 = vrot.slane %v8866_v63, 2 }
 0x1e8   :  { %v2118_v58 = vsel %vm417_vm1, %v12328_v53, %v12327_v56  ;;  %v2937_v5 = vmax.f32 %v2456_v49, %v2593_v17  ;;  %v12333_v50 = vrot.slane %v8736_v20, 2  ;;  %v6784_v4 = vadd.f32 %v8815_v0, %v8674_v12 }
 0x1e9   :  { %v2597_v51 = vsel %vm2581_vm2, %v12330_v27, %v12329_v41  ;;  %v8904_v34 = vsel %vm417_vm1, %v2129_v18, %v2130_v3  ;;  %v8907_v38 = vsel %vm2581_vm2, %v2610_v29, %v2611_v35  ;;  %v2459_v9 = vmax.f32 %v8703_v48, %v2118_v58 }
 0x1ea   :  { %12331 = vst [vmem:[#allocation25_spill] sm:$0xff] %v8904_v34  ;;  %12332 = vst [vmem:[#allocation26_spill] sm:$0xff] %v8907_v38  ;;  %v2599_v18 = vsel %vm2581_vm2, %v12334_v6, %v12333_v50  ;;  %v8921_v39 = vmax.f32 %v2458_v57, %v2597_v51  ;;  %v6720_v29 = vadd.f32 %v1329_v24, %v8670_v11  ;;  %v12337_v6 = vrot.slane %v8742_v23, 1 }
 0x1eb   :  { %v8891_v8 = vpop.f32.mrb[16].mxu0  ;;  %v8893_v55 = vpop.f32.mrb[16].mxu1  ;;  %v7037_v49 = vpack.i.bf16 %v2937_v5, %v2936_v45  ;;  %v2940_v38 = vmax.f32 %v2459_v9, %v2599_v18  ;;  %v6721_v56 = vadd.f32 %v1331_v21, %v8677_v13  ;;  %v6785_v48 = vadd.f32 %v1717_v22, %v8679_v14 }
 0x1ec   :  { %v8899_v41 = vpop.f32.mrb[17].mxu0  ;;  %v8901_v27 = vpop.f32.mrb[17].mxu1  ;;  %12335 = vst [vmem:[#allocation27_spill] sm:$0xff] %v8921_v39  ;;  %v8931_v34 = vmax.f32 %v6720_v29, 0.0  ;;  %v12338_v57 = vrot.slane %v8707_v47, 1  ;;  %v12339_v51 = vrot.slane %v8742_v23, 2 }
 0x1ed   :  { %v8910_v53 = vpop.f32.mrb[18].mxu0  ;;  %v8912_v42 = vpop.f32.mrb[18].mxu1  ;;  %v12340_v5 = vrot.slane %v8707_v47, 2  ;;  %7038 = vrot.lane.b32.xlu0 %v7037_v49, %s7961_s3  ;;  %v7042_v0 = vpack.i.bf16 %v2940_v38, %v8921_v39  ;;  %v8946_v21 = vmax.f32 %v6784_v4, 0.0  ;;  %v8948_v45 = vmax.f32 %v6721_v56, 0.0 }
 0x1ee   :  { %v8924_v17 = vpop.f32.mrb[19].mxu0  ;;  %v8926_v58 = vpop.f32.mrb[19].mxu1  ;;  %12336 = vst [vmem:[#allocation28_spill] sm:$0xff] %v8931_v34  ;;  %v2120_v24 = vsel %vm417_vm1, %v12338_v57, %v12337_v6  ;;  %v2141_v50 = vrot.slane %v8931_v34, 1  ;;  %v2622_v18 = vrot.slane %v8931_v34, 2  ;;  %v8953_v29 = vmax.f32 %v6785_v48, 0.0 }
 0x1ef   :  { %v2601_v9 = vsel %vm2581_vm2, %v12340_v5, %v12339_v51  ;;  %v2460_v22 = vmax.f32 %v8707_v47, %v2120_v24  ;;  %v6722_v6 = vadd.f32 %v8834_v31, %v8670_v11  ;;  %7043 = vrot.lane.b32.xlu1 %v7042_v0, %s7964_s2  ;;  %v6723_v31 = vadd.f32 %v8842_v36, %v8677_v13 }
 0x1f0   :  { %v8967_v48 = vsel %vm417_vm1, %v2130_v3, %v2141_v50  ;;  %v8970_v51 = vsel %vm2581_vm2, %v2611_v35, %v2622_v18  ;;  %v6786_v3 = vadd.f32 %v8836_v33, %v8674_v12  ;;  %v6787_v5 = vadd.f32 %v8844_v60, %v8679_v14 }
 0x1f1   :  { %12341 = vst [vmem:[#allocation29_spill] sm:$0xff] %v8967_v48  ;;  %12342 = vst [vmem:[#allocation30_spill] sm:$0xff] %v8970_v51  ;;  %v2941_v49 = vmax.f32 %v2460_v22, %v2601_v9  ;;  %v1872_v56 = vmax.f32 %v6722_v6, 0.0  ;;  %v12343_v51 = vrot.slane %v8763_v10, 2  ;;  %v12345_v9 = vrot.slane %v8761_v2, 2 }
 0x1f2   :  { %v9002_v36 = vmax.f32 %v6786_v3, 0.0  ;;  %v9004_v7 = vmax.f32 %v6723_v31, 0.0  ;;  %v9006_v60 = vmax.f32 %v6787_v5, 0.0  ;;  %v12347_v39 = vrot.slane %v8740_v15, 1 }
 0x1f3   :  { %v8962_v47 = vpop.f32.mrb[20].mxu0  ;;  %v8964_v24 = vpop.f32.mrb[20].mxu1  ;;  %v8993_v19 = vmax.f32 %v8793_v59, %v12343_v51  ;;  %v2948_v22 = vmax.f32 %v8788_v40, %v12345_v9  ;;  %v7047_v57 = vpack.i.bf16 %v2941_v49, %v2940_v38  ;;  %v2149_v48 = vrot.slane %v1872_v56, 1 }
 0x1f4   :  { %v8974_v0 = vpop.f32.mrb[21].mxu0  ;;  %v8976_v4 = vpop.f32.mrb[21].mxu1  ;;  %v2630_v63 = vrot.slane %v1872_v56, 2  ;;  %v12346_v51 = vrot.slane %v8763_v10, 1  ;;  %v12235_v31 = vrot.slane %v9002_v36, 1  ;;  %v12356_v34 = vrot.slane %v8736_v20, 2 }
 0x1f5   :  { %v8982_v30 = vpop.f32.mrb[22].mxu0  ;;  %v8984_v35 = vpop.f32.mrb[22].mxu1  ;;  %12344 = vst [vmem:[#allocation31_spill] sm:$0xff] %v8993_v19  ;;  %v7052_v59 = vpack.i.bf16 %v2948_v22, %v8993_v19  ;;  %7048 = vrot.lane.b32.xlu0 %v7047_v57, %s7961_s3  ;;  %v9016_v38 = vsel %vm417_vm1, %v2141_v50, %v2149_v48  ;;  %v2481_v49 = vmax.f32 %v1872_v56, %v2149_v48  ;;  %v12236_v19 = vrot.slane %v9004_v7, 1 }
 0x1f6   :  { %v8998_v33 = vpop.f32.mrb[23].mxu0  ;;  %v9000_v6 = vpop.f32.mrb[23].mxu1  ;;  %v2124_v40 = vsel %vm417_vm1, %v12347_v39, %v12346_v51  ;;  %12348 = vst [vmem:[#allocation32_spill] sm:$0xff] %v9016_v38  ;;  %v9019_v3 = vsel %vm2581_vm2, %v2622_v18, %v2630_v63  ;;  %v9033_v50 = vmax.f32 %v9002_v36, %v12235_v31  ;;  %v12353_v18 = vrot.slane %v8763_v10, 2 }
 0x1f7   :  { %12349 = vst [vmem:[#allocation33_spill] sm:$0xff] %v9019_v3  ;;  %7053 = vrot.lane.b32.xlu1 %v7052_v59, %s7964_s2  ;;  %v9028_v57 = vmax.f32 %v2481_v49, %v2630_v63  ;;  %v9044_v5 = vmax.f32 %v9004_v7, %v12236_v19  ;;  %v12351_v63 = vrot.slane %v8761_v2, 1  ;;  %v12352_v59 = vrot.slane %v8736_v20, 1 }
 0x1f8   :  { %v2462_v9 = vmax.f32 %v8740_v15, %v2124_v40  ;;  %v12354_v56 = vrot.slane %v8740_v15, 2  ;;  %v12355_v38 = vrot.slane %v8761_v2, 2  ;;  %v12357_v40 = vrot.slane %v8765_v16, 1 }
 0x1f9   :  { %12350 = vst [vmem:[#allocation34_spill] sm:$0xff] %v9028_v57  ;;  %v2126_v49 = vsel %vm417_vm1, %v12352_v59, %v12351_v63  ;;  %v2608_v15 = vrot.slane %v8765_v16, 2  ;;  %v6725_v2 = vadd.f32 %v8899_v41, %v8677_v13  ;;  %v6789_v37 = vadd.f32 %v8901_v27, %v8679_v14 }
 0x1fa   :  { %v2605_v39 = vsel %vm2581_vm2, %v12354_v56, %v12353_v18  ;;  %v2463_v19 = vmax.f32 %v8736_v20, %v2126_v49  ;;  %v2607_v63 = vsel %vm2581_vm2, %v12356_v34, %v12355_v38  ;;  %v2468_v10 = vmax.f32 %v8765_v16, %v12357_v40 }
 0x1fb   :  { %v9037_v48 = vpop.f32.mrb[24].mxu0  ;;  %v9039_v51 = vpop.f32.mrb[24].mxu1  ;;  %v9075_v56 = vmax.f32 %v2462_v9, %v2605_v39  ;;  %v6724_v49 = vadd.f32 %v8891_v8, %v8670_v11  ;;  %v6788_v20 = vadd.f32 %v8893_v55, %v8674_v12  ;;  %v12359_v9 = vrot.slane %v8765_v16, 1 }
 0x1fc   :  { %v9057_v31 = vpop.f32.mrb[25].mxu0  ;;  %v9059_v57 = vpop.f32.mrb[25].mxu1  ;;  %v2944_v40 = vmax.f32 %v2463_v19, %v2607_v63  ;;  %v2949_v3 = vmax.f32 %v2468_v10, %v2608_v15  ;;  %v12360_v39 = vrot.slane %v8742_v23, 1  ;;  %v9098_v41 = vmax.f32 %v6725_v2, 0.0 }
 0x1fd   :  { %v9071_v59 = vpop.f32.mrb[26].mxu0  ;;  %v9073_v18 = vpop.f32.mrb[26].mxu1  ;;  %12358 = vst [vmem:[#allocation35_spill] sm:$0xff] %v9075_v56  ;;  %v9094_v46 = vmax.f32 %v6724_v49, 0.0  ;;  %v9096_v55 = vmax.f32 %v6788_v20, 0.0  ;;  %v9102_v10 = vmax.f32 %v6789_v37, 0.0 }
 0x1fe   :  { %v9083_v34 = vpop.f32.mrb[27].mxu0  ;;  %v9085_v38 = vpop.f32.mrb[27].mxu1  ;;  %v2128_v8 = vsel %vm417_vm1, %v12360_v39, %v12359_v9  ;;  %v7062_v19 = vpack.i.bf16 %v2944_v40, %v9075_v56  ;;  %v7057_v63 = vpack.i.bf16 %v2949_v3, %v2948_v22  ;;  %v12362_v27 = vrot.slane %v8742_v23, 2 }
 0x1ff   :  { %12361 = vst [vmem:[#allocation36_spill] sm:$0xff] %v9094_v46  ;;  %v2464_v43 = vmax.f32 %v8742_v23, %v2128_v8  ;;  %v2157_v54 = vrot.slane %v9094_v46, 1  ;;  %v2638_v49 = vrot.slane %v9094_v46, 2  ;;  %v6726_v8 = vadd.f32 %v8910_v53, %v8670_v11 }
 0x200   :  { %v2609_v16 = vsel %vm2581_vm2, %v12362_v27, %v2608_v15  ;;  %7063 = vrot.lane.b32.xlu0 %v7062_v19, %s7964_s2  ;;  %7058 = vrot.lane.b32.xlu1 %v7057_v63, %s7961_s3  ;;  %v6790_v19 = vadd.f32 %v8912_v42, %v8674_v12  ;;  %v6727_v63 = vadd.f32 %v8924_v17, %v8677_v13  ;;  %v12364_v23 = vrot.slane %v8868_v52, 1 }
 0x201   :  { %v2945_v39 = vmax.f32 %v2464_v43, %v2609_v16  ;;  %v6791_v3 = vadd.f32 %v8926_v58, %v8679_v14  ;;  %v12365_v43 = vrot.slane %v8805_v25, 1  ;;  %v12366_v53 = vrot.slane %v8872_v28, 1 }
 0x202   :  { %v12367_v42 = vrot.slane %v8817_v32, 1  ;;  %v12368_v17 = vrot.slane %v8868_v52, 2  ;;  %v12369_v20 = vrot.slane %v8805_v25, 2  ;;  %v9152_v26 = vmax.f32 %v6726_v8, 0.0 }
 0x203   :  { %v9117_v15 = vpop.f32.mrb[28].mxu0  ;;  %v9119_v9 = vpop.f32.mrb[28].mxu1  ;;  %v2137_v16 = vsel %vm417_vm1, %v12365_v43, %v12364_v23  ;;  %v7067_v61 = vpack.i.bf16 %v2945_v39, %v2944_v40  ;;  %v9154_v23 = vmax.f32 %v6790_v19, 0.0  ;;  %v9156_v43 = vmax.f32 %v6727_v63, 0.0 }
 0x204   :  { %v9127_v27 = vpop.f32.mrb[29].mxu0  ;;  %v9129_v2 = vpop.f32.mrb[29].mxu1  ;;  %v2140_v37 = vsel %vm417_vm1, %v12367_v42, %v12366_v53  ;;  %v2618_v22 = vsel %vm2581_vm2, %v12369_v20, %v12368_v17  ;;  %12370 = vst [vmem:[#allocation38_spill] sm:$0xff] %v9152_v26  ;;  %v9162_v42 = vmax.f32 %v6791_v3, 0.0  ;;  %v12372_v17 = vrot.slane %v8872_v28, 2 }
 0x205   :  { %12363 = vst [vmem:[#allocation37_spill] sm:$0xff] %v9129_v2  ;;  %v9148_v56 = vpop.f32.mrb[30].mxu0  ;;  %v9150_v58 = vpop.f32.mrb[30].mxu1  ;;  %v2471_v2 = vmax.f32 %v8805_v25, %v2137_v16  ;;  %v2472_v20 = vmax.f32 %v8817_v32, %v2140_v37  ;;  %v12373_v40 = vrot.slane %v8817_v32, 2  ;;  %7068 = vrot.lane.b32.xlu0 %v7067_v61, %s7961_s3  ;;  %v2158_v8 = vrot.slane %v9152_v26, 1 }
 0x206   :  { %v9158_v62 = vpop.f32.mrb[31].mxu0  ;;  %v9160_v53 = vpop.f32.mrb[31].mxu1  ;;  %v2639_v19 = vrot.slane %v9152_v26, 2  ;;  %v12376_v3 = vrot.slane %v8870_v44, 1  ;;  %v12377_v25 = vrot.slane %v8807_v1, 1  ;;  %v12378_v16 = vrot.slane %v8870_v44, 2 }
 0x207   :  { %12371 = vst [vmem:[#allocation39_spill] sm:$0xff] %v9160_v53  ;;  %v2621_v39 = vsel %vm2581_vm2, %v12373_v40, %v12372_v17  ;;  %v9181_v17 = vsel %vm417_vm1, %v2157_v54, %v2158_v8  ;;  %v2952_v40 = vmax.f32 %v2471_v2, %v2618_v22  ;;  %v12379_v32 = vrot.slane %v8807_v1, 2 }
 0x208   :  { %12374 = vst [vmem:[#allocation40_spill] sm:$0xff] %v9181_v17  ;;  %v9184_v61 = vsel %vm2581_vm2, %v2638_v49, %v2639_v19  ;;  %v2953_v53 = vmax.f32 %v2472_v20, %v2621_v39  ;;  %v2134_v37 = vsel %vm417_vm1, %v12377_v25, %v12376_v3  ;;  %v12380_v49 = vrot.slane %v8948_v45, 1 }
 0x209   :  { %12375 = vst [vmem:[#allocation41_spill] sm:$0xff] %v9184_v61  ;;  %v2615_v54 = vsel %vm2581_vm2, %v12379_v32, %v12378_v16  ;;  %v12381_v2 = vmov %v12376_v3  ;;  %v2470_v17 = vmax.f32 %v8807_v1, %v2134_v37  ;;  %v12383_v3 = vrot.slane %v8946_v21, 1 }
 0x20a   :  { %v2144_v22 = vsel %vm417_vm1, %v12381_v2, %v12380_v49  ;;  %v7077_v63 = vpack.i.bf16 %v2953_v53, %v2952_v40  ;;  %v12384_v25 = vrot.slane %v8868_v52, 1  ;;  %v12386_v2 = vrot.slane %v8948_v45, 2 }
 0x20b   :  { %v9203_v20 = vpop.f32.mrb[32].mxu0  ;;  %v9205_v39 = vpop.f32.mrb[32].mxu1  ;;  %v2474_v16 = vmax.f32 %v8870_v44, %v2144_v22  ;;  %v12387_v53 = vrot.slane %v8870_v44, 2  ;;  %v12388_v37 = vrot.slane %v8946_v21, 2  ;;  %v6728_v22 = vadd.f32 %v8962_v47, %v8670_v11 }
 0x20c   :  { %12382 = vst [vmem:[#allocation42_spill] sm:$0xff] %v9205_v39  ;;  %v2146_v46 = vsel %vm417_vm1, %v12384_v25, %v12383_v3  ;;  %v9214_v32 = vpop.f32.mrb[33].mxu0  ;;  %v9216_v61 = vpop.f32.mrb[33].mxu1  ;;  %v12389_v39 = vrot.slane %v8868_v52, 2  ;;  %7078 = vrot.lane.b32.xlu1 %v7077_v63, %s7961_s3  ;;  %v6793_v63 = vadd.f32 %v8976_v4, %v8679_v14 }
 0x20d   :  { %12385 = vst [vmem:[#allocation43_spill] sm:$0xff] %v9216_v61  ;;  %v2475_v49 = vmax.f32 %v8868_v52, %v2146_v46  ;;  %v2625_v1 = vsel %vm2581_vm2, %v12387_v53, %v12386_v2  ;;  %v9231_v25 = vpop.f32.mrb[34].mxu0  ;;  %v9233_v61 = vpop.f32.mrb[34].mxu1  ;;  %v9236_v46 = vmax.f32 %v2470_v17, %v2615_v54  ;;  %v6792_v2 = vadd.f32 %v8964_v24, %v8674_v12 }
 0x20e   :  { %v2627_v3 = vsel %vm2581_vm2, %v12389_v39, %v12388_v37  ;;  %v9238_v44 = vmax.f32 %v2474_v16, %v2625_v1  ;;  %v6729_v52 = vadd.f32 %v8974_v0, %v8677_v13  ;;  %v9244_v39 = vpop.f32.mrb[35].mxu0  ;;  %v9246_v53 = vpop.f32.mrb[35].mxu1  ;;  %v9250_v37 = vmax.f32 %v6728_v22, 0.0 }
 0x20f   :  { %12390 = vst [vmem:[#allocation44_spill] sm:$0xff] %v9236_v46  ;;  %12392 = vst [vmem:[#allocation46_spill] sm:$0xff] %v9244_v39  ;;  %v9248_v47 = vmax.f32 %v2475_v49, %v2627_v3  ;;  %v12395_v17 = vrot.slane %v9004_v7, 1  ;;  %v12396_v54 = vrot.slane %v8948_v45, 1  ;;  %v7072_v16 = vpack.i.bf16 %v2952_v40, %v9236_v46 }
 0x210   :  { %12391 = vst [vmem:[#allocation45_spill] sm:$0xff] %v9238_v44  ;;  %12393 = vst [vmem:[#allocation47_spill] sm:$0xff] %v9246_v53  ;;  %v9260_v0 = vmax.f32 %v6792_v2, 0.0  ;;  %v9262_v1 = vmax.f32 %v6729_v52, 0.0  ;;  %v12397_v49 = vrot.slane %v9002_v36, 1  ;;  %v12398_v3 = vrot.slane %v8946_v21, 1 }
 0x211   :  { %12394 = vst [vmem:[#allocation48_spill] sm:$0xff] %v9250_v37  ;;  %v2152_v24 = vsel %vm417_vm1, %v12396_v54, %v12395_v17  ;;  %v7082_v4 = vpack.i.bf16 %v9248_v47, %v9238_v44  ;;  %v2169_v53 = vrot.slane %v9250_v37, 1  ;;  %v2650_v39 = vrot.slane %v9250_v37, 2  ;;  %7073 = vrot.lane.b32.xlu0 %v7072_v16, %s7964_s2 }
 0x212   :  { %v2154_v22 = vsel %vm417_vm1, %v12398_v3, %v12397_v49  ;;  %v9273_v17 = vmax.f32 %v6793_v63, 0.0  ;;  %v2478_v54 = vmax.f32 %v8948_v45, %v2152_v24  ;;  %v12406_v46 = vrot.slane %v8946_v21, 2 }
 0x213   :  { %7083 = vrot.lane.b32.xlu1 %v7082_v4, %s7964_s2  ;;  %v9282_v49 = vsel %vm417_vm1, %v2158_v8, %v2169_v53  ;;  %v9285_v3 = vsel %vm2581_vm2, %v2639_v19, %v2650_v39  ;;  %v9289_v44 = vpop.f32.mrb[36].mxu0  ;;  %v9291_v40 = vpop.f32.mrb[36].mxu1  ;;  %v2479_v4 = vmax.f32 %v8946_v21, %v2154_v22  ;;  %v12401_v8 = vrot.slane %v9004_v7, 2 }
 0x214   :  { %12399 = vst [vmem:[#allocation49_spill] sm:$0xff] %v9282_v49  ;;  %12400 = vst [vmem:[#allocation50_spill] sm:$0xff] %v9285_v3  ;;  %v12402_v19 = vrot.slane %v8948_v45, 2  ;;  %v9302_v63 = vpop.f32.mrb[37].mxu0  ;;  %v9304_v16 = vpop.f32.mrb[37].mxu1  ;;  %v12405_v3 = vrot.slane %v9002_v36, 2  ;;  %v6730_v24 = vadd.f32 %v8982_v30, %v8670_v11  ;;  %v6794_v22 = vadd.f32 %v8984_v35, %v8674_v12 }
 0x215   :  { %12403 = vst [vmem:[#allocation51_spill] sm:$0xff] %v9302_v63  ;;  %12404 = vst [vmem:[#allocation52_spill] sm:$0xff] %v9304_v16  ;;  %v6731_v45 = vadd.f32 %v8998_v33, %v8677_v13  ;;  %v6795_v21 = vadd.f32 %v9000_v6, %v8679_v14  ;;  %v12411_v30 = vrot.slane %v8872_v28, 1 }
 0x216   :  { %v2633_v52 = vsel %vm2581_vm2, %v12402_v19, %v12401_v8  ;;  %v2635_v2 = vsel %vm2581_vm2, %v12406_v46, %v12405_v3  ;;  %v9317_v8 = vpop.f32.mrb[38].mxu0  ;;  %v9319_v19 = vpop.f32.mrb[38].mxu1  ;;  %v12410_v46 = vrot.slane %v8953_v29, 1  ;;  %v1888_v33 = vmax.f32 %v6730_v24, 0.0 }
 0x217   :  { %12407 = vst [vmem:[#allocation53_spill] sm:$0xff] %v9317_v8  ;;  %12408 = vst [vmem:[#allocation54_spill] sm:$0xff] %v9319_v19  ;;  %v9321_v49 = vmax.f32 %v2478_v54, %v2633_v52  ;;  %v2960_v26 = vmax.f32 %v2479_v4, %v2635_v2  ;;  %v9330_v35 = vpop.f32.mrb[39].mxu0  ;;  %v9332_v16 = vpop.f32.mrb[39].mxu1  ;;  %v9334_v8 = vmax.f32 %v6794_v22, 0.0  ;;  %v9336_v19 = vmax.f32 %v6731_v45, 0.0 }
 0x218   :  { %v2148_v3 = vsel %vm417_vm1, %v12411_v30, %v12410_v46  ;;  %12412 = vst [vmem:[#allocation56_spill] sm:$0xff] %v9330_v35  ;;  %12413 = vst [vmem:[#allocation57_spill] sm:$0xff] %v9332_v16  ;;  %v9340_v6 = vmax.f32 %v6795_v21, 0.0  ;;  %v12414_v54 = vrot.slane %v8953_v29, 2  ;;  %v12415_v4 = vrot.slane %v8872_v28, 2 }
 0x219   :  { %12409 = vst [vmem:[#allocation55_spill] sm:$0xff] %v9321_v49  ;;  %v2476_v2 = vmax.f32 %v8872_v28, %v2148_v3  ;;  %v7102_v52 = vpack.i.bf16 %v2960_v26, %v9321_v49  ;;  %v12416_v30 = vrot.slane %v9006_v60, 1  ;;  %v12417_v24 = vrot.slane %v8953_v29, 1 }
 0x21a   :  { %v2629_v46 = vsel %vm2581_vm2, %v12415_v4, %v12414_v54  ;;  %v2177_v45 = vrot.slane %v1888_v33, 1  ;;  %v2658_v16 = vrot.slane %v1888_v33, 2  ;;  %v12252_v3 = vrot.slane %v9334_v8, 1 }
 0x21b   :  { %v2156_v22 = vsel %vm417_vm1, %v12417_v24, %v12416_v30  ;;  %7103 = vrot.lane.b32.xlu0 %v7102_v52, %s7964_s2  ;;  %v12254_v21 = vrot.slane %v9336_v19, 1  ;;  %v2957_v4 = vmax.f32 %v2476_v2, %v2629_v46  ;;  %v9369_v52 = vpop.f32.mrb[40].mxu0  ;;  %v9371_v49 = vpop.f32.mrb[40].mxu1  ;;  %v12422_v28 = vmov %v12414_v54 }
 0x21c   :  { %v9359_v35 = vsel %vm417_vm1, %v2169_v53, %v2177_v45  ;;  %v2497_v63 = vmax.f32 %v1888_v33, %v2177_v45  ;;  %v9362_v30 = vsel %vm2581_vm2, %v2650_v39, %v2658_v16  ;;  %v9367_v24 = vmax.f32 %v9334_v8, %v12252_v3  ;;  %v9382_v2 = vpop.f32.mrb[41].mxu0  ;;  %v9384_v46 = vpop.f32.mrb[41].mxu1 }
 0x21d   :  { %12418 = vst [vmem:[#allocation58_spill] sm:$0xff] %v9359_v35  ;;  %12419 = vst [vmem:[#allocation59_spill] sm:$0xff] %v9362_v30  ;;  %v9378_v53 = vmax.f32 %v9336_v19, %v12254_v21  ;;  %v7087_v39 = vpack.i.bf16 %v2957_v4, %v9248_v47  ;;  %v2480_v33 = vmax.f32 %v8953_v29, %v2156_v22  ;;  %v12421_v3 = vrot.slane %v9006_v60, 2  ;;  %v9403_v4 = vpop.f32.mrb[42].mxu0 }
 0x21e   :  { %v9386_v45 = vmax.f32 %v2497_v63, %v2658_v16  ;;  %v12423_v35 = vrot.slane %v9004_v7, 2  ;;  %v12425_v47 = vrot.slane %v9002_v36, 2  ;;  %v9405_v63 = vpop.f32.mrb[42].mxu1  ;;  %v6732_v29 = vadd.f32 %v9037_v48, %v8670_v11  ;;  %v9414_v36 = vpop.f32.mrb[43].mxu0 }
 0x21f   :  { %v2637_v54 = vsel %vm2581_vm2, %v12422_v28, %v12421_v3  ;;  %7088 = vrot.lane.b32.xlu1 %v7087_v39, %s7961_s3  ;;  %v6796_v7 = vadd.f32 %v9039_v51, %v8674_v12  ;;  %v6797_v3 = vadd.f32 %v9059_v57, %v8679_v14  ;;  %v12427_v28 = vrot.slane %v9156_v43, 1 }
 0x220   :  { %12420 = vst [vmem:[#allocation60_spill] sm:$0xff] %v9386_v45  ;;  %v9396_v21 = vmax.f32 %v9044_v5, %v12423_v35  ;;  %v9401_v22 = vmax.f32 %v9033_v50, %v12425_v47  ;;  %v2961_v16 = vmax.f32 %v2480_v33, %v2637_v54  ;;  %v6733_v5 = vadd.f32 %v9057_v31, %v8677_v13  ;;  %v9416_v50 = vpop.f32.mrb[43].mxu1 }
 0x221   :  { %12426 = vst [vmem:[#allocation62_spill] sm:$0xff] %v9416_v50  ;;  %v12428_v48 = vrot.slane %v9098_v41, 1  ;;  %v12429_v51 = vrot.slane %v9154_v23, 1  ;;  %v12430_v31 = vrot.slane %v9096_v55, 1  ;;  %v9432_v47 = vmax.f32 %v6732_v29, 0.0 }
 0x222   :  { %12424 = vst [vmem:[#allocation61_spill] sm:$0xff] %v9396_v21  ;;  %v7092_v35 = vpack.i.bf16 %v9401_v22, %v9396_v21  ;;  %v7107_v33 = vpack.i.bf16 %v2961_v16, %v2960_v26  ;;  %v9434_v37 = vmax.f32 %v6796_v7, 0.0  ;;  %v9436_v30 = vmax.f32 %v6733_v5, 0.0 }
 0x223   :  { %v2162_v54 = vsel %vm417_vm1, %v12428_v48, %v12427_v28  ;;  %v2165_v39 = vsel %vm417_vm1, %v12430_v31, %v12429_v51  ;;  %12431 = vst [vmem:[#allocation63_spill] sm:$0xff] %v9432_v47  ;;  %v9438_v57 = vmax.f32 %v6797_v3, 0.0  ;;  %v12432_v28 = vrot.slane %v9156_v43, 2  ;;  %v9457_v51 = vpop.f32.mrb[44].mxu0  ;;  %v9459_v31 = vpop.f32.mrb[44].mxu1 }
 0x224   :  { %v2486_v45 = vmax.f32 %v9098_v41, %v2162_v54  ;;  %v2487_v21 = vmax.f32 %v9096_v55, %v2165_v39  ;;  %v12433_v48 = vrot.slane %v9098_v41, 2  ;;  %7108 = vrot.lane.b32.xlu0 %v7107_v33, %s7961_s3  ;;  %7093 = vrot.lane.b32.xlu1 %v7092_v35, %s7964_s2  ;;  %v2185_v26 = vrot.slane %v9432_v47, 1  ;;  %12434 = vst [vmem:[#allocation64_spill] sm:$0xff] %v9457_v51  ;;  %v9472_v7 = vpop.f32.mrb[45].mxu0  ;;  %v9474_v54 = vpop.f32.mrb[45].mxu1 }
 0x225   :  { %v2666_v16 = vrot.slane %v9432_v47, 2  ;;  %12435 = vst [vmem:[#allocation65_spill] sm:$0xff] %v9459_v31  ;;  %v12436_v35 = vrot.slane %v9154_v23, 2  ;;  %v12437_v39 = vrot.slane %v9096_v55, 2  ;;  %v6798_v41 = vadd.f32 %v9073_v18, %v8674_v12  ;;  %12439 = vst [vmem:[#allocation67_spill] sm:$0xff] %v9472_v7 }
 0x226   :  { %v2643_v50 = vsel %vm2581_vm2, %v12433_v48, %v12432_v28  ;;  %v6734_v48 = vadd.f32 %v9071_v59, %v8670_v11  ;;  %12440 = vst [vmem:[#allocation68_spill] sm:$0xff] %v9474_v54  ;;  %v6735_v29 = vadd.f32 %v9083_v34, %v8677_v13  ;;  %v6799_v55 = vadd.f32 %v9085_v38, %v8679_v14  ;;  %v9485_v59 = vpop.f32.mrb[46].mxu1 }
 0x227   :  { %v2646_v33 = vsel %vm2581_vm2, %v12437_v39, %v12436_v35  ;;  %v9466_v28 = vmax.f32 %v2486_v45, %v2643_v50  ;;  %v12441_v45 = vrot.slane %v9006_v60, 1  ;;  %v9483_v35 = vpop.f32.mrb[46].mxu0  ;;  %12443 = vst [vmem:[#allocation70_spill] sm:$0xff] %v9485_v59  ;;  %v9489_v39 = vmax.f32 %v6798_v41, 0.0 }
 0x228   :  { %v2968_v3 = vmax.f32 %v2487_v21, %v2646_v33  ;;  %12442 = vst [vmem:[#allocation69_spill] sm:$0xff] %v9483_v35  ;;  %v9487_v18 = vmax.f32 %v6734_v48, 0.0  ;;  %v12445_v21 = vrot.slane %v9162_v42, 1  ;;  %v12446_v33 = vrot.slane %v9102_v10, 1  ;;  %v9501_v54 = vpop.f32.mrb[47].mxu0  ;;  %v9503_v35 = vpop.f32.mrb[47].mxu1 }
 0x229   :  { %12438 = vst [vmem:[#allocation66_spill] sm:$0xff] %v9466_v28  ;;  %v2484_v50 = vmax.f32 %v9006_v60, %v12441_v45  ;;  %v12447_v38 = vrot.slane %v9162_v42, 2  ;;  %v12448_v5 = vrot.slane %v9102_v10, 2  ;;  %v9506_v41 = vmax.f32 %v6735_v29, 0.0 }
 0x22a   :  { %12444 = vst [vmem:[#allocation71_spill] sm:$0xff] %v9487_v18  ;;  %v2168_v34 = vsel %vm417_vm1, %v12446_v33, %v12445_v21  ;;  %v7112_v48 = vpack.i.bf16 %v2968_v3, %v9466_v28  ;;  %v9508_v59 = vmax.f32 %v6799_v55, 0.0  ;;  %v12449_v7 = vrot.slane %v9006_v60, 2 }
 0x22b   :  { %v2649_v45 = vsel %vm2581_vm2, %v12448_v5, %v12447_v38  ;;  %v2186_v21 = vrot.slane %v9487_v18, 1  ;;  %v2667_v33 = vrot.slane %v9487_v18, 2  ;;  %v2488_v5 = vmax.f32 %v9102_v10, %v2168_v34  ;;  %v9542_v51 = vpop.f32.mrb[48].mxu1 }
 0x22c   :  { %v2965_v31 = vmax.f32 %v2484_v50, %v12449_v7  ;;  %7113 = vrot.lane.b32.xlu0 %v7112_v48, %s7964_s2  ;;  %v6736_v29 = vadd.f32 %v9117_v15, %v8670_v11  ;;  %v6800_v55 = vadd.f32 %v9119_v9, %v8674_v12  ;;  %v12452_v28 = vrot.slane %v9336_v19, 2  ;;  %v12455_v9 = vld [vmem:[#allocation37_spill] sm:$0xff] }
 0x22d   :  { %v9522_v60 = vsel %vm417_vm1, %v2185_v26, %v2186_v21  ;;  %v9525_v7 = vsel %vm2581_vm2, %v2666_v16, %v2667_v33  ;;  %v9540_v16 = vpop.f32.mrb[48].mxu0  ;;  %v2969_v10 = vmax.f32 %v2488_v5, %v2649_v45  ;;  %v6737_v15 = vadd.f32 %v9127_v27, %v8677_v13 }
 0x22e   :  { %12450 = vst [vmem:[#allocation72_spill] sm:$0xff] %v9522_v60  ;;  %12451 = vst [vmem:[#allocation73_spill] sm:$0xff] %v9525_v7  ;;  %v7097_v50 = vpack.i.bf16 %v2965_v31, %v9401_v22  ;;  %v9538_v26 = vmax.f32 %v9378_v53, %v12452_v28  ;;  %v12454_v22 = vrot.slane %v9334_v8, 2  ;;  %v6801_v34 = vadd.f32 %v12455_v9, %v8679_v14  ;;  %v9554_v53 = vpop.f32.mrb[49].mxu0  ;;  %v9556_v28 = vpop.f32.mrb[49].mxu1 }
 0x22f   :  { %12456 = vst [vmem:[#allocation37_spill] sm:$0xff] %v9556_v28  ;;  %v9558_v48 = vmax.f32 %v6736_v29, 0.0  ;;  %v9560_v38 = vmax.f32 %v6800_v55, 0.0  ;;  %v12458_v45 = vrot.slane %v9262_v1, 1  ;;  %v12459_v5 = vrot.slane %v9156_v43, 1  ;;  %v9572_v9 = vpop.f32.mrb[50].mxu0 }
 0x230   :  { %12453 = vst [vmem:[#allocation74_spill] sm:$0xff] %v9538_v26  ;;  %7098 = vrot.lane.b32.xlu1 %v7097_v50, %s7961_s3  ;;  %v9548_v31 = vmax.f32 %v9367_v24, %v12454_v22  ;;  %v12460_v50 = vrot.slane %v9260_v0, 1  ;;  %v12461_v27 = vrot.slane %v9154_v23, 1  ;;  %v9574_v60 = vpop.f32.mrb[50].mxu1  ;;  %v7117_v29 = vpack.i.bf16 %v2969_v10, %v2968_v3  ;;  %v9582_v28 = vpop.f32.mrb[51].mxu0 }
 0x231   :  { %12457 = vst [vmem:[#allocation75_spill] sm:$0xff] %v9558_v48  ;;  %v2172_v24 = vsel %vm417_vm1, %v12459_v5, %v12458_v45  ;;  %12462 = vst [vmem:[#allocation76_spill] sm:$0xff] %v9574_v60  ;;  %v9578_v47 = vmax.f32 %v6737_v15, 0.0  ;;  %v9580_v7 = vmax.f32 %v6801_v34, 0.0  ;;  %v9584_v45 = vpop.f32.mrb[51].mxu1  ;;  %v2197_v5 = vrot.slane %v9558_v48, 1 }
 0x232   :  { %v2174_v22 = vsel %vm417_vm1, %v12461_v27, %v12460_v50  ;;  %v7132_v55 = vpack.i.bf16 %v9548_v31, %v9538_v26  ;;  %12463 = vst [vmem:[#allocation77_spill] sm:$0xff] %v9584_v45  ;;  %v2678_v50 = vrot.slane %v9558_v48, 2  ;;  %7118 = vrot.lane.b32.xlu0 %v7117_v29, %s7961_s3  ;;  %v2490_v60 = vmax.f32 %v9156_v43, %v2172_v24 }
 0x233   :  { %v9597_v26 = vsel %vm417_vm1, %v2186_v21, %v2197_v5  ;;  %v2491_v29 = vmax.f32 %v9154_v23, %v2174_v22  ;;  %v12466_v27 = vrot.slane %v9262_v1, 2  ;;  %v12467_v10 = vrot.slane %v9156_v43, 2 }
 0x234   :  { %7133 = vrot.lane.b32.xlu1 %v7132_v55, %s7964_s2  ;;  %12464 = vst [vmem:[#allocation78_spill] sm:$0xff] %v9597_v26  ;;  %v9600_v45 = vsel %vm2581_vm2, %v2667_v33, %v2678_v50  ;;  %v12468_v34 = vrot.slane %v9260_v0, 2  ;;  %v12469_v21 = vrot.slane %v9154_v23, 2  ;;  %v6738_v24 = vadd.f32 %v9148_v56, %v8670_v11 }
 0x235   :  { %12465 = vst [vmem:[#allocation79_spill] sm:$0xff] %v9600_v45  ;;  %v2653_v15 = vsel %vm2581_vm2, %v12467_v10, %v12466_v27  ;;  %v6802_v55 = vadd.f32 %v9150_v58, %v8674_v12  ;;  %v6739_v43 = vadd.f32 %v9158_v62, %v8677_v13  ;;  %v9626_v27 = vpop.f32.mrb[52].mxu0  ;;  %v9628_v10 = vpop.f32.mrb[52].mxu1  ;;  %v12474_v56 = vrot.slane %v9340_v6, 1 }
 0x236   :  { %v2655_v33 = vsel %vm2581_vm2, %v12469_v21, %v12468_v34  ;;  %v9618_v3 = vmax.f32 %v2490_v60, %v2653_v15  ;;  %12471 = vst [vmem:[#allocation81_spill] sm:$0xff] %v9626_v27  ;;  %12472 = vst [vmem:[#allocation82_spill] sm:$0xff] %v9628_v10  ;;  %v1904_v23 = vmax.f32 %v6738_v24, 0.0  ;;  %v12473_v34 = vld [vmem:[#allocation39_spill] sm:$0xff]  ;;  %v9638_v58 = vpop.f32.mrb[53].mxu1  ;;  %v12477_v24 = vrot.slane %v9273_v17, 1 }
 0x237   :  { %v9620_v22 = vmax.f32 %v2491_v29, %v2655_v33  ;;  %v6803_v21 = vadd.f32 %v12473_v34, %v8679_v14  ;;  %v2500_v60 = vmax.f32 %v9340_v6, %v12474_v56  ;;  %v9636_v29 = vpop.f32.mrb[53].mxu0  ;;  %12476 = vst [vmem:[#allocation83_spill] sm:$0xff] %v9638_v58  ;;  %v9642_v33 = vmax.f32 %v6802_v55, 0.0  ;;  %v9653_v15 = vpop.f32.mrb[54].mxu1 }
 0x238   :  { %12470 = vst [vmem:[#allocation80_spill] sm:$0xff] %v9618_v3  ;;  %12475 = vst [vmem:[#allocation39_spill] sm:$0xff] %v9636_v29  ;;  %v9644_v26 = vmax.f32 %v6739_v43, 0.0  ;;  %v12478_v34 = vrot.slane %v9162_v42, 1  ;;  %v9651_v56 = vpop.f32.mrb[54].mxu0  ;;  %v2205_v45 = vrot.slane %v1904_v23, 1 }
 0x239   :  { %v7122_v62 = vpack.i.bf16 %v9620_v22, %v9618_v3  ;;  %12479 = vst [vmem:[#allocation84_spill] sm:$0xff] %v9651_v56  ;;  %12480 = vst [vmem:[#allocation85_spill] sm:$0xff] %v9653_v15  ;;  %v2686_v29 = vrot.slane %v1904_v23, 2  ;;  %v9655_v58 = vmax.f32 %v6803_v21, 0.0  ;;  %v12481_v3 = vrot.slane %v9340_v6, 2  ;;  %v9659_v10 = vpop.f32.mrb[55].mxu0 }
 0x23a   :  { %v2176_v18 = vsel %vm417_vm1, %v12478_v34, %v12477_v24  ;;  %v9661_v43 = vpop.f32.mrb[55].mxu1  ;;  %v12264_v27 = vrot.slane %v9642_v33, 1  ;;  %v12266_v34 = vrot.slane %v9644_v26, 1  ;;  %v9669_v21 = vsel %vm417_vm1, %v2197_v5, %v2205_v45 }
 0x23b   :  { %v2981_v55 = vmax.f32 %v2500_v60, %v12481_v3  ;;  %7123 = vrot.lane.b32.xlu0 %v7122_v62, %s7964_s2  ;;  %12482 = vst [vmem:[#allocation86_spill] sm:$0xff] %v9669_v21  ;;  %v2513_v56 = vmax.f32 %v1904_v23, %v2205_v45  ;;  %v9672_v3 = vsel %vm2581_vm2, %v2678_v50, %v2686_v29  ;;  %v12485_v62 = vrot.slane %v9273_v17, 2 }
 0x23c   :  { %12483 = vst [vmem:[#allocation87_spill] sm:$0xff] %v9672_v3  ;;  %v9680_v24 = vmax.f32 %v9642_v33, %v12264_v27  ;;  %v9685_v15 = vmax.f32 %v9644_v26, %v12266_v34  ;;  %v2492_v23 = vmax.f32 %v9162_v42, %v2176_v18  ;;  %v12486_v60 = vrot.slane %v9162_v42, 2  ;;  %v12487_v34 = vld [vmem:[#allocation42_spill] sm:$0xff]  ;;  %v9707_v18 = vpop.f32.mrb[56].mxu1 }
 0x23d   :  { %v9688_v5 = vmax.f32 %v2513_v56, %v2686_v29  ;;  %v7137_v50 = vpack.i.bf16 %v2981_v55, %v9548_v31  ;;  %v6740_v21 = vadd.f32 %v9203_v20, %v8670_v11  ;;  %v6804_v48 = vadd.f32 %v12487_v34, %v8674_v12  ;;  %v12488_v56 = vld [vmem:[#allocation43_spill] sm:$0xff]  ;;  %v9705_v55 = vpop.f32.mrb[56].mxu0 }
 0x23e   :  { %v2657_v27 = vsel %vm2581_vm2, %v12486_v60, %v12485_v62  ;;  %v6741_v29 = vadd.f32 %v9214_v32, %v8677_v13  ;;  %v6805_v31 = vadd.f32 %v12488_v56, %v8679_v14  ;;  %12489 = vst [vmem:[#allocation42_spill] sm:$0xff] %v9705_v55  ;;  %12490 = vst [vmem:[#allocation43_spill] sm:$0xff] %v9707_v18  ;;  %v12491_v60 = vrot.slane %v9506_v41, 1 }
 0x23f   :  { %12484 = vst [vmem:[#allocation88_spill] sm:$0xff] %v9688_v5  ;;  %7138 = vrot.lane.b32.xlu1 %v7137_v50, %s7961_s3  ;;  %v2973_v42 = vmax.f32 %v2492_v23, %v2657_v27  ;;  %v12492_v20 = vrot.slane %v9436_v30, 1  ;;  %v12493_v34 = vrot.slane %v9489_v39, 1  ;;  %v12494_v32 = vrot.slane %v9434_v37, 1  ;;  %v9725_v50 = vpop.f32.mrb[57].mxu0  ;;  %v9727_v27 = vpop.f32.mrb[57].mxu1 }
 0x240   :  { %v12495_v56 = vrot.slane %v9506_v41, 2  ;;  %v12496_v5 = vrot.slane %v9436_v30, 2  ;;  %12497 = vst [vmem:[#allocation89_spill] sm:$0xff] %v9727_v27  ;;  %v9729_v23 = vmax.f32 %v6740_v21, 0.0  ;;  %v9731_v18 = vmax.f32 %v6804_v48, 0.0  ;;  %v9737_v55 = vpop.f32.mrb[58].mxu0 }
 0x241   :  { %v2190_v62 = vsel %vm417_vm1, %v12492_v20, %v12491_v60  ;;  %v2193_v45 = vsel %vm417_vm1, %v12494_v32, %v12493_v34  ;;  %v9733_v60 = vmax.f32 %v6741_v29, 0.0  ;;  %v9735_v20 = vmax.f32 %v6805_v31, 0.0  ;;  %12498 = vst [vmem:[#allocation90_spill] sm:$0xff] %v9737_v55  ;;  %v9739_v34 = vpop.f32.mrb[58].mxu1  ;;  %v9749_v29 = vpop.f32.mrb[59].mxu0 }
 0x242   :  { %v2671_v3 = vsel %vm2581_vm2, %v12496_v5, %v12495_v56  ;;  %12499 = vst [vmem:[#allocation91_spill] sm:$0xff] %v9739_v34  ;;  %v7127_v32 = vpack.i.bf16 %v2973_v42, %v9620_v22  ;;  %v2502_v5 = vmax.f32 %v9436_v30, %v2190_v62  ;;  %v2503_v56 = vmax.f32 %v9434_v37, %v2193_v45  ;;  %v9751_v31 = vpop.f32.mrb[59].mxu1 }
 0x243   :  { %v12500_v27 = vrot.slane %v9489_v39, 2  ;;  %v12501_v21 = vrot.slane %v9434_v37, 2  ;;  %12502 = vst [vmem:[#allocation92_spill] sm:$0xff] %v9749_v29  ;;  %12503 = vst [vmem:[#allocation93_spill] sm:$0xff] %v9751_v31  ;;  %v2213_v55 = vrot.slane %v9729_v23, 1  ;;  %v2694_v34 = vrot.slane %v9729_v23, 2 }
 0x244   :  { %7128 = vrot.lane.b32.xlu0 %v7127_v32, %s7961_s3  ;;  %v12505_v31 = vrot.slane %v9336_v19, 1  ;;  %v12506_v29 = vrot.slane %v9262_v1, 1  ;;  %v12507_v30 = vrot.slane %v9334_v8, 1  ;;  %v12508_v32 = vrot.slane %v9260_v0, 1 }
 0x245   :  { %v2674_v48 = vsel %vm2581_vm2, %v12501_v21, %v12500_v27  ;;  %v9762_v27 = vmax.f32 %v2502_v5, %v2671_v3  ;;  %v12509_v3 = vrot.slane %v9336_v19, 2  ;;  %v12510_v5 = vrot.slane %v9262_v1, 2  ;;  %v12513_v19 = vld [vmem:[#allocation46_spill] sm:$0xff] }
 0x246   :  { %v2984_v21 = vmax.f32 %v2503_v56, %v2674_v48  ;;  %v2180_v22 = vsel %vm417_vm1, %v12506_v29, %v12505_v31  ;;  %v2182_v45 = vsel %vm417_vm1, %v12508_v32, %v12507_v30  ;;  %v12511_v48 = vrot.slane %v9334_v8, 2  ;;  %v9795_v32 = vpop.f32.mrb[60].mxu1 }
 0x247   :  { %12504 = vst [vmem:[#allocation94_spill] sm:$0xff] %v9762_v27  ;;  %v2494_v37 = vmax.f32 %v9262_v1, %v2180_v22  ;;  %v2495_v42 = vmax.f32 %v9260_v0, %v2182_v45  ;;  %v2661_v56 = vsel %vm2581_vm2, %v12510_v5, %v12509_v3  ;;  %v12512_v29 = vrot.slane %v9260_v0, 2  ;;  %v9793_v1 = vpop.f32.mrb[60].mxu0  ;;  %12514 = vst [vmem:[#allocation46_spill] sm:$0xff] %v9795_v32  ;;  %v12516_v3 = vld [vmem:[#allocation47_spill] sm:$0xff] }
 0x248   :  { %v7152_v62 = vpack.i.bf16 %v2984_v21, %v9762_v27  ;;  %v6742_v30 = vadd.f32 %v9231_v25, %v8670_v11  ;;  %v6806_v22 = vadd.f32 %v9233_v61, %v8674_v12  ;;  %v6743_v45 = vadd.f32 %v12513_v19, %v8677_v13  ;;  %v9806_v61 = vpop.f32.mrb[61].mxu0  ;;  %v9808_v27 = vpop.f32.mrb[61].mxu1 }
 0x249   :  { %v2663_v31 = vsel %vm2581_vm2, %v12512_v29, %v12511_v48  ;;  %v9797_v8 = vmax.f32 %v2494_v37, %v2661_v56  ;;  %v6807_v5 = vadd.f32 %v12516_v3, %v8679_v14  ;;  %v12517_v48 = vrot.slane %v9508_v59, 1  ;;  %12519 = vst [vmem:[#allocation47_spill] sm:$0xff] %v9806_v61  ;;  %12520 = vst [vmem:[#allocation96_spill] sm:$0xff] %v9808_v27  ;;  %v9820_v3 = vpop.f32.mrb[62].mxu1 }
 0x24a   :  { %v2976_v0 = vmax.f32 %v2495_v42, %v2663_v31  ;;  %v12518_v25 = vrot.slane %v9438_v57, 1  ;;  %7153 = vrot.lane.b32.xlu1 %v7152_v62, %s7964_s2  ;;  %v9811_v19 = vmax.f32 %v6742_v30, 0.0  ;;  %v9813_v37 = vmax.f32 %v6806_v22, 0.0  ;;  %v9818_v31 = vpop.f32.mrb[62].mxu0  ;;  %12523 = vst [vmem:[#allocation99_spill] sm:$0xff] %v9820_v3 }
 0x24b   :  { %12515 = vst [vmem:[#allocation95_spill] sm:$0xff] %v9797_v8  ;;  %v9815_v42 = vmax.f32 %v6743_v45, 0.0  ;;  %12522 = vst [vmem:[#allocation98_spill] sm:$0xff] %v9818_v31  ;;  %v12524_v27 = vrot.slane %v9508_v59, 2  ;;  %v12525_v62 = vrot.slane %v9438_v57, 2  ;;  %v12526_v22 = vrot.slane %v9340_v6, 1 }
 0x24c   :  { %v2196_v29 = vsel %vm417_vm1, %v12518_v25, %v12517_v48  ;;  %12521 = vst [vmem:[#allocation97_spill] sm:$0xff] %v9811_v19  ;;  %v7142_v48 = vpack.i.bf16 %v2976_v0, %v9797_v8  ;;  %v9823_v25 = vmax.f32 %v6807_v5, 0.0  ;;  %v12527_v45 = vrot.slane %v9273_v17, 1  ;;  %v9835_v61 = vpop.f32.mrb[63].mxu0  ;;  %v9837_v31 = vpop.f32.mrb[63].mxu1 }
 0x24d   :  { %v2504_v56 = vmax.f32 %v9438_v57, %v2196_v29  ;;  %v2677_v30 = vsel %vm2581_vm2, %v12525_v62, %v12524_v27  ;;  %12528 = vst [vmem:[#allocation100_spill] sm:$0xff] %v9835_v61  ;;  %12529 = vst [vmem:[#allocation101_spill] sm:$0xff] %v9837_v31  ;;  %v2214_v8 = vrot.slane %v9811_v19, 1  ;;  %v2695_v5 = vrot.slane %v9811_v19, 2 }
 0x24e   :  { %v2184_v29 = vsel %vm417_vm1, %v12527_v45, %v12526_v22  ;;  %7143 = vrot.lane.b32.xlu0 %v7142_v48, %s7964_s2  ;;  %v12531_v57 = vrot.slane %v9340_v6, 2  ;;  %v12532_v62 = vrot.slane %v9273_v17, 2  ;;  %v6744_v45 = vadd.f32 %v9289_v44, %v8670_v11 }
 0x24f   :  { %v9849_v31 = vsel %vm417_vm1, %v2213_v55, %v2214_v8  ;;  %v9852_v61 = vsel %vm2581_vm2, %v2694_v34, %v2695_v5  ;;  %v2985_v32 = vmax.f32 %v2504_v56, %v2677_v30  ;;  %v2496_v3 = vmax.f32 %v9273_v17, %v2184_v29  ;;  %v12533_v56 = vld [vmem:[#allocation51_spill] sm:$0xff]  ;;  %v12534_v29 = vld [vmem:[#allocation52_spill] sm:$0xff] }
 0x250   :  { %12530 = vst [vmem:[#allocation102_spill] sm:$0xff] %v9849_v31  ;;  %v2665_v22 = vsel %vm2581_vm2, %v12532_v62, %v12531_v57  ;;  %v6808_v55 = vadd.f32 %v9291_v40, %v8674_v12  ;;  %v6745_v30 = vadd.f32 %v12533_v56, %v8677_v13  ;;  %v6809_v48 = vadd.f32 %v12534_v29, %v8679_v14 }
 0x251   :  { %v7157_v34 = vpack.i.bf16 %v2985_v32, %v2984_v21  ;;  %v2977_v27 = vmax.f32 %v2496_v3, %v2665_v22  ;;  %v9870_v31 = vmax.f32 %v6744_v45, 0.0  ;;  %v12536_v17 = vrot.slane %v9578_v47, 1 }
 0x252   :  { %v9872_v6 = vmax.f32 %v6808_v55, 0.0  ;;  %v12537_v57 = vrot.slane %v9506_v41, 1  ;;  %v12538_v40 = vrot.slane %v9560_v38, 1  ;;  %v12539_v21 = vrot.slane %v9489_v39, 1 }
 0x253   :  { %12535 = vst [vmem:[#allocation51_spill] sm:$0xff] %v9870_v31  ;;  %7158 = vrot.lane.b32.xlu1 %v7157_v34, %s7961_s3  ;;  %v7147_v3 = vpack.i.bf16 %v2977_v27, %v2976_v0  ;;  %v9885_v62 = vmax.f32 %v6745_v30, 0.0  ;;  %v9887_v22 = vmax.f32 %v6809_v48, 0.0  ;;  %v2225_v55 = vrot.slane %v9870_v31, 1 }
 0x254   :  { %v2200_v44 = vsel %vm417_vm1, %v12537_v57, %v12536_v17  ;;  %v2202_v32 = vsel %vm417_vm1, %v12539_v21, %v12538_v40  ;;  %v2706_v56 = vrot.slane %v9870_v31, 2  ;;  %v12542_v40 = vrot.slane %v9578_v47, 2  ;;  %v12590_v31 = vld [vmem:[#allocation68_spill] sm:$0xff] }
 0x255   :  { %v2506_v45 = vmax.f32 %v9506_v41, %v2200_v44  ;;  %7148 = vrot.lane.b32.xlu0 %v7147_v3, %s7961_s3  ;;  %v9900_v34 = vsel %vm417_vm1, %v2214_v8, %v2225_v55  ;;  %v2507_v44 = vmax.f32 %v9489_v39, %v2202_v32  ;;  %v12543_v21 = vrot.slane %v9506_v41, 2 }
 0x256   :  { %12540 = vst [vmem:[#allocation52_spill] sm:$0xff] %v9900_v34  ;;  %v9903_v30 = vsel %vm2581_vm2, %v2695_v5, %v2706_v56  ;;  %v12544_v27 = vrot.slane %v9560_v38, 2  ;;  %v12545_v48 = vrot.slane %v9489_v39, 2  ;;  %v12546_v5 = vrot.slane %v9644_v26, 1 }
 0x257   :  { %12541 = vst [vmem:[#allocation103_spill] sm:$0xff] %v9903_v30  ;;  %v2681_v3 = vsel %vm2581_vm2, %v12543_v21, %v12542_v40  ;;  %v12547_v32 = vmov %v12536_v17  ;;  %v12548_v40 = vrot.slane %v9642_v33, 1  ;;  %v12549_v21 = vrot.slane %v9560_v38, 1 }
 0x258   :  { %v2683_v8 = vsel %vm2581_vm2, %v12545_v48, %v12544_v27  ;;  %v9918_v0 = vmax.f32 %v2506_v45, %v2681_v3  ;;  %v2208_v29 = vsel %vm417_vm1, %v12547_v32, %v12546_v5  ;;  %v12550_v39 = vrot.slane %v9644_v26, 2  ;;  %v12554_v5 = vld [vmem:[#allocation53_spill] sm:$0xff] }
 0x259   :  { %v2988_v41 = vmax.f32 %v2507_v44, %v2683_v8  ;;  %v2210_v17 = vsel %vm417_vm1, %v12549_v21, %v12548_v40  ;;  %v2510_v57 = vmax.f32 %v9578_v47, %v2208_v29  ;;  %v12551_v45 = vrot.slane %v9578_v47, 2  ;;  %v12555_v40 = vld [vmem:[#allocation54_spill] sm:$0xff]  ;;  %v12556_v47 = vld [vmem:[#allocation56_spill] sm:$0xff] }
 0x25a   :  { %v2511_v48 = vmax.f32 %v9560_v38, %v2210_v17  ;;  %v12552_v3 = vrot.slane %v9642_v33, 2  ;;  %v12553_v44 = vrot.slane %v9560_v38, 2  ;;  %v6746_v32 = vadd.f32 %v12554_v5, %v8670_v11  ;;  %v12557_v17 = vld [vmem:[#allocation57_spill] sm:$0xff] }
 0x25b   :  { %v2689_v27 = vsel %vm2581_vm2, %v12551_v45, %v12550_v39  ;;  %v6810_v29 = vadd.f32 %v12555_v40, %v8674_v12  ;;  %v7162_v21 = vpack.i.bf16 %v2988_v41, %v9918_v0  ;;  %v6747_v39 = vadd.f32 %v12556_v47, %v8677_v13 }
 0x25c   :  { %v2691_v8 = vsel %vm2581_vm2, %v12553_v44, %v12552_v3  ;;  %v9947_v34 = vmax.f32 %v2510_v57, %v2689_v27  ;;  %v6811_v45 = vadd.f32 %v12557_v17, %v8679_v14  ;;  %v1920_v38 = vmax.f32 %v6746_v32, 0.0 }
 0x25d   :  { %v2992_v19 = vmax.f32 %v2511_v48, %v2691_v8  ;;  %v9953_v30 = vmax.f32 %v6810_v29, 0.0  ;;  %v12558_v3 = vrot.slane %v9580_v7, 1  ;;  %v12559_v44 = vrot.slane %v9508_v59, 1  ;;  %7163 = vrot.lane.b32.xlu1 %v7162_v21, %s7964_s2 }
 0x25e   :  { %v9961_v57 = vmax.f32 %v6747_v39, 0.0  ;;  %v9963_v27 = vmax.f32 %v6811_v45, 0.0  ;;  %v12560_v47 = vrot.slane %v9580_v7, 2  ;;  %v12561_v48 = vrot.slane %v9508_v59, 2 }
 0x25f   :  { %v2204_v5 = vsel %vm417_vm1, %v12559_v44, %v12558_v3  ;;  %v7182_v32 = vpack.i.bf16 %v2992_v19, %v9947_v34  ;;  %v2233_v29 = vrot.slane %v1920_v38, 1  ;;  %v2714_v17 = vrot.slane %v1920_v38, 2 }
 0x260   :  { %v2508_v40 = vmax.f32 %v9508_v59, %v2204_v5  ;;  %v2685_v8 = vsel %vm2581_vm2, %v12561_v48, %v12560_v47  ;;  %v12273_v3 = vrot.slane %v9953_v30, 1  ;;  %v12275_v39 = vrot.slane %v9961_v57, 1 }
 0x261   :  { %7183 = vrot.lane.b32.xlu0 %v7182_v32, %s7964_s2  ;;  %v9979_v59 = vsel %vm417_vm1, %v2225_v55, %v2233_v29  ;;  %v2529_v5 = vmax.f32 %v1920_v38, %v2233_v29  ;;  %v9982_v47 = vsel %vm2581_vm2, %v2706_v56, %v2714_v17  ;;  %v12564_v55 = vrot.slane %v9655_v58, 1 }
 0x262   :  { %12562 = vst [vmem:[#allocation53_spill] sm:$0xff] %v9979_v59  ;;  %12563 = vst [vmem:[#allocation54_spill] sm:$0xff] %v9982_v47  ;;  %v9987_v48 = vmax.f32 %v9953_v30, %v12273_v3  ;;  %v9994_v44 = vmax.f32 %v9961_v57, %v12275_v39  ;;  %v2989_v32 = vmax.f32 %v2508_v40, %v2685_v8  ;;  %v12565_v38 = vrot.slane %v9580_v7, 1 }
 0x263   :  { %v10001_v29 = vmax.f32 %v2529_v5, %v2714_v17  ;;  %v12566_v45 = vrot.slane %v9655_v58, 2  ;;  %v12567_v21 = vrot.slane %v9580_v7, 2  ;;  %v6748_v39 = vadd.f32 %v9369_v52, %v8670_v11 }
 0x264   :  { %v2212_v56 = vsel %vm417_vm1, %v12565_v38, %v12564_v55  ;;  %v7167_v40 = vpack.i.bf16 %v2989_v32, %v2988_v41  ;;  %v6812_v8 = vadd.f32 %v9371_v49, %v8674_v12  ;;  %v6749_v55 = vadd.f32 %v9382_v2, %v8677_v13 }
 0x265   :  { %v2512_v3 = vmax.f32 %v9580_v7, %v2212_v56  ;;  %v2693_v59 = vsel %vm2581_vm2, %v12567_v21, %v12566_v45  ;;  %v6813_v17 = vadd.f32 %v9384_v46, %v8679_v14  ;;  %v10017_v38 = vmax.f32 %v6748_v39, 0.0 }
 0x266   :  { %v12568_v7 = vrot.slane %v9644_v26, 2  ;;  %v12569_v52 = vrot.slane %v9642_v33, 2  ;;  %7168 = vrot.lane.b32.xlu1 %v7167_v40, %s7961_s3  ;;  %v10028_v49 = vmax.f32 %v6812_v8, 0.0  ;;  %v10030_v2 = vmax.f32 %v6749_v55, 0.0 }
 0x267   :  { %v2993_v5 = vmax.f32 %v2512_v3, %v2693_v59  ;;  %v10032_v45 = vmax.f32 %v6813_v17, 0.0  ;;  %v12570_v46 = vrot.slane %v9815_v42, 1  ;;  %v12571_v3 = vrot.slane %v9733_v60, 1 }
 0x268   :  { %v10022_v21 = vmax.f32 %v9685_v15, %v12568_v7  ;;  %v2996_v41 = vmax.f32 %v9680_v24, %v12569_v52  ;;  %v2241_v39 = vrot.slane %v10017_v38, 1  ;;  %v2722_v33 = vrot.slane %v10017_v38, 2 }
 0x269   :  { %v2218_v26 = vsel %vm417_vm1, %v12571_v3, %v12570_v46  ;;  %v7187_v15 = vpack.i.bf16 %v2993_v5, %v2992_v19  ;;  %v12572_v55 = vrot.slane %v9813_v37, 1  ;;  %v12573_v17 = vrot.slane %v9731_v18, 1 }
 0x26a   :  { %v7172_v24 = vpack.i.bf16 %v2996_v41, %v10022_v21  ;;  %v2518_v7 = vmax.f32 %v9733_v60, %v2218_v26  ;;  %v12574_v46 = vrot.slane %v9815_v42, 2  ;;  %v12575_v3 = vrot.slane %v9733_v60, 2  ;;  %v12578_v60 = vld [vmem:[#allocation62_spill] sm:$0xff] }
 0x26b   :  { %7188 = vrot.lane.b32.xlu0 %v7187_v15, %s7961_s3  ;;  %v2221_v5 = vsel %vm417_vm1, %v12573_v17, %v12572_v55  ;;  %v12576_v19 = vrot.slane %v9813_v37, 2  ;;  %v12577_v8 = vrot.slane %v9731_v18, 2  ;;  %v6750_v55 = vadd.f32 %v9403_v4, %v8670_v11 }
 0x26c   :  { %7173 = vrot.lane.b32.xlu1 %v7172_v24, %s7964_s2  ;;  %v2519_v52 = vmax.f32 %v9731_v18, %v2221_v5  ;;  %v2699_v15 = vsel %vm2581_vm2, %v12575_v3, %v12574_v46  ;;  %v6814_v24 = vadd.f32 %v9405_v63, %v8674_v12  ;;  %v6751_v17 = vadd.f32 %v9414_v36, %v8677_v13 }
 0x26d   :  { %v2702_v32 = vsel %vm2581_vm2, %v12577_v8, %v12576_v19  ;;  %v10069_v26 = vmax.f32 %v2518_v7, %v2699_v15  ;;  %v6815_v5 = vadd.f32 %v12578_v60, %v8679_v14  ;;  %v10077_v3 = vmax.f32 %v6750_v55, 0.0 }
 0x26e   :  { %v3000_v46 = vmax.f32 %v2519_v52, %v2702_v32  ;;  %v12580_v18 = vrot.slane %v9655_v58, 1  ;;  %v12581_v4 = vrot.slane %v9823_v25, 1  ;;  %v12582_v19 = vrot.slane %v9735_v20, 1 }
 0x26f   :  { %12579 = vst [vmem:[#allocation56_spill] sm:$0xff] %v10077_v3  ;;  %v10087_v63 = vmax.f32 %v6814_v24, 0.0  ;;  %v10089_v15 = vmax.f32 %v6751_v17, 0.0  ;;  %v10091_v36 = vmax.f32 %v6815_v5, 0.0  ;;  %v2242_v55 = vrot.slane %v10077_v3, 1 }
 0x270   :  { %v2516_v8 = vmax.f32 %v9655_v58, %v12580_v18  ;;  %v2224_v7 = vsel %vm417_vm1, %v12582_v19, %v12581_v4  ;;  %v7192_v52 = vpack.i.bf16 %v3000_v46, %v10069_v26  ;;  %v2723_v60 = vrot.slane %v10077_v3, 2 }
 0x271   :  { %v2520_v32 = vmax.f32 %v9735_v20, %v2224_v7  ;;  %v12583_v18 = vrot.slane %v9655_v58, 2  ;;  %v10105_v4 = vsel %vm417_vm1, %v2241_v39, %v2242_v55  ;;  %v12585_v24 = vrot.slane %v9823_v25, 2  ;;  %v12587_v39 = vld [vmem:[#allocation64_spill] sm:$0xff]  ;;  %v12589_v7 = vld [vmem:[#allocation67_spill] sm:$0xff] }
 0x272   :  { %7193 = vrot.lane.b32.xlu0 %v7192_v52, %s7964_s2  ;;  %12584 = vst [vmem:[#allocation57_spill] sm:$0xff] %v10105_v4  ;;  %v10108_v19 = vsel %vm2581_vm2, %v2722_v33, %v2723_v60  ;;  %v12586_v5 = vrot.slane %v9735_v20, 2  ;;  %v6752_v59 = vadd.f32 %v12587_v39, %v8670_v11  ;;  %v12588_v33 = vld [vmem:[#allocation65_spill] sm:$0xff]  ;;  %v6753_v58 = vadd.f32 %v12589_v7, %v8677_v13 }
 0x273   :  { %v2997_v40 = vmax.f32 %v2516_v8, %v12583_v18  ;;  %v6816_v17 = vadd.f32 %v12588_v33, %v8674_v12  ;;  %v6817_v8 = vadd.f32 %v12590_v31, %v8679_v14  ;;  %v12592_v20 = vrot.slane %v9961_v57, 2 }
 0x274   :  { %v2705_v52 = vsel %vm2581_vm2, %v12586_v5, %v12585_v24  ;;  %v12594_v5 = vrot.slane %v9885_v62, 1  ;;  %v12595_v7 = vrot.slane %v9815_v42, 1  ;;  %v12603_v47 = vrot.slane %v9813_v37, 2 }
 0x275   :  { %v7177_v18 = vpack.i.bf16 %v2997_v40, %v2996_v41  ;;  %v3001_v56 = vmax.f32 %v2520_v32, %v2705_v52  ;;  %v10128_v41 = vmax.f32 %v6752_v59, 0.0  ;;  %v10133_v40 = vmax.f32 %v9994_v44, %v12592_v20 }
 0x276   :  { %v12593_v32 = vrot.slane %v9953_v30, 2  ;;  %v2228_v31 = vsel %vm417_vm1, %v12595_v7, %v12594_v5  ;;  %v10147_v59 = vmax.f32 %v6753_v58, 0.0  ;;  %v10149_v39 = vmax.f32 %v6817_v8, 0.0 }
 0x277   :  { %7178 = vrot.lane.b32.xlu1 %v7177_v18, %s7961_s3  ;;  %12591 = vst [vmem:[#allocation62_spill] sm:$0xff] %v10128_v41  ;;  %v7197_v52 = vpack.i.bf16 %v3001_v56, %v3000_v46  ;;  %v10145_v18 = vmax.f32 %v6816_v17, 0.0  ;;  %v2253_v44 = vrot.slane %v10128_v41, 1  ;;  %v2734_v33 = vrot.slane %v10128_v41, 2 }
 0x278   :  { %v10138_v24 = vmax.f32 %v9987_v48, %v12593_v32  ;;  %v12596_v20 = vrot.slane %v9872_v6, 1  ;;  %v12597_v32 = vrot.slane %v9813_v37, 1  ;;  %v12600_v58 = vrot.slane %v9885_v62, 2 }
 0x279   :  { %7198 = vrot.lane.b32.xlu0 %v7197_v52, %s7961_s3  ;;  %v10166_v8 = vsel %vm417_vm1, %v2242_v55, %v2253_v44  ;;  %v10169_v7 = vsel %vm2581_vm2, %v2723_v60, %v2734_v33  ;;  %v12601_v55 = vrot.slane %v9815_v42, 2  ;;  %v12602_v56 = vrot.slane %v9872_v6, 2  ;;  %v12605_v52 = vld [vmem:[#allocation70_spill] sm:$0xff] }
 0x27a   :  { %v7212_v48 = vpack.i.bf16 %v10138_v24, %v10133_v40  ;;  %v2230_v5 = vsel %vm417_vm1, %v12597_v32, %v12596_v20  ;;  %12598 = vst [vmem:[#allocation64_spill] sm:$0xff] %v10166_v8  ;;  %12599 = vst [vmem:[#allocation65_spill] sm:$0xff] %v10169_v7  ;;  %v2522_v32 = vmax.f32 %v9815_v42, %v2228_v31 }
 0x27b   :  { %v2523_v46 = vmax.f32 %v9813_v37, %v2230_v5  ;;  %v2709_v60 = vsel %vm2581_vm2, %v12601_v55, %v12600_v58  ;;  %v2711_v20 = vsel %vm2581_vm2, %v12603_v47, %v12602_v56  ;;  %v6818_v31 = vadd.f32 %v12605_v52, %v8674_v12 }
 0x27c   :  { %7213 = vrot.lane.b32.xlu1 %v7212_v48, %s7964_s2  ;;  %v12604_v48 = vld [vmem:[#allocation69_spill] sm:$0xff]  ;;  %v6755_v5 = vadd.f32 %v9501_v54, %v8677_v13  ;;  %v10194_v8 = vmax.f32 %v2522_v32, %v2709_v60  ;;  %v6819_v58 = vadd.f32 %v9503_v35, %v8679_v14  ;;  %v12606_v55 = vrot.slane %v9963_v27, 1 }
 0x27d   :  { %v6754_v17 = vadd.f32 %v12604_v48, %v8670_v11  ;;  %v3004_v42 = vmax.f32 %v2523_v46, %v2711_v20  ;;  %v10201_v56 = vmax.f32 %v6818_v31, 0.0  ;;  %v12607_v46 = vrot.slane %v9887_v22, 1 }
 0x27e   :  { %v2532_v37 = vmax.f32 %v9963_v27, %v12606_v55  ;;  %v10203_v48 = vmax.f32 %v6755_v5, 0.0  ;;  %v10207_v54 = vmax.f32 %v6819_v58, 0.0  ;;  %v12608_v20 = vrot.slane %v9823_v25, 1 }
 0x27f   :  { %v1936_v47 = vmax.f32 %v6754_v17, 0.0  ;;  %v7202_v3 = vpack.i.bf16 %v3004_v42, %v10194_v8  ;;  %v12609_v32 = vrot.slane %v9887_v22, 2  ;;  %v12610_v17 = vrot.slane %v9823_v25, 2 }
 0x280   :  { %v2232_v35 = vsel %vm417_vm1, %v12608_v20, %v12607_v46  ;;  %v12280_v55 = vrot.slane %v10201_v56, 1  ;;  %v12281_v58 = vrot.slane %v10203_v48, 1  ;;  %v6820_v7 = vadd.f32 %v9542_v51, %v8674_v12 }
 0x281   :  { %v2713_v60 = vsel %vm2581_vm2, %v12610_v17, %v12609_v32  ;;  %v2261_v31 = vrot.slane %v1936_v47, 1  ;;  %v2742_v5 = vrot.slane %v1936_v47, 2  ;;  %7203 = vrot.lane.b32.xlu0 %v7202_v3, %s7964_s2  ;;  %v6757_v3 = vadd.f32 %v9554_v53, %v8677_v13 }
 0x282   :  { %v10235_v52 = vmax.f32 %v10201_v56, %v12280_v55  ;;  %v10242_v46 = vmax.f32 %v10203_v48, %v12281_v58  ;;  %v12618_v53 = vrot.slane %v10087_v63, 1 }
 0x283   :  { %v10227_v4 = vsel %vm417_vm1, %v2253_v44, %v2261_v31  ;;  %v2545_v32 = vmax.f32 %v1936_v47, %v2261_v31  ;;  %v10230_v17 = vsel %vm2581_vm2, %v2734_v33, %v2742_v5  ;;  %v12612_v44 = vrot.slane %v9963_v27, 2 }
 0x284   :  { %12611 = vst [vmem:[#allocation67_spill] sm:$0xff] %v10227_v4  ;;  %v2524_v47 = vmax.f32 %v9823_v25, %v2232_v35  ;;  %v6756_v31 = vadd.f32 %v9540_v16, %v8670_v11  ;;  %v12614_v4 = vld [vmem:[#allocation37_spill] sm:$0xff]  ;;  %v12616_v25 = vrot.slane %v10030_v2, 1  ;;  %v10265_v16 = vmax.f32 %v6820_v7, 0.0 }
 0x285   :  { %v3013_v20 = vmax.f32 %v2532_v37, %v12612_v44  ;;  %v10247_v33 = vmax.f32 %v2545_v32, %v2742_v5  ;;  %v6821_v41 = vadd.f32 %v12614_v4, %v8679_v14  ;;  %v12615_v37 = vrot.slane %v10089_v15, 1 }
 0x286   :  { %v3005_v58 = vmax.f32 %v2524_v47, %v2713_v60  ;;  %v10263_v5 = vmax.f32 %v6756_v31, 0.0  ;;  %v10267_v51 = vmax.f32 %v6757_v3, 0.0  ;;  %v12625_v31 = vrot.slane %v9885_v62, 1 }
 0x287   :  { %12613 = vst [vmem:[#allocation68_spill] sm:$0xff] %v10247_v33  ;;  %v7217_v55 = vpack.i.bf16 %v3013_v20, %v10138_v24  ;;  %v2246_v35 = vsel %vm417_vm1, %v12616_v25, %v12615_v37  ;;  %v12619_v24 = vrot.slane %v10028_v49, 1  ;;  %v10275_v20 = vmax.f32 %v6821_v41, 0.0 }
 0x288   :  { %12617 = vst [vmem:[#allocation69_spill] sm:$0xff] %v10263_v5  ;;  %v7207_v4 = vpack.i.bf16 %v3005_v58, %v3004_v42  ;;  %v2534_v32 = vmax.f32 %v10030_v2, %v2246_v35  ;;  %v2269_v7 = vrot.slane %v10263_v5, 1  ;;  %v2750_v3 = vrot.slane %v10263_v5, 2 }
 0x289   :  { %v2249_v60 = vsel %vm417_vm1, %v12619_v24, %v12618_v53  ;;  %7218 = vrot.lane.b32.xlu1 %v7217_v55, %s7961_s3  ;;  %v12620_v58 = vrot.slane %v10089_v15, 2  ;;  %v12621_v25 = vrot.slane %v10030_v2, 2  ;;  %v12622_v53 = vrot.slane %v10087_v63, 2 }
 0x28a   :  { %v2535_v44 = vmax.f32 %v10028_v49, %v2249_v60  ;;  %7208 = vrot.lane.b32.xlu0 %v7207_v4, %s7961_s3  ;;  %v12623_v24 = vrot.slane %v10028_v49, 2  ;;  %v12624_v4 = vrot.slane %v9961_v57, 1  ;;  %v12626_v55 = vrot.slane %v9953_v30, 1 }
 0x28b   :  { %v2727_v35 = vsel %vm2581_vm2, %v12621_v25, %v12620_v58  ;;  %v12627_v42 = vrot.slane %v9872_v6, 1 }
 0x28c   :  { %v2730_v60 = vsel %vm2581_vm2, %v12623_v24, %v12622_v53  ;;  %v2236_v41 = vsel %vm417_vm1, %v12625_v31, %v12624_v4  ;;  %v10308_v47 = vmax.f32 %v2534_v32, %v2727_v35  ;;  %v12628_v53 = vrot.slane %v9961_v57, 2 }
 0x28d   :  { %v2238_v2 = vsel %vm417_vm1, %v12627_v42, %v12626_v55  ;;  %v3016_v58 = vmax.f32 %v2535_v44, %v2730_v60  ;;  %v2526_v25 = vmax.f32 %v9885_v62, %v2236_v41  ;;  %v12629_v24 = vrot.slane %v9885_v62, 2  ;;  %v12632_v44 = vld [vmem:[#allocation76_spill] sm:$0xff] }
 0x28e   :  { %v2527_v49 = vmax.f32 %v9872_v6, %v2238_v2  ;;  %v12630_v31 = vrot.slane %v9953_v30, 2  ;;  %v12631_v4 = vrot.slane %v9872_v6, 2  ;;  %v6758_v32 = vadd.f32 %v9572_v9, %v8670_v11  ;;  %v12634_v6 = vld [vmem:[#allocation77_spill] sm:$0xff] }
 0x28f   :  { %v2717_v37 = vsel %vm2581_vm2, %v12629_v24, %v12628_v53  ;;  %v6822_v42 = vadd.f32 %v12632_v44, %v8674_v12  ;;  %v7232_v41 = vpack.i.bf16 %v3016_v58, %v10308_v47  ;;  %v6759_v62 = vadd.f32 %v9582_v28, %v8677_v13 }
 0x290   :  { %v2719_v33 = vsel %vm2581_vm2, %v12631_v4, %v12630_v31  ;;  %v10327_v55 = vmax.f32 %v2526_v25, %v2717_v37  ;;  %v10331_v35 = vmax.f32 %v6758_v32, 0.0  ;;  %v6823_v60 = vadd.f32 %v12634_v6, %v8679_v14 }
 0x291   :  { %v3008_v57 = vmax.f32 %v2527_v49, %v2719_v33  ;;  %v10333_v30 = vmax.f32 %v6822_v42, 0.0  ;;  %v12635_v9 = vrot.slane %v10091_v36, 1  ;;  %v12636_v2 = vrot.slane %v10032_v45, 1  ;;  %7233 = vrot.lane.b32.xlu1 %v7232_v41, %s7964_s2  ;;  %v12645_v41 = vld [vmem:[#allocation81_spill] sm:$0xff] }
 0x292   :  { %12633 = vst [vmem:[#allocation70_spill] sm:$0xff] %v10331_v35  ;;  %v10344_v37 = vmax.f32 %v6759_v62, 0.0  ;;  %v12637_v25 = vrot.slane %v10091_v36, 2  ;;  %v12638_v49 = vrot.slane %v10032_v45, 2  ;;  %v2270_v31 = vrot.slane %v10331_v35, 1 }
 0x293   :  { %v2252_v53 = vsel %vm417_vm1, %v12636_v2, %v12635_v9  ;;  %v7222_v33 = vpack.i.bf16 %v3008_v57, %v10327_v55  ;;  %v2751_v4 = vrot.slane %v10331_v35, 2  ;;  %v10359_v62 = vmax.f32 %v6823_v60, 0.0 }
 0x294   :  { %v2536_v28 = vmax.f32 %v10032_v45, %v2252_v53  ;;  %v2733_v24 = vsel %vm2581_vm2, %v12638_v49, %v12637_v25  ;;  %v10362_v45 = vsel %vm417_vm1, %v2269_v7, %v2270_v31  ;;  %v12641_v2 = vrot.slane %v9963_v27, 1 }
 0x295   :  { %7223 = vrot.lane.b32.xlu0 %v7222_v33, %s7964_s2  ;;  %12639 = vst [vmem:[#allocation37_spill] sm:$0xff] %v10362_v45  ;;  %v10365_v9 = vsel %vm2581_vm2, %v2750_v3, %v2751_v4  ;;  %v12642_v53 = vrot.slane %v9887_v22, 1  ;;  %v12643_v33 = vrot.slane %v9963_v27, 2  ;;  %v12644_v49 = vrot.slane %v9887_v22, 2 }
 0x296   :  { %v3017_v6 = vmax.f32 %v2536_v28, %v2733_v24  ;;  %12640 = vst [vmem:[#allocation76_spill] sm:$0xff] %v10365_v9  ;;  %v6760_v32 = vadd.f32 %v12645_v41, %v8670_v11  ;;  %v12649_v28 = vrot.slane %v10147_v59, 1  ;;  %v12652_v41 = vrot.slane %v10087_v63, 1 }
 0x297   :  { %v2240_v25 = vsel %vm417_vm1, %v12642_v53, %v12641_v2  ;;  %v2721_v60 = vsel %vm2581_vm2, %v12644_v49, %v12643_v33  ;;  %v12646_v2 = vld [vmem:[#allocation82_spill] sm:$0xff]  ;;  %v12647_v53 = vld [vmem:[#allocation39_spill] sm:$0xff]  ;;  %v12709_v35 = vrot.slane %v10275_v20, 2 }
 0x298   :  { %v7237_v24 = vpack.i.bf16 %v3017_v6, %v3016_v58  ;;  %v2528_v44 = vmax.f32 %v9887_v22, %v2240_v25  ;;  %v6824_v27 = vadd.f32 %v12646_v2, %v8674_v12  ;;  %v6761_v42 = vadd.f32 %v12647_v53, %v8677_v13  ;;  %v12648_v33 = vld [vmem:[#allocation83_spill] sm:$0xff] }
 0x299   :  { %v6825_v49 = vadd.f32 %v12648_v33, %v8679_v14  ;;  %v12650_v58 = vrot.slane %v10089_v15, 1  ;;  %v12651_v6 = vrot.slane %v10145_v18, 1  ;;  %v12653_v2 = vrot.slane %v10147_v59, 2 }
 0x29a   :  { %7238 = vrot.lane.b32.xlu1 %v7237_v24, %s7961_s3  ;;  %v12654_v53 = vrot.slane %v10089_v15, 2  ;;  %v3009_v3 = vmax.f32 %v2528_v44, %v2721_v60  ;;  %v10406_v33 = vmax.f32 %v6760_v32, 0.0  ;;  %v10408_v7 = vmax.f32 %v6824_v27, 0.0 }
 0x29b   :  { %v2256_v22 = vsel %vm417_vm1, %v12650_v58, %v12649_v28  ;;  %v2258_v25 = vsel %vm417_vm1, %v12652_v41, %v12651_v6  ;;  %v10410_v45 = vmax.f32 %v6761_v42, 0.0  ;;  %v10412_v28 = vmax.f32 %v6825_v49, 0.0 }
 0x29c   :  { %v2737_v24 = vsel %vm2581_vm2, %v12654_v53, %v12653_v2  ;;  %12655 = vst [vmem:[#allocation77_spill] sm:$0xff] %v10406_v33  ;;  %v2538_v58 = vmax.f32 %v10089_v15, %v2256_v22  ;;  %v2539_v5 = vmax.f32 %v10087_v63, %v2258_v25  ;;  %v12656_v6 = vrot.slane %v10145_v18, 2 }
 0x29d   :  { %v12657_v41 = vrot.slane %v10087_v63, 2  ;;  %v7227_v2 = vpack.i.bf16 %v3009_v3, %v3008_v57  ;;  %v2281_v32 = vrot.slane %v10406_v33, 1  ;;  %v2762_v44 = vrot.slane %v10406_v33, 2 }
 0x29e   :  { %v10436_v22 = vmax.f32 %v2538_v58, %v2737_v24  ;;  %v12663_v49 = vrot.slane %v10145_v18, 1  ;;  %v12664_v58 = vrot.slane %v10203_v48, 2  ;;  %v12666_v25 = vrot.slane %v10201_v56, 2 }
 0x29f   :  { %v2739_v9 = vsel %vm2581_vm2, %v12657_v41, %v12656_v6  ;;  %7228 = vrot.lane.b32.xlu0 %v7227_v2, %s7961_s3  ;;  %v10430_v63 = vsel %vm417_vm1, %v2270_v31, %v2281_v32  ;;  %v10433_v57 = vsel %vm2581_vm2, %v2751_v4, %v2762_v44  ;;  %v12660_v6 = vrot.slane %v10203_v48, 1 }
 0x2a0   :  { %12658 = vst [vmem:[#allocation81_spill] sm:$0xff] %v10430_v63  ;;  %12659 = vst [vmem:[#allocation82_spill] sm:$0xff] %v10433_v57  ;;  %v3020_v53 = vmax.f32 %v2539_v5, %v2739_v9  ;;  %v12661_v41 = vrot.slane %v10147_v59, 1  ;;  %v12662_v31 = vrot.slane %v10201_v56, 1  ;;  %v12665_v5 = vrot.slane %v10147_v59, 2 }
 0x2a1   :  { %v6763_v15 = vadd.f32 %v9659_v10, %v8677_v13  ;;  %v12724_v57 = vrot.slane %v10344_v37, 2 }
 0x2a2   :  { %v2264_v2 = vsel %vm417_vm1, %v12661_v41, %v12660_v6  ;;  %v2266_v4 = vsel %vm417_vm1, %v12663_v49, %v12662_v31  ;;  %v2745_v9 = vsel %vm2581_vm2, %v12665_v5, %v12664_v58  ;;  %v12667_v6 = vrot.slane %v10145_v18, 2  ;;  %v12668_v49 = vld [vmem:[#allocation84_spill] sm:$0xff] }
 0x2a3   :  { %v2542_v3 = vmax.f32 %v10147_v59, %v2264_v2  ;;  %v2543_v24 = vmax.f32 %v10145_v18, %v2266_v4  ;;  %v7242_v60 = vpack.i.bf16 %v3020_v53, %v10436_v22  ;;  %v6762_v31 = vadd.f32 %v12668_v49, %v8670_v11  ;;  %v12669_v2 = vld [vmem:[#allocation85_spill] sm:$0xff] }
 0x2a4   :  { %v2747_v41 = vsel %vm2581_vm2, %v12667_v6, %v12666_v25  ;;  %v6826_v4 = vadd.f32 %v12669_v2, %v8674_v12  ;;  %v6827_v5 = vadd.f32 %v9661_v43, %v8679_v14  ;;  %v12670_v18 = vrot.slane %v10149_v39, 1 }
 0x2a5   :  { %v10469_v59 = vmax.f32 %v2542_v3, %v2745_v9  ;;  %v3024_v58 = vmax.f32 %v2543_v24, %v2747_v41  ;;  %v12671_v25 = vrot.slane %v10091_v36, 1  ;;  %7243 = vrot.lane.b32.xlu1 %v7242_v60, %s7964_s2  ;;  %v1952_v49 = vmax.f32 %v6762_v31, 0.0 }
 0x2a6   :  { %v10479_v42 = vmax.f32 %v6826_v4, 0.0  ;;  %v10481_v2 = vmax.f32 %v6763_v15, 0.0  ;;  %v10485_v24 = vmax.f32 %v6827_v5, 0.0  ;;  %v12672_v43 = vrot.slane %v10149_v39, 2 }
 0x2a7   :  { %v2260_v6 = vsel %vm417_vm1, %v12671_v25, %v12670_v18  ;;  %v7262_v3 = vpack.i.bf16 %v3024_v58, %v10469_v59  ;;  %v12673_v9 = vrot.slane %v10091_v36, 2  ;;  %v12674_v18 = vrot.slane %v10207_v54, 1 }
 0x2a8   :  { %v2540_v10 = vmax.f32 %v10091_v36, %v2260_v6  ;;  %v12675_v60 = vrot.slane %v10149_v39, 1  ;;  %v2289_v15 = vrot.slane %v1952_v49, 1  ;;  %v2770_v4 = vrot.slane %v1952_v49, 2 }
 0x2a9   :  { %v2741_v41 = vsel %vm2581_vm2, %v12673_v9, %v12672_v43  ;;  %v12287_v25 = vrot.slane %v10479_v42, 1  ;;  %7263 = vrot.lane.b32.xlu0 %v7262_v3, %s7964_s2  ;;  %v12288_v5 = vrot.slane %v10481_v2, 1  ;;  %v12682_v3 = vld [vmem:[#allocation43_spill] sm:$0xff] }
 0x2aa   :  { %v2268_v31 = vsel %vm417_vm1, %v12675_v60, %v12674_v18  ;;  %v3021_v9 = vmax.f32 %v2540_v10, %v2741_v41  ;;  %v10504_v27 = vsel %vm417_vm1, %v2281_v32, %v2289_v15  ;;  %v2561_v63 = vmax.f32 %v1952_v49, %v2289_v15 }
 0x2ab   :  { %12676 = vst [vmem:[#allocation39_spill] sm:$0xff] %v10504_v27  ;;  %v10507_v18 = vsel %vm2581_vm2, %v2762_v44, %v2770_v4  ;;  %v10512_v60 = vmax.f32 %v10479_v42, %v12287_v25  ;;  %v10519_v43 = vmax.f32 %v10481_v2, %v12288_v5  ;;  %v2544_v32 = vmax.f32 %v10149_v39, %v2268_v31  ;;  %v12681_v25 = vld [vmem:[#allocation42_spill] sm:$0xff]  ;;  %v12697_v27 = vld [vmem:[#allocation91_spill] sm:$0xff] }
 0x2ac   :  { %12677 = vst [vmem:[#allocation83_spill] sm:$0xff] %v10507_v18  ;;  %v7247_v10 = vpack.i.bf16 %v3021_v9, %v3020_v53  ;;  %v10522_v49 = vmax.f32 %v2561_v63, %v2770_v4  ;;  %v12679_v44 = vrot.slane %v10207_v54, 2  ;;  %v12680_v41 = vrot.slane %v10149_v39, 2  ;;  %v12683_v63 = vld [vmem:[#allocation89_spill] sm:$0xff] }
 0x2ad   :  { %v6764_v6 = vadd.f32 %v12681_v25, %v8670_v11  ;;  %v6828_v36 = vadd.f32 %v12682_v3, %v8674_v12  ;;  %v6765_v53 = vadd.f32 %v9725_v50, %v8677_v13  ;;  %v6829_v31 = vadd.f32 %v12683_v63, %v8679_v14 }
 0x2ae   :  { %12678 = vst [vmem:[#allocation84_spill] sm:$0xff] %v10522_v49  ;;  %v2749_v15 = vsel %vm2581_vm2, %v12680_v41, %v12679_v44  ;;  %7248 = vrot.lane.b32.xlu1 %v7247_v10, %s7961_s3  ;;  %v12684_v4 = vrot.slane %v10203_v48, 2  ;;  %v12687_v3 = vrot.slane %v10201_v56, 2  ;;  %v12689_v50 = vrot.slane %v10267_v51, 1  ;;  %v10564_v56 = vpop.permute.xlu0 %7033 }
 0x2af   :  { %v3025_v5 = vmax.f32 %v2544_v32, %v2749_v15  ;;  %v10543_v9 = vmax.f32 %v6764_v6, 0.0  ;;  %v10545_v25 = vmax.f32 %v6828_v36, 0.0  ;;  %v12688_v32 = vrot.slane %v10344_v37, 1 }
 0x2b0   :  { %v10541_v39 = vmax.f32 %v10242_v46, %v12684_v4  ;;  %v3028_v10 = vmax.f32 %v10235_v52, %v12687_v3  ;;  %v10555_v15 = vmax.f32 %v6765_v53, 0.0  ;;  %v10557_v48 = vmax.f32 %v6829_v31, 0.0  ;;  %v12696_v3 = vld [vmem:[#allocation90_spill] sm:$0xff] }
 0x2b1   :  { %12686 = vst [vmem:[#allocation42_spill] sm:$0xff] %v10543_v9  ;;  %v2274_v44 = vsel %vm417_vm1, %v12689_v50, %v12688_v32  ;;  %v7267_v41 = vpack.i.bf16 %v3025_v5, %v3024_v58  ;;  %v12690_v46 = vrot.slane %v10333_v30, 1  ;;  %v12691_v6 = vrot.slane %v10265_v16, 1 }
 0x2b2   :  { %12685 = vst [vmem:[#allocation85_spill] sm:$0xff] %v10541_v39  ;;  %v2297_v52 = vrot.slane %v10543_v9, 1  ;;  %v2778_v63 = vrot.slane %v10543_v9, 2  ;;  %v7252_v32 = vpack.i.bf16 %v3028_v10, %v10541_v39  ;;  %v2550_v50 = vmax.f32 %v10267_v51, %v2274_v44 }
 0x2b3   :  { %v2277_v36 = vsel %vm417_vm1, %v12691_v6, %v12690_v46  ;;  %7268 = vrot.lane.b32.xlu0 %v7267_v41, %s7961_s3  ;;  %v12692_v6 = vrot.slane %v10344_v37, 2  ;;  %v12693_v58 = vrot.slane %v10267_v51, 2  ;;  %v12694_v4 = vrot.slane %v10333_v30, 2 }
 0x2b4   :  { %v2551_v46 = vmax.f32 %v10265_v16, %v2277_v36  ;;  %v12695_v53 = vrot.slane %v10265_v16, 2  ;;  %v6766_v5 = vadd.f32 %v12696_v3, %v8670_v11  ;;  %v6830_v44 = vadd.f32 %v12697_v27, %v8674_v12  ;;  %v12698_v36 = vld [vmem:[#allocation92_spill] sm:$0xff]  ;;  %7253 = vrot.lane.b32.xlu1 %v7252_v32, %s7964_s2 }
 0x2b5   :  { %v2755_v41 = vsel %vm2581_vm2, %v12693_v58, %v12692_v6  ;;  %v6767_v33 = vadd.f32 %v12698_v36, %v8677_v13  ;;  %v12700_v6 = vld [vmem:[#allocation93_spill] sm:$0xff]  ;;  %v12701_v16 = vrot.slane %v10207_v54, 1  ;;  %v12703_v36 = vrot.slane %v10359_v62, 1 }
 0x2b6   :  { %v2758_v31 = vsel %vm2581_vm2, %v12695_v53, %v12694_v4  ;;  %v10595_v51 = vmax.f32 %v2550_v50, %v2755_v41  ;;  %v6831_v18 = vadd.f32 %v12700_v6, %v8679_v14  ;;  %v10602_v53 = vmax.f32 %v6766_v5, 0.0 }
 0x2b7   :  { %v3032_v58 = vmax.f32 %v2551_v46, %v2758_v31  ;;  %v2548_v4 = vmax.f32 %v10207_v54, %v12701_v16  ;;  %v10604_v3 = vmax.f32 %v6830_v44, 0.0  ;;  %v10606_v27 = vmax.f32 %v6767_v33, 0.0  ;;  %v10613_v31 = vpop.permute.xlu0 %7038 }
 0x2b8   :  { %12699 = vst [vmem:[#allocation43_spill] sm:$0xff] %v10595_v51  ;;  %12702 = vst [vmem:[#allocation89_spill] sm:$0xff] %v10602_v53  ;;  %v12704_v32 = vrot.slane %v10275_v20, 1  ;;  %v10616_v41 = vmax.f32 %v6831_v18, 0.0  ;;  %v12705_v6 = vrot.slane %v10207_v54, 2  ;;  %v2298_v33 = vrot.slane %v10602_v53, 1 }
 0x2b9   :  { %v7272_v46 = vpack.i.bf16 %v3032_v58, %v10595_v51  ;;  %v2779_v16 = vrot.slane %v10602_v53, 2  ;;  %v12708_v49 = vrot.slane %v10359_v62, 2  ;;  %v12710_v54 = vld [vmem:[#allocation46_spill] sm:$0xff]  ;;  %v12723_v9 = vrot.slane %v10410_v45, 2  ;;  %v7642_v51 = vld [vmem:[#allocation2 + $0x4] ss:$16 sps:$4 sm:$0xff]  }
 0x2ba   :  { %v2280_v50 = vsel %vm417_vm1, %v12704_v32, %v12703_v36  ;;  %v3029_v5 = vmax.f32 %v2548_v4, %v12705_v6  ;;  %v10631_v4 = vsel %vm417_vm1, %v2297_v52, %v2298_v33  ;;  %v10641_v36 = vpop.permute.xlu1 %7043  ;;  %v6768_v52 = vadd.f32 %v9793_v1, %v8670_v11  ;;  %5054 = vmatprep.subr.bf16.mxu0 %v7642_v51 }
 0x2bb   :  { %v2552_v44 = vmax.f32 %v10275_v20, %v2280_v50  ;;  %7273 = vrot.lane.b32.xlu0 %v7272_v46, %s7964_s2  ;;  %12706 = vst [vmem:[#allocation90_spill] sm:$0xff] %v10631_v4  ;;  %v10634_v50 = vsel %vm2581_vm2, %v2778_v63, %v2779_v16  ;;  %v2761_v46 = vsel %vm2581_vm2, %v12709_v35, %v12708_v49  ;;  %v12712_v20 = vld [vmem:[#allocation96_spill] sm:$0xff]  ;;  %v12713_v49 = vrot.slane %v10481_v2, 2 }
 0x2bc   :  { %12707 = vst [vmem:[#allocation91_spill] sm:$0xff] %v10634_v50  ;;  %v7257_v6 = vpack.i.bf16 %v3029_v5, %v3028_v10  ;;  %v6832_v63 = vadd.f32 %v12710_v54, %v8674_v12  ;;  %v12711_v10 = vld [vmem:[#allocation47_spill] sm:$0xff]  ;;  %v6833_v35 = vadd.f32 %v12712_v20, %v8679_v14  ;;  %v12718_v20 = vrot.slane %v10344_v37, 1 }
 0x2bd   :  { %v3033_v18 = vmax.f32 %v2552_v44, %v2761_v46  ;;  %v6769_v5 = vadd.f32 %v12711_v10, %v8677_v13  ;;  %v10657_v50 = vmax.f32 %v10519_v43, %v12713_v49  ;;  %v12715_v44 = vrot.slane %v10479_v42, 2  ;;  %v10664_v46 = vpop.permute.xlu0 %7048 }
 0x2be   :  { %7258 = vrot.lane.b32.xlu1 %v7257_v6, %s7961_s3  ;;  %v10666_v6 = vmax.f32 %v6768_v52, 0.0  ;;  %v10668_v32 = vmax.f32 %v6832_v63, 0.0  ;;  %v12717_v10 = vrot.slane %v10410_v45, 1  ;;  %v10677_v49 = vmax.f32 %v6833_v35, 0.0 }
 0x2bf   :  { %12714 = vst [vmem:[#allocation92_spill] sm:$0xff] %v10657_v50  ;;  %v10662_v1 = vmax.f32 %v10512_v60, %v12715_v44  ;;  %v7277_v54 = vpack.i.bf16 %v3033_v18, %v3032_v58  ;;  %v10675_v43 = vmax.f32 %v6769_v5, 0.0  ;;  %v12719_v44 = vrot.slane %v10408_v7, 1 }
 0x2c0   :  { %12716 = vst [vmem:[#allocation93_spill] sm:$0xff] %v10666_v6  ;;  %v2284_v4 = vsel %vm417_vm1, %v12718_v20, %v12717_v10  ;;  %v12720_v58 = vrot.slane %v10333_v30, 1  ;;  %v2309_v52 = vrot.slane %v10666_v6, 1  ;;  %v2790_v63 = vrot.slane %v10666_v6, 2 }
 0x2c1   :  { %v7292_v60 = vpack.i.bf16 %v10662_v1, %v10657_v50  ;;  %7278 = vrot.lane.b32.xlu0 %v7277_v54, %s7961_s3  ;;  %v2554_v35 = vmax.f32 %v10344_v37, %v2284_v4  ;;  %v12725_v10 = vrot.slane %v10408_v7, 2  ;;  %v10720_v50 = vpop.permute.xlu0 %7063  ;;  %v12729_v37 = vld [vmem:[#allocation99_spill] sm:$0xff] }
 0x2c2   :  { %v2286_v18 = vsel %vm417_vm1, %v12720_v58, %v12719_v44  ;;  %v10696_v44 = vpop.permute.xlu1 %7053  ;;  %v10699_v54 = vsel %vm417_vm1, %v2298_v33, %v2309_v52  ;;  %v10702_v58 = vsel %vm2581_vm2, %v2779_v16, %v2790_v63  ;;  %v12726_v33 = vrot.slane %v10333_v30, 2 }
 0x2c3   :  { %7293 = vrot.lane.b32.xlu1 %v7292_v60, %s7964_s2  ;;  %12721 = vst [vmem:[#allocation46_spill] sm:$0xff] %v10699_v54  ;;  %12722 = vst [vmem:[#allocation47_spill] sm:$0xff] %v10702_v58  ;;  %v2555_v5 = vmax.f32 %v10333_v30, %v2286_v18  ;;  %v2765_v60 = vsel %vm2581_vm2, %v12724_v57, %v12723_v9  ;;  %v12727_v58 = vld [vmem:[#allocation98_spill] sm:$0xff]  ;;  %v7640_v18 = vld [vmem:[#allocation2] ss:$16 sps:$4 sm:$0xff]   ;;  %v6834_v53 = vadd.f32 %v12729_v37, %v8674_v12 }
 0x2c4   :  { %v2767_v16 = vsel %vm2581_vm2, %v12726_v33, %v12725_v10  ;;  %v6770_v4 = vadd.f32 %v12727_v58, %v8670_v11  ;;  %v10722_v20 = vmax.f32 %v2554_v35, %v2765_v60  ;;  %v12730_v57 = vld [vmem:[#allocation100_spill] sm:$0xff]  ;;  %v12731_v30 = vld [vmem:[#allocation101_spill] sm:$0xff]  ;;  %v12732_v33 = vrot.slane %v10485_v24, 1  ;;  %5055 = vmatpush1.bf16.msra.mxu0 %v7640_v18 }
 0x2c5   :  { %v3036_v54 = vmax.f32 %v2555_v5, %v2767_v16  ;;  %v6771_v9 = vadd.f32 %v12730_v57, %v8677_v13  ;;  %v6835_v10 = vadd.f32 %v12731_v30, %v8679_v14  ;;  %v12300_v58 = vrot.slane %v10485_v24, 2 }
 0x2c6   :  { %12728 = vst [vmem:[#allocation96_spill] sm:$0xff] %v10722_v20  ;;  %v1968_v39 = vmax.f32 %v6770_v4, 0.0  ;;  %v2564_v11 = vmax.f32 %v10485_v24, %v12732_v33  ;;  %v10735_v5 = vmax.f32 %v6834_v53, 0.0  ;;  %v12733_v12 = vrot.slane %v10412_v28, 1  ;;  %v10748_v57 = vpop.permute.xlu1 %7058 }
 0x2c7   :  { %v7282_v35 = vpack.i.bf16 %v3036_v54, %v10722_v20  ;;  %v10737_v60 = vmax.f32 %v6771_v9, 0.0  ;;  %v12734_v13 = vrot.slane %v10359_v62, 1  ;;  %v10744_v37 = vmax.f32 %v6835_v10, 0.0 }
 0x2c8   :  { %v2317_v14 = vrot.slane %v1968_v39, 1  ;;  %v2798_v4 = vrot.slane %v1968_v39, 2  ;;  %v3045_v51 = vmax.f32 %v2564_v11, %v12300_v58  ;;  %v12299_v53 = vrot.slane %v10735_v5, 1 }
 0x2c9   :  { %v2288_v16 = vsel %vm417_vm1, %v12734_v13, %v12733_v12  ;;  %7283 = vrot.lane.b32.xlu0 %v7282_v35, %s7964_s2  ;;  %v12302_v30 = vrot.slane %v10737_v60, 1  ;;  %v10762_v13 = vpop.permute.xlu0 %7068  ;;  %v12738_v35 = vrot.slane %v10412_v28, 2  ;;  %v12739_v33 = vrot.slane %v10359_v62, 2 }
 0x2ca   :  { %v10756_v18 = vsel %vm417_vm1, %v2309_v52, %v2317_v14  ;;  %v2577_v10 = vmax.f32 %v1968_v39, %v2317_v14  ;;  %v10759_v12 = vsel %vm2581_vm2, %v2790_v63, %v2798_v4  ;;  %v10769_v9 = vmax.f32 %v10735_v5, %v12299_v53 }
 0x2cb   :  { %12735 = vst [vmem:[#allocation98_spill] sm:$0xff] %v10756_v18  ;;  %12736 = vst [vmem:[#allocation99_spill] sm:$0xff] %v10759_v12  ;;  %v10774_v52 = vmax.f32 %v10737_v60, %v12302_v30  ;;  %v7297_v14 = vpack.i.bf16 %v3045_v51, %v10662_v1  ;;  %v2556_v11 = vmax.f32 %v10359_v62, %v2288_v16  ;;  %v12740_v58 = vrot.slane %v10606_v27, 1 }
 0x2cc   :  { %v10777_v63 = vmax.f32 %v2577_v10, %v2798_v4  ;;  %v2769_v53 = vsel %vm2581_vm2, %v12739_v33, %v12738_v35  ;;  %v12741_v18 = vrot.slane %v10555_v15, 1  ;;  %v12742_v39 = vrot.slane %v10604_v3, 1 }
 0x2cd   :  { %v12743_v4 = vrot.slane %v10545_v25, 1  ;;  %v12744_v16 = vrot.slane %v10606_v27, 2  ;;  %v12745_v51 = vrot.slane %v10555_v15, 2  ;;  %v12746_v33 = vrot.slane %v10604_v3, 2  ;;  %7298 = vrot.lane.b32.xlu1 %v7297_v14, %s7961_s3 }
 0x2ce   :  { %12737 = vst [vmem:[#allocation100_spill] sm:$0xff] %v10777_v63  ;;  %v2302_v30 = vsel %vm417_vm1, %v12741_v18, %v12740_v58  ;;  %v12747_v10 = vrot.slane %v10545_v25, 2  ;;  %v3037_v58 = vmax.f32 %v2556_v11, %v2769_v53  ;;  %v12751_v12 = vrot.slane %v10408_v7, 1 }
 0x2cf   :  { %v2305_v1 = vsel %vm417_vm1, %v12743_v4, %v12742_v39  ;;  %v2783_v62 = vsel %vm2581_vm2, %v12745_v51, %v12744_v16  ;;  %v2566_v18 = vmax.f32 %v10555_v15, %v2302_v30  ;;  %v12748_v39 = vrot.slane %v10481_v2, 1  ;;  %v10814_v16 = vpop.permute.xlu1 %7078 }
 0x2d0   :  { %v2786_v35 = vsel %vm2581_vm2, %v12747_v10, %v12746_v33  ;;  %v2567_v63 = vmax.f32 %v10545_v25, %v2305_v1  ;;  %v12749_v4 = vrot.slane %v10410_v45, 1  ;;  %v12750_v51 = vrot.slane %v10479_v42, 1 }
 0x2d1   :  { %v12752_v15 = vrot.slane %v10481_v2, 2  ;;  %v12753_v25 = vrot.slane %v10410_v45, 2  ;;  %v12754_v11 = vrot.slane %v10479_v42, 2  ;;  %v12755_v14 = vrot.slane %v10408_v7, 2 }
 0x2d2   :  { %v2292_v6 = vsel %vm417_vm1, %v12749_v4, %v12748_v39  ;;  %v2294_v33 = vsel %vm417_vm1, %v12751_v12, %v12750_v51  ;;  %v7287_v10 = vpack.i.bf16 %v3037_v58, %v3036_v54  ;;  %v10832_v39 = vmax.f32 %v2566_v18, %v2783_v62  ;;  %v10835_v51 = vpop.permute.xlu0 %7073  ;;  %v12758_v58 = vld [vmem:[#allocation15_spill] sm:$0xff] }
 0x2d3   :  { %v2558_v53 = vmax.f32 %v10410_v45, %v2292_v6  ;;  %v2773_v30 = vsel %vm2581_vm2, %v12753_v25, %v12752_v15  ;;  %v2775_v1 = vsel %vm2581_vm2, %v12755_v14, %v12754_v11  ;;  %v3048_v4 = vmax.f32 %v2567_v63, %v2786_v35  ;;  %v7645_v6 = vld [vmem:[#allocation2 + $0x24] ss:$16 sps:$4 sm:$0xff]   ;;  %v7643_v15 = vld [vmem:[#allocation2 + $0x20] ss:$16 sps:$4 sm:$0xff]   ;;  %v12759_v63 = vld [vmem:[#allocation12_spill] sm:$0xff] }
 0x2d4   :  { %12756 = vst [vmem:[#allocation101_spill] sm:$0xff] %v10832_v39  ;;  %v2559_v12 = vmax.f32 %v10408_v7, %v2294_v33  ;;  %v7036_v45 = vunpack.i.h.bf16 %v10564_v56  ;;  %v7035_v42 = vunpack.i.l.bf16 %v10564_v56  ;;  %7288 = vrot.lane.b32.xlu0 %v7287_v10, %s7961_s3  ;;  %v12760_v35 = vld [vmem:[#allocation14_spill] sm:$0xff]  ;;  %v12762_v33 = vrot.slane %v10616_v41, 1  ;;  %5056 = vmatprep.subr.bf16.mxu0 %v7645_v6 }
 0x2d5   :  { %v10837_v2 = vmax.f32 %v2558_v53, %v2773_v30  ;;  %v7312_v54 = vpack.i.bf16 %v3048_v4, %v10832_v39  ;;  %v12761_v7 = vmax.f32 %v12759_v63, %v12760_v35  ;;  %v12763_v53 = vrot.slane %v10557_v48, 1  ;;  %v12764_v30 = vld [vmem:[#allocation23_spill] sm:$0xff]  ;;  %5057 = vmatpush1.bf16.msra.mxu0 %v7643_v15 }
 0x2d6   :  { %v3040_v62 = vmax.f32 %v2559_v12, %v2775_v1  ;;  %v3352_v11 = vmax.f32 %v12764_v30, %v7036_v45  ;;  %v3255_v56 = vsel %vm3254_vm3, %v7035_v42, %v7036_v45  ;;  %v12765_v10 = vrot.slane %v10616_v41, 2 }
 0x2d7   :  { %12757 = vst [vmem:[#allocation104_spill] sm:$0xff] %v10837_v2  ;;  %v2934_v18 = vmax.f32 %v12761_v7, %v12758_v58  ;;  %v2308_v25 = vsel %vm417_vm1, %v12763_v53, %v12762_v33  ;;  %v12766_v1 = vrot.slane %v10557_v48, 2  ;;  %7313 = vrot.lane.b32.xlu1 %v7312_v54, %s7964_s2  ;;  %v12767_v35 = vrot.slane %v10485_v24, 1  ;;  %v10872_v53 = vpop.permute.xlu1 %7083 }
 0x2d8   :  { %v2568_v14 = vmax.f32 %v10557_v48, %v2308_v25  ;;  %v7302_v58 = vpack.i.bf16 %v3040_v62, %v10837_v2  ;;  %v12768_v7 = vrot.slane %v10412_v28, 1  ;;  %v12769_v42 = vrot.slane %v10485_v24, 2  ;;  %v12804_v2 = vld [vmem:[#allocation16_spill] sm:$0xff] }
 0x2d9   :  { %v2789_v12 = vsel %vm2581_vm2, %v12766_v1, %v12765_v10  ;;  %v3351_v63 = vmax.f32 %v2934_v18, %v3255_v56  ;;  %v12770_v33 = vrot.slane %v10412_v28, 2  ;;  %v7041_v18 = vunpack.i.h.bf16 %v10613_v31  ;;  %v10883_v10 = vpop.permute.xlu0 %7103 }
 0x2da   :  { %v2296_v45 = vsel %vm417_vm1, %v12768_v7, %v12767_v35  ;;  %v3049_v6 = vmax.f32 %v2568_v14, %v2789_v12  ;;  %7303 = vrot.lane.b32.xlu0 %v7302_v58, %s7964_s2  ;;  %v7040_v25 = vunpack.i.l.bf16 %v10613_v31  ;;  %v12771_v24 = vrot.slane %v10675_v43, 1 }
 0x2db   :  { %v2777_v48 = vsel %vm2581_vm2, %v12770_v33, %v12769_v42  ;;  %v2560_v54 = vmax.f32 %v10412_v28, %v2296_v45  ;;  %v12772_v30 = vrot.slane %v10606_v27, 1  ;;  %v12773_v1 = vrot.slane %v10668_v32, 1  ;;  %v7646_v33 = vld [vmem:[#allocation2 + $0x40] ss:$16 sps:$4 sm:$0xff]  }
 0x2dc   :  { %v7317_v14 = vpack.i.bf16 %v3049_v6, %v3048_v4  ;;  %v12774_v15 = vrot.slane %v10604_v3, 1  ;;  %v3576_v31 = vsel %vm3575_vm4, %v7040_v25, %v7041_v18  ;;  %v3673_v35 = vmax.f32 %v3352_v11, %v7041_v18 }
 0x2dd   :  { %v2312_v56 = vsel %vm417_vm1, %v12772_v30, %v12771_v24  ;;  %v3041_v28 = vmax.f32 %v2560_v54, %v2777_v48  ;;  %v12775_v45 = vrot.slane %v10675_v43, 2  ;;  %v12776_v42 = vrot.slane %v10606_v27, 2  ;;  %v7648_v48 = vld [vmem:[#allocation2 + $0x44] ss:$16 sps:$4 sm:$0xff]  }
 0x2de   :  { %v2314_v12 = vsel %vm417_vm1, %v12774_v15, %v12773_v1  ;;  %v2570_v58 = vmax.f32 %v10606_v27, %v2312_v56  ;;  %7318 = vrot.lane.b32.xlu1 %v7317_v14, %s7961_s3  ;;  %v3672_v54 = vmax.f32 %v3351_v63, %v3576_v31  ;;  %v12777_v24 = vrot.slane %v10668_v32, 2  ;;  %v10909_v15 = vpop.permute.xlu1 %7088  ;;  %5058 = vmatprep.subr.bf16.mxu0 %v7648_v48 }
 0x2df   :  { %v2571_v7 = vmax.f32 %v10604_v3, %v2314_v12  ;;  %v2793_v4 = vsel %vm2581_vm2, %v12776_v42, %v12775_v45  ;;  %v7307_v6 = vpack.i.bf16 %v3041_v28, %v3040_v62  ;;  %v12778_v30 = vrot.slane %v10604_v3, 2  ;;  %v12780_v3 = vld [vmem:[#allocation18_spill] sm:$0xff]  ;;  %v12781_v28 = vld [vmem:[#allocation13_spill] sm:$0xff]  ;;  %5059 = vmatpush1.bf16.msra.mxu0 %v7646_v33  ;;  %v12784_v42 = vld [vmem:[#allocation27_spill] sm:$0xff] }
 0x2e0   :  { %v10904_v18 = vmax.f32 %v2570_v58, %v2793_v4  ;;  %v3753_v25 = vrot.slane %v3673_v35, 2  ;;  %v3785_v56 = vrot.slane %v3673_v35, 4  ;;  %v7046_v27 = vunpack.i.h.bf16 %v10641_v36  ;;  %v12782_v12 = vld [vmem:[#allocation17_spill] sm:$0xff] }
 0x2e1   :  { %v2795_v11 = vsel %vm2581_vm2, %v12778_v30, %v12777_v24  ;;  %7308 = vrot.lane.b32.xlu0 %v7307_v6, %s7961_s3  ;;  %v3752_v62 = vrot.slane %v3672_v54, 2  ;;  %v3784_v63 = vrot.slane %v3672_v54, 4  ;;  %v7045_v14 = vunpack.i.l.bf16 %v10641_v36  ;;  %v10926_v36 = vpop.permute.xlu0 %7108 }
 0x2e2   :  { %12779 = vst [vmem:[#allocation15_spill] sm:$0xff] %v10904_v18  ;;  %v10906_v1 = vmax.f32 %v2571_v7, %v2795_v11  ;;  %v12783_v58 = vmax.f32 %v12781_v28, %v12782_v12  ;;  %v4026_v7 = vsel %vm4024_vm5, %v3673_v35, %v3753_v25  ;;  %v3354_v4 = vmax.f32 %v12784_v42, %v7046_v27 }
 0x2e3   :  { %v12785_v48 = vrot.slane %v10737_v60, 1  ;;  %v12786_v6 = vrot.slane %v10675_v43, 1  ;;  %v4025_v30 = vsel %vm4024_vm5, %v3672_v54, %v3752_v62  ;;  %v4043_v11 = vsel %vm4041_vm6, %v4026_v7, %v3785_v56 }
 0x2e4   :  { %v2938_v31 = vmax.f32 %v12783_v58, %v12780_v3  ;;  %v7322_v45 = vpack.i.bf16 %v10906_v1, %v10904_v18  ;;  %v3256_v33 = vsel %vm3254_vm3, %v7045_v14, %v7046_v27  ;;  %v12787_v35 = vrot.slane %v10735_v5, 1  ;;  %v12803_v18 = vld [vmem:[#allocation20_spill] sm:$0xff] }
 0x2e5   :  { %v2320_v24 = vsel %vm417_vm1, %v12786_v6, %v12785_v48  ;;  %v12788_v25 = vrot.slane %v10668_v32, 1  ;;  %v4042_v28 = vsel %vm4041_vm6, %v4025_v30, %v3784_v63  ;;  %v12789_v54 = vrot.slane %v10737_v60, 2  ;;  %v10953_v48 = vpop.permute.xlu1 %7093 }
 0x2e6   :  { %7323 = vrot.lane.b32.xlu1 %v7322_v45, %s7964_s2  ;;  %v3353_v12 = vmax.f32 %v2938_v31, %v3256_v33  ;;  %v2574_v58 = vmax.f32 %v10675_v43, %v2320_v24  ;;  %v12790_v56 = vrot.slane %v10675_v43, 2  ;;  %v12791_v62 = vrot.slane %v10735_v5, 2 }
 0x2e7   :  { %v2322_v3 = vsel %vm417_vm1, %v12788_v25, %v12787_v35  ;;  %v12792_v14 = vrot.slane %v10668_v32, 2  ;;  %v7051_v45 = vunpack.i.h.bf16 %v10664_v46  ;;  %v7050_v43 = vunpack.i.l.bf16 %v10664_v46 }
 0x2e8   :  { %v2575_v42 = vmax.f32 %v10668_v32, %v2322_v3  ;;  %v2801_v27 = vsel %vm2581_vm2, %v12790_v56, %v12789_v54  ;;  %v12794_v6 = vrot.slane %v10677_v49, 1  ;;  %v12795_v24 = vrot.slane %v10616_v41, 1  ;;  %v10970_v54 = vpop.permute.xlu0 %7113  ;;  %v7649_v56 = vld [vmem:[#allocation2 + $0x60] ss:$16 sps:$4 sm:$0xff]  }
 0x2e9   :  { %v2803_v7 = vsel %vm2581_vm2, %v12792_v14, %v12791_v62  ;;  %v10950_v63 = vmax.f32 %v2574_v58, %v2801_v27  ;;  %v12796_v30 = vrot.slane %v10677_v49, 2  ;;  %v12797_v33 = vrot.slane %v10616_v41, 2  ;;  %v7651_v27 = vld [vmem:[#allocation2 + $0x64] ss:$16 sps:$4 sm:$0xff]  }
 0x2ea   :  { %v3056_v31 = vmax.f32 %v2575_v42, %v2803_v7  ;;  %v2316_v32 = vsel %vm417_vm1, %v12795_v24, %v12794_v6  ;;  %v7056_v25 = vunpack.i.h.bf16 %v10696_v44  ;;  %v3675_v58 = vmax.f32 %v3354_v4, %v7051_v45  ;;  %v12798_v14 = vld [vmem:[#allocation31_spill] sm:$0xff]  ;;  %5060 = vmatprep.subr.bf16.mxu0 %v7651_v27 }
 0x2eb   :  { %12793 = vst [vmem:[#allocation12_spill] sm:$0xff] %v10950_v63  ;;  %v2797_v35 = vsel %vm2581_vm2, %v12797_v33, %v12796_v30  ;;  %v2572_v42 = vmax.f32 %v10616_v41, %v2316_v32  ;;  %v7055_v46 = vunpack.i.l.bf16 %v10696_v44  ;;  %v3577_v62 = vsel %vm3575_vm4, %v7050_v43, %v7051_v45  ;;  %5061 = vmatpush1.bf16.msra.mxu0 %v7649_v56  ;;  %v12808_v27 = vld [vmem:[#allocation35_spill] sm:$0xff] }
 0x2ec   :  { %v7337_v3 = vpack.i.bf16 %v3056_v31, %v10950_v63  ;;  %v3358_v7 = vmax.f32 %v12798_v14, %v7056_v25  ;;  %v12799_v6 = vrot.slane %v10744_v37, 1  ;;  %v12800_v24 = vrot.slane %v10677_v49, 1 }
 0x2ed   :  { %v12801_v4 = vrot.slane %v10744_v37, 2  ;;  %v12802_v41 = vrot.slane %v10677_v49, 2  ;;  %v3833_v32 = vrot.slane %v3675_v58, 6  ;;  %v3865_v33 = vrot.slane %v3675_v58, 2 }
 0x2ee   :  { %v2324_v30 = vsel %vm417_vm1, %v12800_v24, %v12799_v6  ;;  %7338 = vrot.lane.b32.xlu0 %v7337_v3, %s7964_s2  ;;  %v3674_v63 = vmax.f32 %v3353_v12, %v3577_v62  ;;  %v3053_v45 = vmax.f32 %v2572_v42, %v2797_v35  ;;  %v3258_v43 = vsel %vm3254_vm3, %v7055_v46, %v7056_v25  ;;  %v12805_v6 = vld [vmem:[#allocation19_spill] sm:$0xff]  ;;  %v10994_v35 = vpop.permute.xlu1 %7098  ;;  %v12807_v42 = vld [vmem:[#allocation21_spill] sm:$0xff] }
 0x2ef   :  { %v2805_v44 = vsel %vm2581_vm2, %v12802_v41, %v12801_v4  ;;  %v2576_v14 = vmax.f32 %v10677_v49, %v2324_v30  ;;  %v12806_v24 = vmax.f32 %v12804_v2, %v12805_v6  ;;  %v7066_v20 = vunpack.i.h.bf16 %v10720_v50  ;;  %v11008_v30 = vpop.permute.xlu0 %7118 }
 0x2f0   :  { %v3832_v4 = vrot.slane %v3674_v63, 6  ;;  %v3864_v41 = vrot.slane %v3674_v63, 2  ;;  %v4060_v3 = vsel %vm4058_vm7, %v4043_v11, %v3833_v32  ;;  %v7327_v12 = vpack.i.bf16 %v3053_v45, %v10906_v1 }
 0x2f1   :  { %v2942_v39 = vmax.f32 %v12806_v24, %v12803_v18  ;;  %v4077_v25 = vsel %vm4075_vm8, %v4060_v3, %v3675_v58  ;;  %v3357_v49 = vmax.f32 %v12807_v42, %v3258_v43  ;;  %v3057_v46 = vmax.f32 %v2576_v14, %v2805_v44  ;;  %v7652_v14 = vld [vmem:[#allocation2 + $0x80] ss:$16 sps:$4 sm:$0xff]  }
 0x2f2   :  { %v3356_v62 = vmax.f32 %v12808_v27, %v7066_v20  ;;  %v4059_v2 = vsel %vm4058_vm7, %v4042_v28, %v3832_v4  ;;  %v4094_v18 = vsel %vm4092_vm9, %v4077_v25, %v3865_v33  ;;  %7328 = vrot.lane.b32.xlu1 %v7327_v12, %s7961_s3  ;;  %v7065_v56 = vunpack.i.l.bf16 %v10720_v50 }
 0x2f3   :  { %v12809_v11 = vrot.slane %v10737_v60, 2  ;;  %v4076_v58 = vsel %vm4075_vm8, %v4059_v2, %v3674_v63  ;;  %v7342_v44 = vpack.i.bf16 %v3057_v46, %v3056_v31  ;;  %v12810_v32 = vrot.slane %v10735_v5, 2 }
 0x2f4   :  { %v7061_v33 = vunpack.i.h.bf16 %v10748_v57  ;;  %v4093_v45 = vsel %vm4092_vm9, %v4076_v58, %v3864_v41  ;;  %v3257_v50 = vsel %vm3254_vm3, %v7065_v56, %v7066_v20  ;;  %v7060_v60 = vunpack.i.l.bf16 %v10748_v57  ;;  %v11027_v41 = vpop.permute.xlu1 %7133  ;;  %v12814_v58 = vld [vmem:[#allocation22_spill] sm:$0xff] }
 0x2f5   :  { %v11006_v1 = vmax.f32 %v10774_v52, %v12809_v11  ;;  %v3060_v28 = vmax.f32 %v10769_v9, %v12810_v32  ;;  %v7071_v52 = vunpack.i.h.bf16 %v10762_v13  ;;  %7343 = vrot.lane.b32.xlu0 %v7342_v44, %s7961_s3  ;;  %v3355_v43 = vmax.f32 %v2942_v39, %v3257_v50  ;;  %v7654_v9 = vld [vmem:[#allocation2 + $0x84] ss:$16 sps:$4 sm:$0xff]   ;;  %v12813_v11 = vld [vmem:[#allocation26_spill] sm:$0xff] }
 0x2f6   :  { %v3679_v31 = vmax.f32 %v3358_v7, %v7061_v33  ;;  %v7070_v5 = vunpack.i.l.bf16 %v10762_v13  ;;  %v3579_v6 = vsel %vm3575_vm4, %v7060_v60, %v7061_v33  ;;  %v12811_v4 = vrot.slane %v10744_v37, 1  ;;  %5062 = vmatprep.subr.bf16.mxu0 %v7654_v9  ;;  %v12818_v9 = vld [vmem:[#allocation24_spill] sm:$0xff] }
 0x2f7   :  { %v7332_v63 = vpack.i.bf16 %v3060_v28, %v11006_v1  ;;  %v3677_v24 = vmax.f32 %v3356_v62, %v7071_v52  ;;  %v7081_v57 = vunpack.i.h.bf16 %v10814_v16  ;;  %v3678_v39 = vmax.f32 %v3357_v49, %v3579_v6  ;;  %v11036_v62 = vpop.permute.xlu0 %7123  ;;  %5063 = vmatpush1.bf16.msra.mxu0 %v7652_v14  ;;  %v12817_v14 = vld [vmem:[#allocation30_spill] sm:$0xff]  ;;  %v12819_v6 = vld [vmem:[#allocation29_spill] sm:$0xff] }
 0x2f8   :  { %v2580_v20 = vmax.f32 %v10744_v37, %v12811_v4  ;;  %v3993_v3 = vrot.slane %v3679_v31, 2  ;;  %v3578_v7 = vsel %vm3575_vm4, %v7070_v5, %v7071_v52  ;;  %v7080_v13 = vunpack.i.l.bf16 %v10814_v16  ;;  %v12815_v16 = vld [vmem:[#allocation25_spill] sm:$0xff] }
 0x2f9   :  { %7333 = vrot.lane.b32.xlu1 %v7332_v63, %s7964_s2  ;;  %v11032_v12 = vmax.f32 %v3355_v43, %v3578_v7  ;;  %v3913_v25 = vrot.slane %v3677_v24, 4  ;;  %v3945_v42 = vrot.slane %v3677_v24, 6  ;;  %v12812_v46 = vrot.slane %v10744_v37, 2  ;;  %v12822_v7 = vld [vmem:[#allocation33_spill] sm:$0xff] }
 0x2fa   :  { %v3992_v2 = vrot.slane %v3678_v39, 2  ;;  %v11039_v56 = vsel %vm4024_vm5, %v3679_v31, %v3993_v3  ;;  %v3580_v49 = vsel %vm3575_vm4, %v7080_v13, %v7081_v57  ;;  %v12816_v44 = vmax.f32 %v12814_v58, %v12815_v16  ;;  %v12824_v13 = vld [vmem:[#allocation32_spill] sm:$0xff] }
 0x2fb   :  { %v3061_v27 = vmax.f32 %v2580_v20, %v12812_v46  ;;  %v3912_v33 = vrot.slane %v11032_v12, 4  ;;  %v3944_v50 = vrot.slane %v11032_v12, 6  ;;  %v4110_v37 = vsel %vm2581_vm2, %v4094_v18, %v3913_v25  ;;  %v11067_v20 = vpop.permute.xlu1 %7138  ;;  %v11079_v16 = vpop.permute.xlu0 %7128 }
 0x2fc   :  { %v2950_v32 = vmax.f32 %v12816_v44, %v12813_v11  ;;  %v11050_v52 = vsel %vm4024_vm5, %v3678_v39, %v3992_v2  ;;  %v11053_v43 = vsel %vm417_vm1, %v4110_v37, %v3945_v42  ;;  %v7076_v63 = vunpack.i.h.bf16 %v10835_v51  ;;  %v12821_v39 = vld [vmem:[#allocation44_spill] sm:$0xff]  ;;  %v12826_v2 = vld [vmem:[#allocation45_spill] sm:$0xff]  ;;  %v12827_v37 = vld [vmem:[#allocation55_spill] sm:$0xff] }
 0x2fd   :  { %v7347_v60 = vpack.i.bf16 %v3061_v27, %v3060_v28  ;;  %v7075_v31 = vunpack.i.l.bf16 %v10835_v51  ;;  %v11058_v5 = vsel %vm2581_vm2, %v4093_v45, %v3912_v33  ;;  %v12820_v18 = vmax.f32 %v12818_v9, %v12819_v6  ;;  %v12823_v45 = vld [vmem:[#allocation28_spill] sm:$0xff] }
 0x2fe   :  { %v7086_v24 = vunpack.i.h.bf16 %v10872_v53  ;;  %v7085_v4 = vunpack.i.l.bf16 %v10872_v53  ;;  %v3360_v3 = vmax.f32 %v12821_v39, %v7076_v63  ;;  %v12825_v25 = vmax.f32 %v12823_v45, %v12824_v13 }
 0x2ff   :  { %7348 = vrot.lane.b32.xlu1 %v7347_v60, %s7961_s3  ;;  %v2954_v28 = vmax.f32 %v12820_v18, %v12817_v14  ;;  %v3259_v51 = vsel %vm3254_vm3, %v7075_v31, %v7076_v63  ;;  %v7106_v46 = vunpack.i.h.bf16 %v10883_v10  ;;  %v7105_v53 = vunpack.i.l.bf16 %v10883_v10 }
 0x300   :  { %v2958_v42 = vmax.f32 %v12825_v25, %v12822_v7  ;;  %v3359_v27 = vmax.f32 %v2950_v32, %v3259_v51  ;;  %v3362_v11 = vmax.f32 %v12826_v2, %v7086_v24  ;;  %v3260_v58 = vsel %vm3254_vm3, %v7085_v4, %v7086_v24  ;;  %v7657_v2 = vld [vmem:[#allocation2 + $0xa4] ss:$16 sps:$4 sm:$0xff]  }
 0x301   :  { %v3681_v44 = vmax.f32 %v3360_v3, %v7081_v57  ;;  %v3361_v33 = vmax.f32 %v2954_v28, %v3260_v58  ;;  %v3364_v60 = vmax.f32 %v12827_v37, %v7106_v46  ;;  %v7091_v63 = vunpack.i.h.bf16 %v10909_v15  ;;  %v11088_v3 = vpop.permute.xlu1 %7153  ;;  %5064 = vmatprep.subr.bf16.mxu0 %v7657_v2 }
 0x302   :  { %v3680_v31 = vmax.f32 %v3359_v27, %v3580_v49  ;;  %v3261_v14 = vsel %vm3254_vm3, %v7105_v53, %v7106_v46  ;;  %v7090_v9 = vunpack.i.l.bf16 %v10909_v15  ;;  %v7111_v32 = vunpack.i.h.bf16 %v10926_v36  ;;  %v11094_v46 = vpop.permute.xlu0 %7143  ;;  %v7655_v27 = vld [vmem:[#allocation2 + $0xa0] ss:$16 sps:$4 sm:$0xff]  }
 0x303   :  { %v3755_v6 = vrot.slane %v3681_v44, 2  ;;  %v3787_v18 = vrot.slane %v3681_v44, 4  ;;  %v3363_v24 = vmax.f32 %v2958_v42, %v3261_v14  ;;  %v3683_v4 = vmax.f32 %v3362_v11, %v7091_v63  ;;  %5065 = vmatpush1.bf16.msra.mxu0 %v7655_v27 }
 0x304   :  { %v3754_v10 = vrot.slane %v3680_v31, 2  ;;  %v3786_v39 = vrot.slane %v3680_v31, 4  ;;  %v3581_v57 = vsel %vm3575_vm4, %v7090_v9, %v7091_v63  ;;  %v7110_v28 = vunpack.i.l.bf16 %v10926_v36 }
 0x305   :  { %v4028_v49 = vsel %vm4024_vm5, %v3681_v44, %v3755_v6  ;;  %v3682_v51 = vmax.f32 %v3361_v33, %v3581_v57  ;;  %v3835_v7 = vrot.slane %v3683_v4, 6  ;;  %v3867_v45 = vrot.slane %v3683_v4, 2  ;;  %v7660_v44 = vld [vmem:[#allocation2 + $0xc4] ss:$16 sps:$4 sm:$0xff]   ;;  %v7658_v6 = vld [vmem:[#allocation2 + $0xc0] ss:$16 sps:$4 sm:$0xff]  }
 0x306   :  { %v4045_v15 = vsel %vm4041_vm6, %v4028_v49, %v3787_v18  ;;  %v4027_v13 = vsel %vm4024_vm5, %v3680_v31, %v3754_v10  ;;  %v3582_v25 = vsel %vm3575_vm4, %v7110_v28, %v7111_v32  ;;  %v3685_v42 = vmax.f32 %v3364_v60, %v7111_v32  ;;  %5066 = vmatprep.subr.bf16.mxu0 %v7660_v44  ;;  %v12828_v49 = vld [vmem:[#allocation61_spill] sm:$0xff] }
 0x307   :  { %v4044_v36 = vsel %vm4041_vm6, %v4027_v13, %v3786_v39  ;;  %v3834_v11 = vrot.slane %v3682_v51, 6  ;;  %v3866_v58 = vrot.slane %v3682_v51, 2  ;;  %v4062_v53 = vsel %vm4058_vm7, %v4045_v15, %v3835_v7  ;;  %v11109_v39 = vpop.permute.xlu1 %7158  ;;  %v12830_v13 = vld [vmem:[#allocation41_spill] sm:$0xff]  ;;  %5067 = vmatpush1.bf16.msra.mxu0 %v7658_v6 }
 0x308   :  { %v4079_v33 = vsel %vm4075_vm8, %v4062_v53, %v3683_v4  ;;  %v11099_v37 = vmax.f32 %v3363_v24, %v3582_v25  ;;  %v3915_v63 = vrot.slane %v3685_v42, 4  ;;  %v3947_v31 = vrot.slane %v3685_v42, 6  ;;  %v12831_v25 = vld [vmem:[#allocation36_spill] sm:$0xff]  ;;  %v7663_v6 = vld [vmem:[#allocation2 + $0xe4] ss:$16 sps:$4 sm:$0xff]  }
 0x309   :  { %v4061_v60 = vsel %vm4058_vm7, %v4044_v36, %v3834_v11  ;;  %v4096_v14 = vsel %vm4092_vm9, %v4079_v33, %v3867_v45  ;;  %v7096_v9 = vunpack.i.h.bf16 %v10953_v48  ;;  %v7095_v32 = vunpack.i.l.bf16 %v10953_v48  ;;  %v12829_v45 = vld [vmem:[#allocation34_spill] sm:$0xff]  ;;  %v12832_v42 = vld [vmem:[#allocation40_spill] sm:$0xff]  ;;  %v11126_v11 = vpop.permute.xlu0 %7148  ;;  %5068 = vmatprep.subr.bf16.mxu0 %v7663_v6 }
 0x30a   :  { %v4078_v18 = vsel %vm4075_vm8, %v4061_v60, %v3682_v51  ;;  %v3914_v10 = vrot.slane %v11099_v37, 4  ;;  %v4112_v4 = vsel %vm2581_vm2, %v4096_v14, %v3915_v63  ;;  %v12833_v27 = vmax.f32 %v12831_v25, %v12832_v42  ;;  %v12834_v63 = vld [vmem:[#allocation66_spill] sm:$0xff] }
 0x30b   :  { %v4095_v57 = vsel %vm4092_vm9, %v4078_v18, %v3866_v58  ;;  %v11113_v28 = vsel %vm417_vm1, %v4112_v4, %v3947_v31  ;;  %v3366_v48 = vmax.f32 %v12828_v49, %v7096_v9  ;;  %v3262_v7 = vsel %vm3254_vm3, %v7095_v32, %v7096_v9  ;;  %v12836_v4 = vld [vmem:[#allocation38_spill] sm:$0xff]  ;;  %v11143_v42 = vpop.permute.xlu1 %7163 }
 0x30c   :  { %v11118_v51 = vsel %vm2581_vm2, %v4095_v57, %v3914_v10  ;;  %v3365_v15 = vmax.f32 %v12829_v45, %v3262_v7  ;;  %v2966_v2 = vmax.f32 %v12833_v27, %v12830_v13  ;;  %v7116_v36 = vunpack.i.h.bf16 %v10970_v54  ;;  %v12835_v10 = vld [vmem:[#allocation50_spill] sm:$0xff]  ;;  %v12837_v57 = vld [vmem:[#allocation49_spill] sm:$0xff] }
 0x30d   :  { %v7115_v58 = vunpack.i.l.bf16 %v10970_v54  ;;  %v7101_v53 = vunpack.i.h.bf16 %v10994_v35  ;;  %v7100_v44 = vunpack.i.l.bf16 %v10994_v35  ;;  %v7121_v33 = vunpack.i.h.bf16 %v11008_v30  ;;  %v7661_v7 = vld [vmem:[#allocation2 + $0xe0] ss:$16 sps:$4 sm:$0xff]  }
 0x30e   :  { %v3368_v31 = vmax.f32 %v12834_v63, %v7116_v36  ;;  %v7120_v60 = vunpack.i.l.bf16 %v11008_v30  ;;  %v7136_v14 = vunpack.i.h.bf16 %v11027_v41  ;;  %v7135_v9 = vunpack.i.l.bf16 %v11027_v41  ;;  %v7666_v41 = vld [vmem:[#allocation2 + $0x104] ss:$16 sps:$4 sm:$0xff]   ;;  %5069 = vmatpush1.bf16.msra.mxu0 %v7661_v7 }
 0x30f   :  { %v3263_v32 = vsel %vm3254_vm3, %v7115_v58, %v7116_v36  ;;  %v3583_v18 = vsel %vm3575_vm4, %v7100_v44, %v7101_v53  ;;  %v3687_v54 = vmax.f32 %v3366_v48, %v7101_v53  ;;  %v12838_v35 = vmax.f32 %v12836_v4, %v12837_v57  ;;  %v12839_v36 = vld [vmem:[#allocation74_spill] sm:$0xff]  ;;  %5070 = vmatprep.subr.bf16.mxu0 %v7666_v41 }
 0x310   :  { %v3367_v45 = vmax.f32 %v2966_v2, %v3263_v32  ;;  %v3686_v13 = vmax.f32 %v3365_v15, %v3583_v18  ;;  %v3584_v30 = vsel %vm3575_vm4, %v7120_v60, %v7121_v33  ;;  %v3689_v25 = vmax.f32 %v3368_v31, %v7121_v33  ;;  %v11148_v2 = vpop.permute.xlu0 %7183  ;;  %v7664_v15 = vld [vmem:[#allocation2 + $0x100] ss:$16 sps:$4 sm:$0xff]   ;;  %v12840_v31 = vld [vmem:[#allocation60_spill] sm:$0xff] }
 0x311   :  { %v2970_v49 = vmax.f32 %v12838_v35, %v12835_v10  ;;  %v3995_v27 = vrot.slane %v3687_v54, 2  ;;  %v3374_v58 = vmax.f32 %v12839_v36, %v7136_v14  ;;  %v3266_v48 = vsel %vm3254_vm3, %v7135_v9, %v7136_v14  ;;  %v12841_v32 = vld [vmem:[#allocation80_spill] sm:$0xff] }
 0x312   :  { %v7126_v53 = vunpack.i.h.bf16 %v11036_v62  ;;  %v3994_v44 = vrot.slane %v3686_v13, 2  ;;  %v3688_v63 = vmax.f32 %v3367_v45, %v3584_v30  ;;  %v3757_v10 = vrot.slane %v3689_v25, 2  ;;  %5071 = vmatpush1.bf16.msra.mxu0 %v7664_v15 }
 0x313   :  { %v3789_v4 = vrot.slane %v3689_v25, 4  ;;  %v4144_v33 = vsel %vm4024_vm5, %v3687_v54, %v3995_v27  ;;  %v3373_v60 = vmax.f32 %v12840_v31, %v3266_v48  ;;  %v7125_v57 = vunpack.i.l.bf16 %v11036_v62  ;;  %v7669_v27 = vld [vmem:[#allocation2 + $0x124] ss:$16 sps:$4 sm:$0xff]   ;;  %v11165_v48 = vpop.permute.xlu1 %7168 }
 0x314   :  { %v3370_v18 = vmax.f32 %v12841_v32, %v7126_v53  ;;  %v4143_v14 = vsel %vm4024_vm5, %v3686_v13, %v3994_v44  ;;  %v11156_v9 = vsel %vm4041_vm6, %v4144_v33, 0.0  ;;  %v3756_v35 = vrot.slane %v3688_v63, 2  ;;  %v7667_v44 = vld [vmem:[#allocation2 + $0x120] ss:$16 sps:$4 sm:$0xff]   ;;  %5072 = vmatprep.subr.bf16.mxu0 %v7669_v27  ;;  %v11177_v15 = vpop.permute.xlu0 %7188 }
 0x315   :  { %v3788_v6 = vrot.slane %v3688_v63, 4  ;;  %v4030_v45 = vsel %vm4024_vm5, %v3689_v25, %v3757_v10  ;;  %v3264_v7 = vsel %vm3254_vm3, %v7125_v57, %v7126_v53  ;;  %v7141_v54 = vunpack.i.h.bf16 %v11067_v20  ;;  %v12843_v32 = vld [vmem:[#allocation63_spill] sm:$0xff] }
 0x316   :  { %v7140_v30 = vunpack.i.l.bf16 %v11067_v20  ;;  %v4029_v36 = vsel %vm4024_vm5, %v3688_v63, %v3756_v35  ;;  %v4047_v62 = vsel %vm4041_vm6, %v4030_v45, %v3789_v4  ;;  %v3369_v41 = vmax.f32 %v2970_v49, %v3264_v7  ;;  %v12842_v63 = vld [vmem:[#allocation73_spill] sm:$0xff]  ;;  %v12844_v4 = vld [vmem:[#allocation72_spill] sm:$0xff]  ;;  %5073 = vmatpush1.bf16.msra.mxu0 %v7667_v44 }
 0x317   :  { %v7131_v13 = vunpack.i.h.bf16 %v11079_v16  ;;  %v4046_v25 = vsel %vm4041_vm6, %v4029_v36, %v3788_v6  ;;  %v3695_v10 = vmax.f32 %v3374_v58, %v7141_v54  ;;  %v7130_v33 = vunpack.i.l.bf16 %v11079_v16  ;;  %v7672_v45 = vld [vmem:[#allocation2 + $0x144] ss:$16 sps:$4 sm:$0xff]  }
 0x318   :  { %v3587_v53 = vsel %vm3575_vm4, %v7140_v30, %v7141_v54  ;;  %v12845_v49 = vmax.f32 %v12843_v32, %v12844_v4  ;;  %v7156_v35 = vunpack.i.h.bf16 %v11088_v3  ;;  %v7155_v58 = vunpack.i.l.bf16 %v11088_v3  ;;  %v12846_v16 = vld [vmem:[#allocation59_spill] sm:$0xff]  ;;  %v12847_v54 = vld [vmem:[#allocation48_spill] sm:$0xff]  ;;  %5074 = vmatprep.subr.bf16.mxu0 %v7672_v45 }
 0x319   :  { %v3694_v20 = vmax.f32 %v3373_v60, %v3587_v53  ;;  %v3691_v31 = vmax.f32 %v3370_v18, %v7131_v13  ;;  %v3997_v6 = vrot.slane %v3695_v10, 2  ;;  %v3585_v7 = vsel %vm3575_vm4, %v7130_v33, %v7131_v13  ;;  %v12848_v60 = vld [vmem:[#allocation58_spill] sm:$0xff]  ;;  %v7670_v32 = vld [vmem:[#allocation2 + $0x140] ss:$16 sps:$4 sm:$0xff]   ;;  %v7675_v44 = vld [vmem:[#allocation2 + $0x164] ss:$16 sps:$4 sm:$0xff]  }
 0x31a   :  { %v11174_v57 = vmax.f32 %v12845_v49, %v12842_v63  ;;  %v12849_v18 = vmax.f32 %v12847_v54, %v12848_v60  ;;  %v3690_v36 = vmax.f32 %v3369_v41, %v3585_v7  ;;  %v12850_v49 = vld [vmem:[#allocation94_spill] sm:$0xff]  ;;  %v3267_v13 = vsel %vm3254_vm3, %v7155_v58, %v7156_v35  ;;  %v11197_v7 = vpop.permute.xlu1 %7173  ;;  %v12851_v60 = vld [vmem:[#allocation95_spill] sm:$0xff]  ;;  %5075 = vmatpush1.bf16.msra.mxu0 %v7670_v32 }
 0x31b   :  { %v3996_v27 = vrot.slane %v3694_v20, 2  ;;  %v3837_v53 = vrot.slane %v3691_v31, 6  ;;  %v3869_v63 = vrot.slane %v3691_v31, 2  ;;  %v11188_v4 = vsel %vm4024_vm5, %v3695_v10, %v3997_v6  ;;  %5076 = vmatprep.subr.bf16.mxu0 %v7675_v44 }
 0x31c   :  { %v11185_v30 = vmax.f32 %v12849_v18, %v12846_v16  ;;  %v3376_v24 = vmax.f32 %v12850_v49, %v7156_v35  ;;  %v7146_v3 = vunpack.i.h.bf16 %v11094_v46  ;;  %v3836_v16 = vrot.slane %v3690_v36, 6 }
 0x31d   :  { %v11194_v33 = vsel %vm4024_vm5, %v3694_v20, %v3996_v27  ;;  %v3868_v54 = vrot.slane %v3690_v36, 2  ;;  %v4064_v41 = vsel %vm4058_vm7, %v4047_v62, %v3837_v53  ;;  %v3375_v6 = vmax.f32 %v11174_v57, %v3267_v13  ;;  %v11217_v57 = vpop.permute.xlu0 %7193 }
 0x31e   :  { %v4081_v10 = vsel %vm4075_vm8, %v4064_v41, %v3691_v31  ;;  %v3372_v18 = vmax.f32 %v12851_v60, %v7146_v3  ;;  %v7145_v35 = vunpack.i.l.bf16 %v11094_v46  ;;  %v4063_v45 = vsel %vm4058_vm7, %v4046_v25, %v3836_v16  ;;  %v7673_v46 = vld [vmem:[#allocation2 + $0x160] ss:$16 sps:$4 sm:$0xff]  }
 0x31f   :  { %v4098_v20 = vsel %vm4092_vm9, %v4081_v10, %v3869_v63  ;;  %v11209_v62 = vsel %vm417_vm1, %v11058_v5, %v3944_v50  ;;  %v12852_v58 = vrot.slane %v11099_v37, 6  ;;  %v4080_v25 = vsel %vm4075_vm8, %v4063_v45, %v3690_v36  ;;  %v7678_v63 = vld [vmem:[#allocation2 + $0x184] ss:$16 sps:$4 sm:$0xff]   ;;  %v11245_v10 = vpop.permute.xlu1 %7178  ;;  %5077 = vmatpush1.bf16.msra.mxu0 %v7673_v46  ;;  %v7676_v60 = vld [vmem:[#allocation2 + $0x180] ss:$16 sps:$4 sm:$0xff]  }
 0x320   :  { %v3265_v27 = vsel %vm3254_vm3, %v7145_v35, %v7146_v3  ;;  %v11223_v12 = vsel %vm4041_vm6, %v11050_v52, 0.0  ;;  %v11226_v50 = vsel %vm4041_vm6, %v4143_v14, 0.0  ;;  %v4097_v5 = vsel %vm4092_vm9, %v4080_v25, %v3868_v54  ;;  %v12854_v16 = vld [vmem:[#allocation71_spill] sm:$0xff]  ;;  %v12855_v54 = vld [vmem:[#allocation78_spill] sm:$0xff]  ;;  %5078 = vmatprep.subr.bf16.mxu0 %v7678_v63 }
 0x321   :  { %v11215_v31 = vsel %vm417_vm1, %v11118_v51, %v12852_v58  ;;  %v3371_v37 = vmax.f32 %v11185_v30, %v3265_v27  ;;  %v4205_v51 = vrot.slane %v11209_v62, 1  ;;  %v4206_v53 = vrot.slane %v11223_v12, 1  ;;  %v12853_v30 = vld [vmem:[#allocation79_spill] sm:$0xff] }
 0x322   :  { %v4211_v36 = vrot.slane %v11215_v31, 1  ;;  %v4212_v32 = vrot.slane %v11226_v50, 1  ;;  %v7161_v52 = vunpack.i.h.bf16 %v11109_v39  ;;  %v7160_v49 = vunpack.i.l.bf16 %v11109_v39 }
 0x323   :  { %v4207_v14 = vsel %vm417_vm1, %v4205_v51, %v4206_v53  ;;  %v7151_v13 = vunpack.i.h.bf16 %v11126_v11  ;;  %v7150_v3 = vunpack.i.l.bf16 %v11126_v11  ;;  %v12856_v41 = vmax.f32 %v12854_v16, %v12855_v54  ;;  %v11251_v53 = vpop.permute.xlu0 %7198  ;;  %5079 = vmatpush1.bf16.msra.mxu0 %v7676_v60  ;;  %v12859_v60 = vld [vmem:[#allocation86_spill] sm:$0xff] }
 0x324   :  { %v4213_v35 = vsel %vm417_vm1, %v4211_v36, %v4212_v32  ;;  %v3588_v39 = vsel %vm3575_vm4, %v7160_v49, %v7161_v52  ;;  %v3697_v45 = vmax.f32 %v3376_v24, %v7161_v52  ;;  %v7166_v58 = vunpack.i.h.bf16 %v11143_v42 }
 0x325   :  { %v11243_v44 = vmax.f32 %v12856_v41, %v12853_v30  ;;  %v7352_v25 = vpack.i.bf16 %v4213_v35, %v4207_v14  ;;  %v3696_v11 = vmax.f32 %v3375_v6, %v3588_v39  ;;  %v3586_v27 = vsel %vm3575_vm4, %v7150_v3, %v7151_v13  ;;  %v7681_v30 = vld [vmem:[#allocation2 + $0x1a4] ss:$16 sps:$4 sm:$0xff]   ;;  %v7679_v6 = vld [vmem:[#allocation2 + $0x1a0] ss:$16 sps:$4 sm:$0xff]  }
 0x326   :  { %v3693_v51 = vmax.f32 %v3372_v18, %v7151_v13  ;;  %v3759_v16 = vrot.slane %v3697_v45, 2  ;;  %v3791_v54 = vrot.slane %v3697_v45, 4  ;;  %v11253_v46 = vmax.f32 %v3371_v37, %v3586_v27  ;;  %5080 = vmatprep.subr.bf16.mxu0 %v7681_v30  ;;  %v7684_v13 = vld [vmem:[#allocation2 + $0x1c4] ss:$16 sps:$4 sm:$0xff]  }
 0x327   :  { %v3378_v36 = vmax.f32 %v9918_v0, %v7166_v58  ;;  %7353 = vrot.lane.b32.xlu0 %v7352_v25, %s7965_s9  ;;  %v3758_v24 = vrot.slane %v3696_v11, 2  ;;  %v3790_v32 = vrot.slane %v3696_v11, 4  ;;  %v7165_v37 = vunpack.i.l.bf16 %v11143_v42  ;;  %v12857_v35 = vld [vmem:[#allocation87_spill] sm:$0xff]  ;;  %5081 = vmatpush1.bf16.msra.mxu0 %v7679_v6 }
 0x328   :  { %v3917_v63 = vrot.slane %v3693_v51, 4  ;;  %v3949_v52 = vrot.slane %v3693_v51, 6  ;;  %v4032_v18 = vsel %vm4024_vm5, %v3697_v45, %v3759_v16  ;;  %v3916_v49 = vrot.slane %v11253_v46, 4  ;;  %v12858_v39 = vld [vmem:[#allocation75_spill] sm:$0xff]  ;;  %v11268_v45 = vpop.permute.xlu1 %7213  ;;  %5082 = vmatprep.subr.bf16.mxu0 %v7684_v13 }
 0x329   :  { %v3948_v14 = vrot.slane %v11253_v46, 6  ;;  %v4031_v0 = vsel %vm4024_vm5, %v3696_v11, %v3758_v24  ;;  %v4049_v3 = vsel %vm4041_vm6, %v4032_v18, %v3791_v54  ;;  %v12860_v25 = vmax.f32 %v12858_v39, %v12859_v60 }
 0x32a   :  { %v4114_v41 = vsel %vm2581_vm2, %v4098_v20, %v3917_v63  ;;  %v4048_v51 = vsel %vm4041_vm6, %v4031_v0, %v3790_v32  ;;  %v11272_v16 = vsel %vm2581_vm2, %v4097_v5, %v3916_v49  ;;  %v3268_v11 = vsel %vm3254_vm3, %v7165_v37, %v7166_v58  ;;  %v11282_v63 = vpop.permute.xlu0 %7203  ;;  %v7682_v32 = vld [vmem:[#allocation2 + $0x1c0] ss:$16 sps:$4 sm:$0xff]  }
 0x32b   :  { %v2990_v27 = vmax.f32 %v12860_v25, %v12857_v35  ;;  %v11275_v42 = vsel %vm417_vm1, %v4114_v41, %v3949_v52  ;;  %v3377_v30 = vmax.f32 %v11243_v44, %v3268_v11  ;;  %v7186_v20 = vunpack.i.h.bf16 %v11148_v2  ;;  %v7687_v44 = vld [vmem:[#allocation2 + $0x1e4] ss:$16 sps:$4 sm:$0xff]   ;;  %5083 = vmatpush1.bf16.msra.mxu0 %v7682_v32 }
 0x32c   :  { %v7185_v54 = vunpack.i.l.bf16 %v11148_v2  ;;  %v7171_v24 = vunpack.i.h.bf16 %v11165_v48  ;;  %v7170_v5 = vunpack.i.l.bf16 %v11165_v48  ;;  %v7191_v18 = vunpack.i.h.bf16 %v11177_v15  ;;  %v11294_v13 = vpop.permute.xlu1 %7218  ;;  %5084 = vmatprep.subr.bf16.mxu0 %v7687_v44 }
 0x32d   :  { %v7190_v52 = vunpack.i.l.bf16 %v11177_v15  ;;  %v7176_v58 = vunpack.i.h.bf16 %v11197_v7  ;;  %v3380_v49 = vmax.f32 %v9947_v34, %v7186_v20  ;;  %v7175_v0 = vunpack.i.l.bf16 %v11197_v7  ;;  %v7685_v34 = vld [vmem:[#allocation2 + $0x1e0] ss:$16 sps:$4 sm:$0xff]   ;;  %v12861_v7 = vld [vmem:[#allocation102_spill] sm:$0xff] }
 0x32e   :  { %v3269_v2 = vsel %vm3254_vm3, %v7185_v54, %v7186_v20  ;;  %v3699_v37 = vmax.f32 %v3378_v36, %v7171_v24  ;;  %v3589_v6 = vsel %vm3575_vm4, %v7170_v5, %v7171_v24  ;;  %v7196_v54 = vunpack.i.h.bf16 %v11217_v57 }
 0x32f   :  { %v3379_v41 = vmax.f32 %v2990_v27, %v3269_v2  ;;  %v3590_v48 = vsel %vm3575_vm4, %v7190_v52, %v7191_v18  ;;  %v3382_v35 = vmax.f32 %v10022_v21, %v7176_v58  ;;  %v3698_v39 = vmax.f32 %v3377_v30, %v3589_v6  ;;  %v12863_v2 = vld [vmem:[#allocation88_spill] sm:$0xff]  ;;  %5085 = vmatpush1.bf16.msra.mxu0 %v7685_v34 }
 0x330   :  { %v3839_v15 = vrot.slane %v3699_v37, 6  ;;  %v3871_v60 = vrot.slane %v3699_v37, 2  ;;  %v3701_v25 = vmax.f32 %v3380_v49, %v7191_v18  ;;  %v3270_v36 = vsel %vm3254_vm3, %v7175_v0, %v7176_v58  ;;  %v11305_v18 = vpop.permute.xlu0 %7208 }
 0x331   :  { %v11296_v11 = vmax.f32 %v3379_v41, %v3590_v48  ;;  %v12862_v27 = vmax.f32 %v9729_v23, %v12861_v7  ;;  %v3838_v21 = vrot.slane %v3698_v39, 6  ;;  %v3870_v30 = vrot.slane %v3698_v39, 2 }
 0x332   :  { %v4066_v24 = vsel %vm4058_vm7, %v4049_v3, %v3839_v15  ;;  %v3919_v5 = vrot.slane %v3701_v25, 4  ;;  %v3951_v49 = vrot.slane %v3701_v25, 6  ;;  %v3381_v44 = vmax.f32 %v12863_v2, %v3270_v36  ;;  %v7234_v25 = vpop.permute.xlu1 %7233  ;;  %v12865_v2 = vld [vmem:[#allocation97_spill] sm:$0xff] }
 0x333   :  { %v2998_v20 = vmax.f32 %v12862_v27, %v9852_v61  ;;  %v4083_v32 = vsel %vm4075_vm8, %v4066_v24, %v3699_v37  ;;  %v3918_v52 = vrot.slane %v11296_v11, 4  ;;  %v3950_v58 = vrot.slane %v11296_v11, 6 }
 0x334   :  { %v4065_v23 = vsel %vm4058_vm7, %v4048_v51, %v3838_v21  ;;  %v4100_v61 = vsel %vm4092_vm9, %v4083_v32, %v3871_v60  ;;  %v3384_v0 = vmax.f32 %v10069_v26, %v7196_v54  ;;  %v7195_v37 = vunpack.i.l.bf16 %v11217_v57 }
 0x335   :  { %v4082_v3 = vsel %vm4075_vm8, %v4065_v23, %v3698_v39  ;;  %v4116_v41 = vsel %vm2581_vm2, %v4100_v61, %v3919_v5  ;;  %v7181_v6 = vunpack.i.h.bf16 %v11245_v10  ;;  %v7180_v51 = vunpack.i.l.bf16 %v11245_v10  ;;  %v12864_v61 = vld [vmem:[#allocation103_spill] sm:$0xff] }
 0x336   :  { %v4099_v48 = vsel %vm4092_vm9, %v4082_v3, %v3870_v30  ;;  %v11320_v15 = vsel %vm417_vm1, %v4116_v41, %v3951_v49  ;;  %v7201_v60 = vunpack.i.h.bf16 %v11251_v53  ;;  %v3271_v39 = vsel %vm3254_vm3, %v7195_v37, %v7196_v54  ;;  %v11331_v30 = vpop.permute.xlu0 %7223 }
 0x337   :  { %v11325_v26 = vsel %vm2581_vm2, %v4099_v48, %v3918_v52  ;;  %v3703_v34 = vmax.f32 %v3382_v35, %v7181_v6  ;;  %v7200_v57 = vunpack.i.l.bf16 %v11251_v53  ;;  %v3383_v36 = vmax.f32 %v2998_v20, %v3271_v39  ;;  %v11346_v48 = vpop.permute.xlu1 %7238 }
 0x338   :  { %v3591_v7 = vsel %vm3575_vm4, %v7180_v51, %v7181_v6  ;;  %v3705_v27 = vmax.f32 %v3384_v0, %v7201_v60  ;;  %v7216_v21 = vunpack.i.h.bf16 %v11268_v45  ;;  %v7215_v32 = vunpack.i.l.bf16 %v11268_v45  ;;  %v12866_v0 = vld [vmem:[#allocation52_spill] sm:$0xff] }
 0x339   :  { %v3702_v10 = vmax.f32 %v3381_v44, %v3591_v7  ;;  %v3999_v24 = vrot.slane %v3703_v34, 2  ;;  %v3592_v5 = vsel %vm3575_vm4, %v7200_v57, %v7201_v60  ;;  %v12867_v3 = vmax.f32 %v12865_v2, %v12866_v0  ;;  %v12870_v0 = vld [vmem:[#allocation54_spill] sm:$0xff] }
 0x33a   :  { %v3704_v52 = vmax.f32 %v3383_v36, %v3592_v5  ;;  %v3761_v49 = vrot.slane %v3705_v27, 2  ;;  %v3793_v54 = vrot.slane %v3705_v27, 4  ;;  %v3390_v35 = vmax.f32 %v10133_v40, %v7216_v21 }
 0x33b   :  { %v3998_v53 = vrot.slane %v3702_v10, 2  ;;  %v4148_v20 = vsel %vm4024_vm5, %v3703_v34, %v3999_v24  ;;  %v3274_v23 = vsel %vm3254_vm3, %v7215_v32, %v7216_v21  ;;  %v3002_v44 = vmax.f32 %v12867_v3, %v12864_v61  ;;  %v11356_v21 = vpop.permute.xlu0 %7228  ;;  %v12872_v3 = vld [vmem:[#allocation53_spill] sm:$0xff] }
 0x33c   :  { %v11343_v41 = vsel %vm4041_vm6, %v4148_v20, 0.0  ;;  %v3760_v37 = vrot.slane %v3704_v52, 2  ;;  %v3792_v45 = vrot.slane %v3704_v52, 4  ;;  %v4034_v6 = vsel %vm4024_vm5, %v3705_v27, %v3761_v49 }
 0x33d   :  { %v4147_v40 = vsel %vm4024_vm5, %v3702_v10, %v3998_v53  ;;  %v4051_v51 = vsel %vm4041_vm6, %v4034_v6, %v3793_v54  ;;  %v3389_v60 = vmax.f32 %v10001_v29, %v3274_v23  ;;  %v7206_v39 = vunpack.i.h.bf16 %v11282_v63  ;;  %v11373_v6 = vpop.permute.xlu1 %7243 }
 0x33e   :  { %v4033_v34 = vsel %vm4024_vm5, %v3704_v52, %v3760_v37  ;;  %v7205_v57 = vunpack.i.l.bf16 %v11282_v63  ;;  %v7221_v36 = vunpack.i.h.bf16 %v11294_v13  ;;  %v7220_v7 = vunpack.i.l.bf16 %v11294_v13  ;;  %v12868_v63 = vld [vmem:[#allocation57_spill] sm:$0xff] }
 0x33f   :  { %v4050_v27 = vsel %vm4041_vm6, %v4033_v34, %v3792_v45  ;;  %v3386_v10 = vmax.f32 %v10194_v8, %v7206_v39  ;;  %v7211_v24 = vunpack.i.h.bf16 %v11305_v18  ;;  %v7210_v29 = vunpack.i.l.bf16 %v11305_v18  ;;  %v12871_v18 = vld [vmem:[#allocation51_spill] sm:$0xff] }
 0x340   :  { %v3272_v5 = vsel %vm3254_vm3, %v7205_v57, %v7206_v39  ;;  %v3595_v32 = vsel %vm3575_vm4, %v7220_v7, %v7221_v36  ;;  %v3711_v52 = vmax.f32 %v3390_v35, %v7221_v36  ;;  %v12869_v49 = vmax.f32 %v10017_v38, %v12868_v63  ;;  %v11381_v57 = vpop.permute.xlu0 %7263 }
 0x341   :  { %v3385_v54 = vmax.f32 %v3002_v44, %v3272_v5  ;;  %v3710_v53 = vmax.f32 %v3389_v60, %v3595_v32  ;;  %v3593_v20 = vsel %vm3575_vm4, %v7210_v29, %v7211_v24  ;;  %v3707_v23 = vmax.f32 %v3386_v10, %v7211_v24 }
 0x342   :  { %v3014_v13 = vmax.f32 %v12869_v49, %v10108_v19  ;;  %v4001_v8 = vrot.slane %v3711_v52, 2  ;;  %v7236_v61 = vunpack.i.h.bf16 %v7234_v25  ;;  %v7235_v2 = vunpack.i.l.bf16 %v7234_v25 }
 0x343   :  { %v12873_v37 = vmax.f32 %v12871_v18, %v12872_v3  ;;  %v4000_v35 = vrot.slane %v3710_v53, 2  ;;  %v3706_v39 = vmax.f32 %v3385_v54, %v3593_v20  ;;  %v3841_v34 = vrot.slane %v3707_v23, 6  ;;  %v12876_v18 = vld [vmem:[#allocation64_spill] sm:$0xff] }
 0x344   :  { %v3873_v38 = vrot.slane %v3707_v23, 2  ;;  %v11376_v19 = vsel %vm4024_vm5, %v3711_v52, %v4001_v8  ;;  %v3392_v44 = vmax.f32 %v10308_v47, %v7236_v61  ;;  %v3275_v60 = vsel %vm3254_vm3, %v7235_v2, %v7236_v61  ;;  %v12874_v2 = vld [vmem:[#allocation65_spill] sm:$0xff] }
 0x345   :  { %v3006_v45 = vmax.f32 %v12873_v37, %v12870_v0  ;;  %v7226_v25 = vunpack.i.h.bf16 %v11331_v30  ;;  %v11384_v36 = vsel %vm4024_vm5, %v3710_v53, %v4000_v35  ;;  %v3840_v7 = vrot.slane %v3706_v39, 6  ;;  %v12875_v0 = vld [vmem:[#allocation56_spill] sm:$0xff] }
 0x346   :  { %v3872_v10 = vrot.slane %v3706_v39, 2  ;;  %v4068_v24 = vsel %vm4058_vm7, %v4051_v51, %v3841_v34  ;;  %v3391_v5 = vmax.f32 %v3014_v13, %v3275_v60  ;;  %v7225_v47 = vunpack.i.l.bf16 %v11331_v30  ;;  %v11413_v13 = vpop.permute.xlu1 %7248 }
 0x347   :  { %v4085_v29 = vsel %vm4075_vm8, %v4068_v24, %v3707_v23  ;;  %v3388_v32 = vmax.f32 %v10327_v55, %v7226_v25  ;;  %v4067_v52 = vsel %vm4058_vm7, %v4050_v27, %v3840_v7  ;;  %v11396_v49 = vsel %vm417_vm1, %v11272_v16, %v3948_v14  ;;  %v7690_v14 = vld [vmem:[#allocation2 + $0x204] ss:$16 sps:$4 sm:$0xff]  }
 0x348   :  { %v4102_v63 = vsel %vm4092_vm9, %v4085_v29, %v3873_v38  ;;  %v11402_v51 = vsel %vm417_vm1, %v11325_v26, %v3950_v58  ;;  %v4084_v55 = vsel %vm4075_vm8, %v4067_v52, %v3706_v39  ;;  %v3273_v30 = vsel %vm3254_vm3, %v7225_v47, %v7226_v25  ;;  %5127 = vmatprep.subr.bf16.mxu0 %v7690_v14 }
 0x349   :  { %v11408_v27 = vsel %vm4041_vm6, %v11194_v33, 0.0  ;;  %v11411_v46 = vsel %vm4041_vm6, %v4147_v40, 0.0  ;;  %v4101_v16 = vsel %vm4092_vm9, %v4084_v55, %v3872_v10  ;;  %v3387_v11 = vmax.f32 %v3006_v45, %v3273_v30  ;;  %v7269_v40 = vpop.permute.xlu0 %7268 }
 0x34a   :  { %v4217_v58 = vrot.slane %v11396_v49, 1  ;;  %v4218_v26 = vrot.slane %v11408_v27, 1  ;;  %v4223_v54 = vrot.slane %v11402_v51, 1  ;;  %v4224_v53 = vrot.slane %v11411_v46, 1  ;;  %v7254_v29 = vpop.permute.xlu1 %7253 }
 0x34b   :  { %v7241_v33 = vunpack.i.h.bf16 %v11346_v48  ;;  %v7240_v20 = vunpack.i.l.bf16 %v11346_v48  ;;  %v7231_v8 = vunpack.i.h.bf16 %v11356_v21  ;;  %v7230_v61 = vunpack.i.l.bf16 %v11356_v21 }
 0x34c   :  { %v4219_v23 = vsel %vm417_vm1, %v4217_v58, %v4218_v26  ;;  %v12877_v3 = vmax.f32 %v12875_v0, %v12876_v18  ;;  %v4225_v45 = vsel %vm417_vm1, %v4223_v54, %v4224_v53  ;;  %v7246_v48 = vunpack.i.h.bf16 %v11373_v6  ;;  %v12878_v54 = vld [vmem:[#allocation62_spill] sm:$0xff]  ;;  %v12879_v53 = vld [vmem:[#allocation67_spill] sm:$0xff] }
 0x34d   :  { %v3596_v35 = vsel %vm3575_vm4, %v7240_v20, %v7241_v33  ;;  %v3713_v39 = vmax.f32 %v3392_v44, %v7241_v33  ;;  %v7357_v34 = vpack.i.bf16 %v4225_v45, %v4219_v23  ;;  %v3594_v60 = vsel %vm3575_vm4, %v7230_v61, %v7231_v8  ;;  %v7274_v58 = vpop.permute.xlu0 %7273 }
 0x34e   :  { %v3018_v37 = vmax.f32 %v12877_v3, %v12874_v2  ;;  %v3712_v38 = vmax.f32 %v3391_v5, %v3596_v35  ;;  %v3709_v25 = vmax.f32 %v3388_v32, %v7231_v8  ;;  %v11433_v21 = vmax.f32 %v3387_v11, %v3594_v60 }
 0x34f   :  { %v3763_v7 = vrot.slane %v3713_v39, 2  ;;  %v3795_v10 = vrot.slane %v3713_v39, 4  ;;  %v3394_v24 = vmax.f32 %v10436_v22, %v7246_v48  ;;  %7358 = vrot.lane.b32.xlu1 %v7357_v34, %s7965_s9  ;;  %v7245_v32 = vunpack.i.l.bf16 %v11373_v6 }
 0x350   :  { %v3762_v47 = vrot.slane %v3712_v38, 2  ;;  %v3794_v52 = vrot.slane %v3712_v38, 4  ;;  %v3921_v55 = vrot.slane %v3709_v25, 4  ;;  %v3953_v44 = vrot.slane %v3709_v25, 6 }
 0x351   :  { %v4036_v30 = vsel %vm4024_vm5, %v3713_v39, %v3763_v7  ;;  %v3920_v5 = vrot.slane %v11433_v21, 4  ;;  %v3952_v14 = vrot.slane %v11433_v21, 6  ;;  %v12880_v33 = vmax.f32 %v12878_v54, %v12879_v53  ;;  %v7259_v39 = vpop.permute.xlu1 %7258 }
 0x352   :  { %v4035_v11 = vsel %vm4024_vm5, %v3712_v38, %v3762_v47  ;;  %v4053_v22 = vsel %vm4041_vm6, %v4036_v30, %v3795_v10  ;;  %v4118_v26 = vsel %vm2581_vm2, %v4102_v63, %v3921_v55  ;;  %v3276_v6 = vsel %vm3254_vm3, %v7245_v32, %v7246_v48  ;;  %v7279_v10 = vpop.permute.xlu0 %7278  ;;  %v12883_v30 = vld [vmem:[#allocation69_spill] sm:$0xff] }
 0x353   :  { %v3022_v20 = vmax.f32 %v12880_v33, %v10230_v17  ;;  %v4052_v23 = vsel %vm4041_vm6, %v4035_v11, %v3794_v52  ;;  %v11450_v8 = vsel %vm2581_vm2, %v4101_v16, %v3920_v5  ;;  %v11453_v61 = vsel %vm417_vm1, %v4118_v26, %v3953_v44  ;;  %v12882_v44 = vld [vmem:[#allocation76_spill] sm:$0xff] }
 0x354   :  { %v3393_v2 = vmax.f32 %v3018_v37, %v3276_v6  ;;  %v7266_v0 = vunpack.i.h.bf16 %v11381_v57  ;;  %v7265_v63 = vunpack.i.l.bf16 %v11381_v57  ;;  %v7251_v18 = vunpack.i.h.bf16 %v11413_v13  ;;  %v12881_v57 = vld [vmem:[#allocation85_spill] sm:$0xff] }
 0x355   :  { %v7250_v3 = vunpack.i.l.bf16 %v11413_v13  ;;  %v7271_v17 = vunpack.i.h.bf16 %v7269_v40  ;;  %v7270_v45 = vunpack.i.l.bf16 %v7269_v40  ;;  %v7256_v35 = vunpack.i.h.bf16 %v7254_v29 }
 0x356   :  { %v3396_v16 = vmax.f32 %v10469_v59, %v7266_v0  ;;  %v3277_v34 = vsel %vm3254_vm3, %v7265_v63, %v7266_v0  ;;  %v3715_v38 = vmax.f32 %v3394_v24, %v7251_v18  ;;  %v7255_v60 = vunpack.i.l.bf16 %v7254_v29  ;;  %v12884_v24 = vld [vmem:[#allocation37_spill] sm:$0xff]  ;;  %v7294_v0 = vpop.permute.xlu1 %7293 }
 0x357   :  { %v3395_v48 = vmax.f32 %v3022_v20, %v3277_v34  ;;  %v3597_v37 = vsel %vm3575_vm4, %v7250_v3, %v7251_v18  ;;  %v3598_v25 = vsel %vm3575_vm4, %v7270_v45, %v7271_v17  ;;  %v3398_v7 = vmax.f32 %v12881_v57, %v7256_v35  ;;  %v12886_v3 = vld [vmem:[#allocation68_spill] sm:$0xff]  ;;  %v12887_v45 = vld [vmem:[#allocation43_spill] sm:$0xff] }
 0x358   :  { %v3714_v47 = vmax.f32 %v3393_v2, %v3597_v37  ;;  %v3843_v13 = vrot.slane %v3715_v38, 6  ;;  %v3875_v52 = vrot.slane %v3715_v38, 2  ;;  %v3717_v40 = vmax.f32 %v3396_v16, %v7271_v17 }
 0x359   :  { %v11465_v55 = vmax.f32 %v3395_v48, %v3598_v25  ;;  %v3278_v59 = vsel %vm3254_vm3, %v7255_v60, %v7256_v35  ;;  %v12885_v29 = vmax.f32 %v12883_v30, %v12884_v24  ;;  %v7276_v32 = vunpack.i.h.bf16 %v7274_v58  ;;  %v7284_v60 = vpop.permute.xlu0 %7283 }
 0x35a   :  { %v3842_v11 = vrot.slane %v3714_v47, 6  ;;  %v3874_v26 = vrot.slane %v3714_v47, 2  ;;  %v4070_v54 = vsel %vm4058_vm7, %v4053_v22, %v3843_v13  ;;  %v3923_v53 = vrot.slane %v3717_v40, 4 }
 0x35b   :  { %v3030_v5 = vmax.f32 %v12885_v29, %v12882_v44  ;;  %v4087_v33 = vsel %vm4075_vm8, %v4070_v54, %v3715_v38  ;;  %v3922_v20 = vrot.slane %v11465_v55, 4  ;;  %v3954_v6 = vrot.slane %v11465_v55, 6 }
 0x35c   :  { %v3955_v2 = vrot.slane %v3717_v40, 6  ;;  %v4069_v63 = vsel %vm4058_vm7, %v4052_v23, %v3842_v11  ;;  %v4104_v18 = vsel %vm4092_vm9, %v4087_v33, %v3875_v52  ;;  %v3397_v17 = vmax.f32 %v12886_v3, %v3278_v59  ;;  %v12888_v33 = vld [vmem:[#allocation92_spill] sm:$0xff] }
 0x35d   :  { %v3400_v35 = vmax.f32 %v12887_v45, %v7276_v32  ;;  %v4086_v16 = vsel %vm4075_vm8, %v4069_v63, %v3714_v47  ;;  %v4120_v22 = vsel %vm2581_vm2, %v4104_v18, %v3923_v53  ;;  %v7275_v34 = vunpack.i.l.bf16 %v7274_v58  ;;  %v12891_v63 = vld [vmem:[#allocation81_spill] sm:$0xff] }
 0x35e   :  { %v7261_v38 = vunpack.i.h.bf16 %v7259_v39  ;;  %v4103_v48 = vsel %vm4092_vm9, %v4086_v16, %v3874_v26  ;;  %v11484_v37 = vsel %vm417_vm1, %v4120_v22, %v3955_v2  ;;  %v7260_v25 = vunpack.i.l.bf16 %v7259_v39  ;;  %v7299_v26 = vpop.permute.xlu1 %7298 }
 0x35f   :  { %v7281_v23 = vunpack.i.h.bf16 %v7279_v10  ;;  %v11487_v57 = vsel %vm2581_vm2, %v4103_v48, %v3922_v20  ;;  %v3279_v13 = vsel %vm3254_vm3, %v7275_v34, %v7276_v32  ;;  %v7280_v40 = vunpack.i.l.bf16 %v7279_v10  ;;  %v12890_v32 = vld [vmem:[#allocation70_spill] sm:$0xff] }
 0x360   :  { %v3719_v52 = vmax.f32 %v3398_v7, %v7261_v38  ;;  %v3399_v47 = vmax.f32 %v3030_v5, %v3279_v13  ;;  %v3599_v59 = vsel %vm3575_vm4, %v7260_v25, %v7261_v38  ;;  %v7296_v44 = vunpack.i.h.bf16 %v7294_v0  ;;  %v12889_v5 = vld [vmem:[#allocation82_spill] sm:$0xff]  ;;  %v12893_v38 = vld [vmem:[#allocation84_spill] sm:$0xff] }
 0x361   :  { %v3721_v58 = vmax.f32 %v3400_v35, %v7281_v23  ;;  %v3718_v30 = vmax.f32 %v3397_v17, %v3599_v59  ;;  %v3600_v29 = vsel %vm3575_vm4, %v7280_v40, %v7281_v23  ;;  %v7295_v11 = vunpack.i.l.bf16 %v7294_v0  ;;  %v7289_v17 = vpop.permute.xlu0 %7288  ;;  %v12894_v59 = vld [vmem:[#allocation96_spill] sm:$0xff] }
 0x362   :  { %v4003_v24 = vrot.slane %v3719_v52, 2  ;;  %v3720_v39 = vmax.f32 %v3399_v47, %v3600_v29  ;;  %v3406_v20 = vmax.f32 %v12888_v33, %v7296_v44  ;;  %v12892_v18 = vmax.f32 %v12890_v32, %v12891_v63  ;;  %v12896_v33 = vld [vmem:[#allocation42_spill] sm:$0xff] }
 0x363   :  { %v3765_v54 = vrot.slane %v3721_v58, 2  ;;  %v3797_v53 = vrot.slane %v3721_v58, 4  ;;  %v4002_v2 = vrot.slane %v3718_v30, 2  ;;  %v3282_v10 = vsel %vm3254_vm3, %v7295_v11, %v7296_v44  ;;  %v7314_v11 = vpop.permute.xlu1 %7313 }
 0x364   :  { %v4152_v7 = vsel %vm4024_vm5, %v3719_v52, %v4003_v24  ;;  %v3034_v3 = vmax.f32 %v12892_v18, %v12889_v5  ;;  %v3764_v0 = vrot.slane %v3720_v39, 2  ;;  %v3796_v35 = vrot.slane %v3720_v39, 4 }
 0x365   :  { %v11500_v45 = vsel %vm4041_vm6, %v4152_v7, 0.0  ;;  %v4038_v16 = vsel %vm4024_vm5, %v3721_v58, %v3765_v54  ;;  %v4151_v22 = vsel %vm4024_vm5, %v3718_v30, %v4002_v2  ;;  %v3405_v48 = vmax.f32 %v12893_v38, %v3282_v10  ;;  %v12897_v2 = vld [vmem:[#allocation90_spill] sm:$0xff]  ;;  %v7304_v32 = vpop.permute.xlu0 %7303 }
 0x366   :  { %v4055_v34 = vsel %vm4041_vm6, %v4038_v16, %v3797_v53  ;;  %v7286_v25 = vunpack.i.h.bf16 %v7284_v60  ;;  %v4037_v23 = vsel %vm4024_vm5, %v3720_v39, %v3764_v0  ;;  %v7285_v13 = vunpack.i.l.bf16 %v7284_v60  ;;  %v12895_v53 = vld [vmem:[#allocation91_spill] sm:$0xff] }
 0x367   :  { %v7301_v52 = vunpack.i.h.bf16 %v7299_v26  ;;  %v7300_v40 = vunpack.i.l.bf16 %v7299_v26  ;;  %v4054_v47 = vsel %vm4041_vm6, %v4037_v23, %v3796_v35  ;;  %v7291_v24 = vunpack.i.h.bf16 %v7289_v17  ;;  %v12899_v0 = vld [vmem:[#allocation83_spill] sm:$0xff]  ;;  %v12900_v35 = vld [vmem:[#allocation77_spill] sm:$0xff] }
 0x368   :  { %v3402_v44 = vmax.f32 %v12894_v59, %v7286_v25  ;;  %v7290_v29 = vunpack.i.l.bf16 %v7289_v17  ;;  %v3280_v58 = vsel %vm3254_vm3, %v7285_v13, %v7286_v25  ;;  %v12898_v7 = vmax.f32 %v12896_v33, %v12897_v2  ;;  %v12901_v16 = vld [vmem:[#allocation39_spill] sm:$0xff] }
 0x369   :  { %v3603_v30 = vsel %vm3575_vm4, %v7300_v40, %v7301_v52  ;;  %v3727_v54 = vmax.f32 %v3406_v20, %v7301_v52  ;;  %v3401_v60 = vmax.f32 %v3034_v3, %v3280_v58  ;;  %v7316_v18 = vunpack.i.h.bf16 %v7314_v11  ;;  %v7309_v21 = vpop.permute.xlu0 %7308 }
 0x36a   :  { %v3046_v39 = vmax.f32 %v12898_v7, %v12895_v53  ;;  %v11515_v10 = vmax.f32 %v3405_v48, %v3603_v30  ;;  %v3601_v26 = vsel %vm3575_vm4, %v7290_v29, %v7291_v24  ;;  %v3723_v5 = vmax.f32 %v3402_v44, %v7291_v24  ;;  %v12903_v48 = vld [vmem:[#allocation101_spill] sm:$0xff]  ;;  %v12904_v53 = vld [vmem:[#allocation104_spill] sm:$0xff] }
 0x36b   :  { %v4005_v63 = vrot.slane %v3727_v54, 2  ;;  %v7315_v17 = vunpack.i.l.bf16 %v7314_v11  ;;  %v12902_v38 = vmax.f32 %v12900_v35, %v12901_v16  ;;  %v3722_v23 = vmax.f32 %v3401_v60, %v3601_v26  ;;  %v7319_v26 = vpop.permute.xlu1 %7318 }
 0x36c   :  { %v4004_v25 = vrot.slane %v11515_v10, 2  ;;  %v3845_v13 = vrot.slane %v3723_v5, 6  ;;  %v3877_v52 = vrot.slane %v3723_v5, 2  ;;  %v3408_v40 = vmax.f32 %v12903_v48, %v7316_v18 }
 0x36d   :  { %v3038_v20 = vmax.f32 %v12902_v38, %v12899_v0  ;;  %v11524_v3 = vsel %vm4024_vm5, %v3727_v54, %v4005_v63  ;;  %v3283_v59 = vsel %vm3254_vm3, %v7315_v17, %v7316_v18  ;;  %v7306_v44 = vunpack.i.h.bf16 %v7304_v32 }
 0x36e   :  { %v3844_v24 = vrot.slane %v3722_v23, 6  ;;  %v3876_v29 = vrot.slane %v3722_v23, 2  ;;  %v4072_v11 = vsel %vm4058_vm7, %v4055_v34, %v3845_v13  ;;  %v3407_v58 = vmax.f32 %v3046_v39, %v3283_v59 }
 0x36f   :  { %v4089_v30 = vsel %vm4075_vm8, %v4072_v11, %v3723_v5  ;;  %v3404_v33 = vmax.f32 %v12904_v53, %v7306_v44  ;;  %v7305_v2 = vunpack.i.l.bf16 %v7304_v32  ;;  %v11535_v54 = vsel %vm417_vm1, %v11450_v8, %v3952_v14  ;;  %v7339_v53 = vpop.permute.xlu0 %7338 }
 0x370   :  { %v4071_v7 = vsel %vm4058_vm7, %v4054_v47, %v3844_v24  ;;  %v4106_v60 = vsel %vm4092_vm9, %v4089_v30, %v3877_v52  ;;  %v11543_v34 = vsel %vm417_vm1, %v11487_v57, %v3954_v6  ;;  %v11547_v39 = vsel %vm4041_vm6, %v11384_v36, 0.0  ;;  %v7324_v24 = vpop.permute.xlu1 %7323 }
 0x371   :  { %v4088_v5 = vsel %vm4075_vm8, %v4071_v7, %v3722_v23  ;;  %v3281_v14 = vsel %vm3254_vm3, %v7305_v2, %v7306_v44  ;;  %v11552_v8 = vsel %vm4041_vm6, %v4151_v22, 0.0  ;;  %v4229_v47 = vrot.slane %v11535_v54, 1 }
 0x372   :  { %v11556_v55 = vsel %vm4092_vm9, %v4088_v5, %v3876_v29  ;;  %v3403_v6 = vmax.f32 %v3038_v20, %v3281_v14  ;;  %v4230_v57 = vrot.slane %v11547_v39, 1  ;;  %v4235_v36 = vrot.slane %v11543_v34, 1 }
 0x373   :  { %v4236_v32 = vrot.slane %v11552_v8, 1  ;;  %v7321_v63 = vunpack.i.h.bf16 %v7319_v26  ;;  %v7320_v18 = vunpack.i.l.bf16 %v7319_v26  ;;  %v7311_v17 = vunpack.i.h.bf16 %v7309_v21 }
 0x374   :  { %v4231_v0 = vsel %vm417_vm1, %v4229_v47, %v4230_v57  ;;  %v7310_v35 = vunpack.i.l.bf16 %v7309_v21  ;;  %v11564_v22 = vsel %vm4041_vm6, %v11039_v56, 0.0  ;;  %v4310_v16 = vrot.slane %v11209_v62, 2 }
 0x375   :  { %v4237_v38 = vsel %vm417_vm1, %v4235_v36, %v4236_v32  ;;  %v3604_v20 = vsel %vm3575_vm4, %v7320_v18, %v7321_v63  ;;  %v3729_v23 = vmax.f32 %v3408_v40, %v7321_v63  ;;  %v3725_v13 = vmax.f32 %v3404_v33, %v7311_v17  ;;  %v12905_v63 = vld [vmem:[#allocation47_spill] sm:$0xff]  ;;  %v12906_v18 = vld [vmem:[#allocation89_spill] sm:$0xff] }
 0x376   :  { %v7362_v52 = vpack.i.bf16 %v4237_v38, %v4231_v0  ;;  %v3728_v48 = vmax.f32 %v3407_v58, %v3604_v20  ;;  %v3602_v59 = vsel %vm3575_vm4, %v7310_v35, %v7311_v17  ;;  %v4311_v44 = vrot.slane %v11223_v12, 2  ;;  %v12907_v17 = vld [vmem:[#allocation46_spill] sm:$0xff]  ;;  %v12909_v38 = vld [vmem:[#allocation99_spill] sm:$0xff]  ;;  %v12910_v20 = vld [vmem:[#allocation93_spill] sm:$0xff] }
 0x377   :  { %v3767_v29 = vrot.slane %v3729_v23, 2  ;;  %v3799_v11 = vrot.slane %v3729_v23, 4  ;;  %v11571_v30 = vmax.f32 %v3403_v6, %v3602_v59  ;;  %v3925_v56 = vrot.slane %v3725_v13, 4 }
 0x378   :  { %7363 = vrot.lane.b32.xlu0 %v7362_v52, %s7965_s9  ;;  %v3766_v2 = vrot.slane %v3728_v48, 2  ;;  %v3798_v7 = vrot.slane %v3728_v48, 4  ;;  %v3957_v26 = vrot.slane %v3725_v13, 6  ;;  %v4312_v40 = vsel %vm2581_vm2, %v4310_v16, %v4311_v44  ;;  %v7329_v44 = vpop.permute.xlu1 %7328 }
 0x379   :  { %v4040_v58 = vsel %vm4024_vm5, %v3729_v23, %v3767_v29  ;;  %v3924_v33 = vrot.slane %v11571_v30, 4  ;;  %v3956_v21 = vrot.slane %v11571_v30, 6  ;;  %v4122_v5 = vsel %vm2581_vm2, %v4106_v60, %v3925_v56  ;;  %v12911_v23 = vld [vmem:[#allocation98_spill] sm:$0xff] }
 0x37a   :  { %v4039_v14 = vsel %vm4024_vm5, %v3728_v48, %v3766_v2  ;;  %v4057_v47 = vsel %vm4041_vm6, %v4040_v58, %v3799_v11  ;;  %v11582_v6 = vsel %vm417_vm1, %v4122_v5, %v3957_v26  ;;  %v4313_v57 = vrot.slane %v11053_v43, 2  ;;  %v12913_v11 = vld [vmem:[#allocation15_spill] sm:$0xff]  ;;  %v7344_v26 = vpop.permute.xlu0 %7343  ;;  %v12914_v5 = vld [vmem:[#allocation12_spill] sm:$0xff] }
 0x37b   :  { %v4056_v36 = vsel %vm4041_vm6, %v4039_v14, %v3798_v7  ;;  %v4314_v32 = vrot.slane %v11564_v22, 2  ;;  %v12908_v0 = vmax.f32 %v12906_v18, %v12907_v17  ;;  %v7326_v16 = vunpack.i.h.bf16 %v7324_v24 }
 0x37c   :  { %v7325_v60 = vunpack.i.l.bf16 %v7324_v24  ;;  %v12912_v13 = vmax.f32 %v12910_v20, %v12911_v23  ;;  %v7341_v48 = vunpack.i.h.bf16 %v7339_v53  ;;  %v7340_v59 = vunpack.i.l.bf16 %v7339_v53 }
 0x37d   :  { %v3050_v35 = vmax.f32 %v12908_v0, %v12905_v63  ;;  %v4315_v29 = vsel %vm2581_vm2, %v4313_v57, %v4314_v32  ;;  %v3410_v56 = vmax.f32 %v12913_v11, %v7326_v16  ;;  %v4208_v2 = vrot.slane %v11053_v43, 1 }
 0x37e   :  { %v3054_v52 = vmax.f32 %v12912_v13, %v12909_v38  ;;  %v4209_v7 = vrot.slane %v11564_v22, 1  ;;  %v7367_v58 = vpack.i.bf16 %v4315_v29, %v4312_v40  ;;  %v3284_v24 = vsel %vm3254_vm3, %v7325_v60, %v7326_v16 }
 0x37f   :  { %v3412_v14 = vmax.f32 %v12914_v5, %v7341_v48  ;;  %v3285_v63 = vsel %vm3254_vm3, %v7340_v59, %v7341_v48  ;;  %v3409_v18 = vmax.f32 %v3050_v35, %v3284_v24  ;;  %v4214_v57 = vrot.slane %v11113_v28, 1  ;;  %v7334_v59 = vpop.permute.xlu1 %7333 }
 0x380   :  { %v3411_v17 = vmax.f32 %v3054_v52, %v3285_v63  ;;  %v4210_v53 = vsel %vm417_vm1, %v4208_v2, %v4209_v7  ;;  %7368 = vrot.lane.b32.xlu0 %v7367_v58, %s7961_s3  ;;  %v4215_v32 = vrot.slane %v11156_v9, 1  ;;  %v7331_v0 = vunpack.i.h.bf16 %v7329_v44 }
 0x381   :  { %v7330_v38 = vunpack.i.l.bf16 %v7329_v44  ;;  %v7346_v20 = vunpack.i.h.bf16 %v7344_v26  ;;  %v7345_v40 = vunpack.i.l.bf16 %v7344_v26  ;;  %v11608_v16 = vsel %vm4041_vm6, %v11188_v4, 0.0 }
 0x382   :  { %v4322_v60 = vrot.slane %v11396_v49, 2  ;;  %v4323_v35 = vrot.slane %v11408_v27, 2  ;;  %v4216_v23 = vsel %vm417_vm1, %v4214_v57, %v4215_v32  ;;  %v3731_v52 = vmax.f32 %v3410_v56, %v7331_v0 }
 0x383   :  { %v3605_v13 = vsel %vm3575_vm4, %v7330_v38, %v7331_v0  ;;  %v3733_v48 = vmax.f32 %v3412_v14, %v7346_v20  ;;  %v7382_v29 = vpack.i.bf16 %v4216_v23, %v4210_v53  ;;  %v3606_v44 = vsel %vm3575_vm4, %v7345_v40, %v7346_v20 }
 0x384   :  { %v3730_v11 = vmax.f32 %v3409_v18, %v3605_v13  ;;  %v4324_v2 = vsel %vm2581_vm2, %v4322_v60, %v4323_v35  ;;  %v3847_v7 = vrot.slane %v3731_v52, 6  ;;  %v3879_v4 = vrot.slane %v3731_v52, 2  ;;  %v7349_v35 = vpop.permute.xlu1 %7348 }
 0x385   :  { %v11616_v26 = vmax.f32 %v3411_v17, %v3606_v44  ;;  %v3927_v58 = vrot.slane %v3733_v48, 4  ;;  %7383 = vrot.lane.b32.xlu0 %v7382_v29, %s7965_s9  ;;  %v3959_v63 = vrot.slane %v3733_v48, 6  ;;  %v4325_v56 = vrot.slane %v11275_v42, 2  ;;  %v12915_v44 = vld [vmem:[#allocation100_spill] sm:$0xff] }
 0x386   :  { %v3846_v24 = vrot.slane %v3730_v11, 6  ;;  %v3878_v5 = vrot.slane %v3730_v11, 2  ;;  %v4074_v14 = vsel %vm4058_vm7, %v4057_v47, %v3847_v7  ;;  %v4326_v57 = vrot.slane %v11608_v16, 2 }
 0x387   :  { %v3926_v18 = vrot.slane %v11616_v26, 4  ;;  %v3958_v53 = vrot.slane %v11616_v26, 6  ;;  %v4091_v17 = vsel %vm4075_vm8, %v4074_v14, %v3731_v52  ;;  %v7336_v0 = vunpack.i.h.bf16 %v7334_v59 }
 0x388   :  { %v4073_v32 = vsel %vm4058_vm7, %v4056_v36, %v3846_v24  ;;  %v7335_v38 = vunpack.i.l.bf16 %v7334_v59  ;;  %v4108_v40 = vsel %vm4092_vm9, %v4091_v17, %v3879_v4  ;;  %v4327_v60 = vsel %vm2581_vm2, %v4325_v56, %v4326_v57 }
 0x389   :  { %v4090_v20 = vsel %vm4075_vm8, %v4073_v32, %v3730_v11  ;;  %v4220_v47 = vrot.slane %v11275_v42, 1  ;;  %v4124_v13 = vsel %vm2581_vm2, %v4108_v40, %v3927_v58  ;;  %v7392_v48 = vpack.i.bf16 %v4327_v60, %v4324_v2 }
 0x38a   :  { %v4107_v23 = vsel %vm4092_vm9, %v4090_v20, %v3878_v5  ;;  %v3414_v36 = vmax.f32 %v11006_v1, %v7336_v0  ;;  %v11635_v59 = vsel %vm417_vm1, %v4124_v13, %v3959_v63  ;;  %v3286_v29 = vsel %vm3254_vm3, %v7335_v38, %v7336_v0 }
 0x38b   :  { %v4123_v52 = vsel %vm2581_vm2, %v4107_v23, %v3926_v18  ;;  %v4221_v11 = vrot.slane %v11608_v16, 1  ;;  %7393 = vrot.lane.b32.xlu0 %v7392_v48, %s7961_s3  ;;  %v3413_v7 = vmax.f32 %v12915_v44, %v3286_v29  ;;  %v4226_v4 = vrot.slane %v11320_v15, 1 }
 0x38c   :  { %v4227_v58 = vrot.slane %v11343_v41, 1  ;;  %v7351_v2 = vunpack.i.h.bf16 %v7349_v35  ;;  %v7350_v24 = vunpack.i.l.bf16 %v7349_v35  ;;  %v11646_v5 = vsel %vm4041_vm6, %v11376_v19, 0.0 }
 0x38d   :  { %v4222_v1 = vsel %vm417_vm1, %v4220_v47, %v4221_v11  ;;  %v4334_v63 = vrot.slane %v11535_v54, 2  ;;  %v4335_v18 = vrot.slane %v11547_v39, 2  ;;  %v4337_v57 = vrot.slane %v11453_v61, 2 }
 0x38e   :  { %v4228_v56 = vsel %vm417_vm1, %v4226_v4, %v4227_v58  ;;  %v3735_v14 = vmax.f32 %v3414_v36, %v7351_v2  ;;  %v3607_v17 = vsel %vm3575_vm4, %v7350_v24, %v7351_v2  ;;  %v4338_v0 = vrot.slane %v11646_v5, 2 }
 0x38f   :  { %v7402_v32 = vpack.i.bf16 %v4228_v56, %v4222_v1  ;;  %v4232_v38 = vrot.slane %v11453_v61, 1  ;;  %v3734_v20 = vmax.f32 %v3413_v7, %v3607_v17  ;;  %v4336_v19 = vsel %vm2581_vm2, %v4334_v63, %v4335_v18 }
 0x390   :  { %v4007_v40 = vrot.slane %v3735_v14, 2  ;;  %v4233_v60 = vrot.slane %v11646_v5, 1  ;;  %v4339_v47 = vsel %vm2581_vm2, %v4337_v57, %v4338_v0  ;;  %v4238_v35 = vrot.slane %v11484_v37, 1 }
 0x391   :  { %7403 = vrot.lane.b32.xlu0 %v7402_v32, %s7965_s9  ;;  %v4239_v23 = vrot.slane %v11500_v45, 1  ;;  %v4121_v13 = vsel %vm2581_vm2, %v11556_v55, %v3924_v33  ;;  %v4006_v48 = vrot.slane %v3734_v20, 2  ;;  %v7412_v29 = vpack.i.bf16 %v4339_v47, %v4336_v19 }
 0x392   :  { %v4156_v36 = vsel %vm4024_vm5, %v3735_v14, %v4007_v40  ;;  %v4234_v11 = vsel %vm417_vm1, %v4232_v38, %v4233_v60  ;;  %v11674_v4 = vsel %vm417_vm1, %v4121_v13, %v3956_v21  ;;  %v4153_v55 = vsel %vm4024_vm5, %v11515_v10, %v4004_v25 }
 0x393   :  { %v11668_v44 = vsel %vm4041_vm6, %v4156_v36, 0.0  ;;  %v4240_v7 = vsel %vm417_vm1, %v4238_v35, %v4239_v23  ;;  %v4155_v33 = vsel %vm4024_vm5, %v3734_v20, %v4006_v48  ;;  %v11682_v2 = vsel %vm4041_vm6, %v4153_v55, 0.0 }
 0x394   :  { %v7422_v58 = vpack.i.bf16 %v4240_v7, %v4234_v11  ;;  %v11686_v1 = vsel %vm4041_vm6, %v11524_v3, 0.0  ;;  %v4346_v30 = vrot.slane %v11674_v4, 2  ;;  %v4347_v21 = vrot.slane %v11682_v2, 2 }
 0x395   :  { %7413 = vrot.lane.b32.xlu0 %v7412_v29, %s7961_s3  ;;  %v4349_v24 = vrot.slane %v11582_v6, 2  ;;  %v4350_v10 = vrot.slane %v11686_v1, 2  ;;  %v11696_v25 = vsel %vm417_vm1, %v4123_v52, %v3958_v53  ;;  %v11699_v63 = vsel %vm4041_vm6, %v4155_v33, 0.0 }
 0x396   :  { %v4241_v3 = vrot.slane %v11674_v4, 1  ;;  %v4242_v56 = vrot.slane %v11682_v2, 1  ;;  %v4348_v14 = vsel %vm2581_vm2, %v4346_v30, %v4347_v21  ;;  %v4247_v57 = vrot.slane %v11696_v25, 1 }
 0x397   :  { %v4351_v18 = vsel %vm2581_vm2, %v4349_v24, %v4350_v10  ;;  %v4248_v32 = vrot.slane %v11699_v63, 1  ;;  %v4244_v53 = vrot.slane %v11582_v6, 1  ;;  %v4245_v52 = vrot.slane %v11686_v1, 1 }
 0x398   :  { %v7432_v17 = vpack.i.bf16 %v4351_v18, %v4348_v14  ;;  %v4243_v26 = vsel %vm417_vm1, %v4241_v3, %v4242_v56  ;;  %v4250_v38 = vrot.slane %v11635_v59, 1  ;;  %v4251_v20 = vrot.slane %v11668_v44, 1 }
 0x399   :  { %7423 = vrot.lane.b32.xlu0 %v7422_v58, %s7965_s9  ;;  %v4249_v0 = vsel %vm417_vm1, %v4247_v57, %v4248_v32  ;;  %v4316_v40 = vrot.slane %v11215_v31, 2  ;;  %v4246_v60 = vsel %vm417_vm1, %v4244_v53, %v4245_v52  ;;  %v4317_v47 = vrot.slane %v11226_v50, 2 }
 0x39a   :  { %v7372_v19 = vpack.i.bf16 %v4249_v0, %v4243_v26  ;;  %v4319_v35 = vrot.slane %v11113_v28, 2  ;;  %v4252_v23 = vsel %vm417_vm1, %v4250_v38, %v4251_v20  ;;  %v4320_v13 = vrot.slane %v11156_v9, 2 }
 0x39b   :  { %v4417_v48 = vrot.slane %v11053_v43, 3  ;;  %v4418_v36 = vrot.slane %v11564_v22, 3  ;;  %v7437_v29 = vpack.i.bf16 %v4252_v23, %v4246_v60  ;;  %v4318_v11 = vsel %vm2581_vm2, %v4316_v40, %v4317_v47 }
 0x39c   :  { %7373 = vrot.lane.b32.xlu1 %v7372_v19, %s7965_s9  ;;  %v4423_v7 = vrot.slane %v11113_v28, 3  ;;  %v4424_v55 = vrot.slane %v11156_v9, 3  ;;  %v4321_v33 = vsel %vm2581_vm2, %v4319_v35, %v4320_v13  ;;  %v4414_v30 = vrot.slane %v11209_v62, 3 }
 0x39d   :  { %7433 = vrot.lane.b32.xlu0 %v7432_v17, %s7961_s3  ;;  %v4419_v58 = vsel %vm4092_vm9, %v4417_v48, %v4418_v36  ;;  %v4415_v21 = vrot.slane %v11223_v12, 3  ;;  %v7377_v22 = vpack.i.bf16 %v4321_v33, %v4318_v11  ;;  %v4420_v10 = vrot.slane %v11215_v31, 3 }
 0x39e   :  { %v4425_v24 = vsel %vm4092_vm9, %v4423_v7, %v4424_v55  ;;  %v4421_v3 = vrot.slane %v11226_v50, 3  ;;  %v4448_v18 = vrot.slane %v11500_v45, 3  ;;  %v4441_v12 = vrot.slane %v11453_v61, 3  ;;  %v11743_v50 = vpop.permute.xlu0 %7353 }
 0x39f   :  { %v7452_v56 = vpack.i.bf16 %v4425_v24, %v4419_v58  ;;  %v4416_v9 = vsel %vm4092_vm9, %v4414_v30, %v4415_v21  ;;  %v4447_v57 = vrot.slane %v11484_v37, 3  ;;  %v4328_v32 = vrot.slane %v11402_v51, 2 }
 0x3a0   :  { %7378 = vrot.lane.b32.xlu1 %v7377_v22, %s7961_s3  ;;  %v4422_v14 = vsel %vm4092_vm9, %v4420_v10, %v4421_v3  ;;  %v4329_v17 = vrot.slane %v11411_v46, 2  ;;  %v4442_v53 = vrot.slane %v11646_v5, 3  ;;  %v4331_v52 = vrot.slane %v11320_v15, 2  ;;  %v7693_v3 = vld [vmem:[#allocation2 + $0x224] ss:$16 sps:$4 sm:$0xff]  }
 0x3a1   :  { %7438 = vrot.lane.b32.xlu0 %v7437_v29, %s7965_s9  ;;  %v7387_v26 = vpack.i.bf16 %v4422_v14, %v4416_v9  ;;  %v4332_v0 = vrot.slane %v11343_v41, 2  ;;  %v4449_v38 = vsel %vm4092_vm9, %v4447_v57, %v4448_v18  ;;  %v4426_v40 = vrot.slane %v11396_v49, 3 }
 0x3a2   :  { %v4330_v20 = vsel %vm2581_vm2, %v4328_v32, %v4329_v17  ;;  %v4433_v19 = vrot.slane %v11411_v46, 3  ;;  %v4432_v47 = vrot.slane %v11402_v51, 3  ;;  %v7356_v5 = vunpack.i.h.bf16 %v11743_v50 }
 0x3a3   :  { %v4333_v60 = vsel %vm2581_vm2, %v4331_v52, %v4332_v0  ;;  %v7355_v35 = vunpack.i.l.bf16 %v11743_v50  ;;  %v4443_v23 = vsel %vm4092_vm9, %v4441_v12, %v4442_v53  ;;  %v4427_v13 = vrot.slane %v11408_v27, 3  ;;  %v7696_v52 = vld [vmem:[#allocation2 + $0x244] ss:$16 sps:$4 sm:$0xff]  }
 0x3a4   :  { %7388 = vrot.lane.b32.xlu1 %v7387_v26, %s7964_s2  ;;  %v4340_v48 = vrot.slane %v11543_v34, 2  ;;  %v4341_v46 = vrot.slane %v11552_v8, 2  ;;  %v7462_v36 = vpack.i.bf16 %v4449_v38, %v4443_v23  ;;  %v7397_v29 = vpack.i.bf16 %v4333_v60, %v4330_v20  ;;  %v7691_v26 = vld [vmem:[#allocation2 + $0x220] ss:$16 sps:$4 sm:$0xff]  }
 0x3a5   :  { %7453 = vrot.lane.b32.xlu0 %v7452_v56, %s7964_s2  ;;  %v4434_v11 = vsel %vm4092_vm9, %v4432_v47, %v4433_v19  ;;  %v4344_v55 = vrot.slane %v11500_v45, 2  ;;  %v4518_v33 = vsel %vm4285_vm10, %v11053_v43, %v7355_v35  ;;  %v4519_v27 = vsel %vm4285_vm10, %v11113_v28, %v7356_v5  ;;  %v7688_v45 = vld [vmem:[#allocation2 + $0x200] ss:$16 sps:$4 sm:$0xff]  }
 0x3a6   :  { %v4342_v7 = vsel %vm2581_vm2, %v4340_v48, %v4341_v46  ;;  %v4428_v58 = vsel %vm4092_vm9, %v4426_v40, %v4427_v13  ;;  %v4543_v30 = vpack.c.bf16 %v4519_v27, %v4518_v33  ;;  %v4438_v21 = vrot.slane %v11535_v54, 3  ;;  %v7694_v60 = vld [vmem:[#allocation2 + $0x240] ss:$16 sps:$4 sm:$0xff]   ;;  %v7699_v13 = vld [vmem:[#allocation2 + $0x264] ss:$16 sps:$4 sm:$0xff]  }
 0x3a7   :  { %v4439_v22 = vrot.slane %v11547_v39, 3  ;;  %v4343_v24 = vrot.slane %v11484_v37, 2  ;;  %v4542_v43 = vpack.c.bf16 %v11215_v31, %v11209_v62  ;;  %v4444_v10 = vrot.slane %v11543_v34, 3  ;;  %v7697_v46 = vld [vmem:[#allocation2 + $0x260] ss:$16 sps:$4 sm:$0xff]  }
 0x3a8   :  { %7398 = vrot.lane.b32.xlu1 %v7397_v29, %s7961_s3  ;;  %v4445_v28 = vrot.slane %v11552_v8, 3  ;;  %v7407_v56 = vpack.i.bf16 %v4434_v11, %v4428_v58  ;;  %5086 = vmatprep.mubr.bf16.mxu0 %v4543_v30  ;;  %v4352_v14 = vrot.slane %v11696_v25, 2  ;;  %v4353_v39 = vrot.slane %v11699_v63, 2  ;;  %v7700_v11 = vld [vmem:[#allocation2 + $0x280] ss:$16 sps:$4 sm:$0xff]  }
 0x3a9   :  { %7463 = vrot.lane.b32.xlu0 %v7462_v36, %s7964_s2  ;;  %v4440_v9 = vsel %vm4092_vm9, %v4438_v21, %v4439_v22  ;;  %v4345_v18 = vsel %vm2581_vm2, %v4343_v24, %v4344_v55  ;;  %5087 = vmatmul.mubr.bf16.vlgmr.msra.gmra.mrb[64].mxu0 %v4542_v43  ;;  %v4450_v62 = vrot.slane %v11674_v4, 3  ;;  %v4451_v31 = vrot.slane %v11682_v2, 3  ;;  %v7702_v36 = vld [vmem:[#allocation2 + $0x284] ss:$16 sps:$4 sm:$0xff]   ;;  %v7703_v58 = vld [vmem:[#allocation2 + $0x2a0] ss:$16 sps:$4 sm:$0xff]  }
 0x3aa   :  { %v4446_v12 = vsel %vm4092_vm9, %v4444_v10, %v4445_v28  ;;  %v4354_v57 = vsel %vm2581_vm2, %v4352_v14, %v4353_v39  ;;  %v4456_v32 = vrot.slane %v11696_v25, 3  ;;  %v4457_v17 = vrot.slane %v11699_v63, 3  ;;  %5128 = vmatpush1.bf16.msra.mxu0 %v7688_v45  ;;  %v7705_v55 = vld [vmem:[#allocation2 + $0x2a4] ss:$16 sps:$4 sm:$0xff]  }
 0x3ab   :  { %v7427_v8 = vpack.i.bf16 %v4446_v12, %v4440_v9  ;;  %v4452_v53 = vsel %vm4092_vm9, %v4450_v62, %v4451_v31  ;;  %5129 = vmatprep.subr.bf16.mxu0 %v7693_v3  ;;  %v7417_v0 = vpack.i.bf16 %v4345_v18, %v4342_v7  ;;  %v4435_v2 = vrot.slane %v11320_v15, 3  ;;  %v7708_v45 = vld [vmem:[#allocation2 + $0x2c4] ss:$16 sps:$4 sm:$0xff]   ;;  %v7709_v9 = vld [vmem:[#allocation2 + $0x2e0] ss:$16 sps:$4 sm:$0xff]  }
 0x3ac   :  { %7408 = vrot.lane.b32.xlu1 %v7407_v56, %s7964_s2  ;;  %v4458_v38 = vsel %vm4092_vm9, %v4456_v32, %v4457_v17  ;;  %v4436_v20 = vrot.slane %v11343_v41, 3  ;;  %v4356_v40 = vrot.slane %v11668_v44, 2  ;;  %v4552_v47 = vpack.c.bf16 %v11543_v34, %v11535_v54  ;;  %v7711_v28 = vld [vmem:[#allocation2 + $0x2e4] ss:$16 sps:$4 sm:$0xff]   ;;  %v7712_v31 = vld [vmem:[#allocation2 + $0x300] ss:$16 sps:$4 sm:$0xff]  }
 0x3ad   :  { %v7447_v19 = vpack.i.bf16 %v4458_v38, %v4452_v53  ;;  %v4355_v23 = vrot.slane %v11635_v59, 2  ;;  %v4557_v48 = vpack.c.bf16 %v11696_v25, %v11674_v4  ;;  %v4429_v7 = vrot.slane %v11275_v42, 3  ;;  %v7714_v39 = vld [vmem:[#allocation2 + $0x304] ss:$16 sps:$4 sm:$0xff]   ;;  %v7715_v32 = vld [vmem:[#allocation2 + $0x320] ss:$16 sps:$4 sm:$0xff]  }
 0x3ae   :  { %v4437_v63 = vsel %vm4092_vm9, %v4435_v2, %v4436_v20  ;;  %5130 = vmatpush1.bf16.msra.mxu0 %v7691_v26  ;;  %v4430_v33 = vrot.slane %v11608_v16, 3  ;;  %v4460_v27 = vrot.slane %v11668_v44, 3  ;;  %v4453_v21 = vrot.slane %v11582_v6, 3  ;;  %v7706_v16 = vld [vmem:[#allocation2 + $0x2c0] ss:$16 sps:$4 sm:$0xff]  }
 0x3af   :  { %5131 = vmatprep.subr.bf16.mxu0 %v7696_v52  ;;  %v4357_v41 = vsel %vm2581_vm2, %v4355_v23, %v4356_v40  ;;  %v4459_v22 = vrot.slane %v11635_v59, 3  ;;  %v4454_v43 = vrot.slane %v11686_v1, 3  ;;  %v7720_v17 = vld [vmem:[#allocation2 + $0x344] ss:$16 sps:$4 sm:$0xff]   ;;  %v7724_v52 = vld [vmem:[#allocation2 + $0x380] ss:$16 sps:$4 sm:$0xff]  }
 0x3b0   :  { %7418 = vrot.lane.b32.xlu1 %v7417_v0, %s7961_s3  ;;  %v7442_v29 = vpack.i.bf16 %v4357_v41, %v4354_v57  ;;  %v4431_v30 = vsel %vm4092_vm9, %v4429_v7, %v4430_v33  ;;  %v7717_v57 = vld [vmem:[#allocation2 + $0x324] ss:$16 sps:$4 sm:$0xff]   ;;  %v7730_v38 = vld [vmem:[#allocation2 + $0x3c0] ss:$16 sps:$4 sm:$0xff]   ;;  %vm5452_vm1 = vcmask 1047559   ;;  %vm7967_vm2 = vmmov 0  }
 0x3b1   :  { %v7457_v24 = vpack.i.bf16 %v4437_v63, %v4431_v30  ;;  %v4461_v10 = vsel %vm4092_vm9, %v4459_v22, %v4460_v27  ;;  %v4455_v44 = vsel %vm4092_vm9, %v4453_v21, %v4454_v43  ;;  %v7723_v26 = vld [vmem:[#allocation2 + $0x364] ss:$16 sps:$4 sm:$0xff]   ;;  %v7733_v20 = vld [vmem:[#allocation2 + $0x3e0] ss:$16 sps:$4 sm:$0xff]  }
 0x3b2   :  { %5132 = vmatpush1.bf16.msra.mxu0 %v7694_v60  ;;  %v7467_v3 = vpack.i.bf16 %v4461_v10, %v4455_v44  ;;  %v7726_v53 = vld [vmem:[#allocation2 + $0x384] ss:$16 sps:$4 sm:$0xff]  }
 0x3b3   :  { %5133 = vmatprep.subr.bf16.mxu0 %v7699_v13  ;;  %v7732_v0 = vld [vmem:[#allocation2 + $0x3c4] ss:$16 sps:$4 sm:$0xff]  }
 0x3b4   :  { %7428 = vrot.lane.b32.xlu1 %v7427_v8, %s7964_s2  ;;  %v4547_v8 = vpack.c.bf16 %v11402_v51, %v11396_v49  ;;  %v7729_v49 = vld [vmem:[#allocation2 + $0x3a4] ss:$16 sps:$4 sm:$0xff]   ;;  %v7727_v51 = vld [vmem:[#allocation2 + $0x3a0] ss:$16 sps:$4 sm:$0xff]  }
 0x3b5   :  { %v7735_v2 = vld [vmem:[#allocation2 + $0x3e4] ss:$16 sps:$4 sm:$0xff]  }
 0x3b6   :  { %5134 = vmatpush1.bf16.msra.mxu0 %v7697_v46  ;;  %v7738_v40 = vld [vmem:[#allocation2 + $0x404] ss:$16 sps:$4 sm:$0xff]  }
 0x3b7   :  { %5135 = vmatprep.subr.bf16.mxu0 %v7702_v36 }
 0x3b8   :  { %7443 = vrot.lane.b32.xlu1 %v7442_v29, %s7961_s3 }
 0x3ba   :  { %5136 = vmatpush1.bf16.msra.mxu0 %v7700_v11 }
 0x3bb   :  { %5137 = vmatprep.subr.bf16.mxu0 %v7705_v55 }
 0x3bc   :  { %7448 = vrot.lane.b32.xlu1 %v7447_v19, %s7964_s2 }
 0x3be   :  { %5138 = vmatpush1.bf16.msra.mxu0 %v7703_v58 }
 0x3bf   :  { %5139 = vmatprep.subr.bf16.mxu0 %v7708_v45 }
 0x3c0   :  { %7458 = vrot.lane.b32.xlu1 %v7457_v24, %s7964_s2 }
 0x3c1   :  { %v11821_v56 = vpop.permute.xlu1 %7358 }
 0x3c2   :  { %5140 = vmatpush1.bf16.msra.mxu0 %v7706_v16  ;;  %v7361_v14 = vunpack.i.h.bf16 %v11821_v56  ;;  %v7360_v1 = vunpack.i.l.bf16 %v11821_v56  ;;  %v7744_v56 = vld [vmem:[#allocation2 + $0x444] ss:$16 sps:$4 sm:$0xff]  }
 0x3c3   :  { %5141 = vmatprep.subr.bf16.mxu0 %v7711_v28 }
 0x3c4   :  { %7468 = vrot.lane.b32.xlu1 %v7467_v3, %s7964_s2  ;;  %v4520_v18 = vsel %vm4285_vm10, %v11275_v42, %v7360_v1  ;;  %v4521_v12 = vsel %vm4285_vm10, %v11320_v15, %v7361_v14  ;;  %v7718_v42 = vld [vmem:[#allocation2 + $0x340] ss:$16 sps:$4 sm:$0xff]  }
 0x3c5   :  { %v4548_v62 = vpack.c.bf16 %v4521_v12, %v4520_v18  ;;  %v7721_v15 = vld [vmem:[#allocation2 + $0x360] ss:$16 sps:$4 sm:$0xff]  }
 0x3c6   :  { %5142 = vmatpush1.bf16.msra.mxu0 %v7709_v9 }
 0x3c7   :  { %5143 = vmatprep.subr.bf16.mxu0 %v7714_v39  ;;  %5096 = vmatprep.mubr.bf16.mxu0 %v4548_v62  ;;  %v7736_v39 = vld [vmem:[#allocation2 + $0x400] ss:$16 sps:$4 sm:$0xff]  }
 0x3c8   :  { %5097 = vmatmul.mubr.bf16.gmra.mrb[68].mxu0 %v4547_v8 }
 0x3ca   :  { %5144 = vmatpush1.bf16.msra.mxu0 %v7712_v31  ;;  %v7741_v31 = vld [vmem:[#allocation2 + $0x424] ss:$16 sps:$4 sm:$0xff]  }
 0x3cb   :  { %5145 = vmatprep.subr.bf16.mxu0 %v7717_v57 }
 0x3ce   :  { %5146 = vmatpush1.bf16.msra.mxu0 %v7715_v32 }
 0x3cf   :  { %5147 = vmatprep.subr.bf16.mxu0 %v7720_v17 }
 0x3d2   :  { %5148 = vmatpush1.bf16.msra.mxu0 %v7718_v42 }
 0x3d3   :  { %5149 = vmatprep.subr.bf16.mxu0 %v7723_v26 }
 0x3d6   :  { %5150 = vmatpush1.bf16.msra.mxu0 %v7721_v15  ;;  %v7739_v15 = vld [vmem:[#allocation2 + $0x420] ss:$16 sps:$4 sm:$0xff]  }
 0x3d7   :  { %5151 = vmatprep.subr.bf16.mxu0 %v7726_v53 }
 0x3da   :  { %5152 = vmatpush1.bf16.msra.mxu0 %v7724_v52 }
 0x3db   :  { %5153 = vmatprep.subr.bf16.mxu0 %v7729_v49 }
 0x3de   :  { %5154 = vmatpush1.bf16.msra.mxu0 %v7727_v51 }
 0x3df   :  { %5155 = vmatprep.subr.bf16.mxu0 %v7732_v0 }
 0x3e2   :  { %5156 = vmatpush1.bf16.msra.mxu0 %v7730_v38 }
 0x3e3   :  { %5157 = vmatprep.subr.bf16.mxu0 %v7735_v2 }
 0x3e6   :  { %5158 = vmatpush1.bf16.msra.mxu0 %v7733_v20 }
 0x3e7   :  { %5200 = vmatprep.subr.bf16.mxu0 %v7738_v40 }
 0x3ea   :  { %v11835_v19 = vpop.permute.xlu0 %7363 }
 0x3eb   :  { %v7366_v63 = vunpack.i.h.bf16 %v11835_v19  ;;  %v7365_v60 = vunpack.i.l.bf16 %v11835_v19 }
 0x3ed   :  { %v4522_v23 = vsel %vm4285_vm10, %v11453_v61, %v7365_v60  ;;  %v4523_v13 = vsel %vm4285_vm10, %v11484_v37, %v7366_v63 }
 0x3ee   :  { %v4553_v41 = vpack.c.bf16 %v4523_v13, %v4522_v23  ;;  %v7742_v23 = vld [vmem:[#allocation2 + $0x440] ss:$16 sps:$4 sm:$0xff]  }
 0x3f0   :  { %5106 = vmatprep.mubr.bf16.mxu0 %v4553_v41 }
 0x3f1   :  { %5107 = vmatmul.mubr.bf16.gmra.mrb[72].mxu0 %v4552_v47 }
 0x3f2   :  { %v7369_v46 = vpop.permute.xlu0 %7368 }
 0x3f3   :  { %v7371_v58 = vunpack.i.h.bf16 %v7369_v46  ;;  %v7370_v30 = vunpack.i.l.bf16 %v7369_v46  ;;  %v7747_v46 = vld [vmem:[#allocation2 + $0x464] ss:$16 sps:$4 sm:$0xff]  }
 0x3f5   :  { %v4390_v4 = vsel %vm3575_vm4, %v7370_v30, %v7371_v58 }
 0x3f7   :  { %v7384_v36 = vpop.permute.xlu0 %7383 }
 0x3f8   :  { %v7386_v33 = vunpack.i.h.bf16 %v7384_v36  ;;  %v7385_v27 = vunpack.i.l.bf16 %v7384_v36 }
 0x3fa   :  { %v4287_v43 = vsel %vm4285_vm10, %v7356_v5, %v7386_v33 }
 0x3fd   :  { %v7394_v29 = vpop.permute.xlu0 %7393 }
 0x3fe   :  { %v7395_v18 = vunpack.i.l.bf16 %v7394_v29  ;;  %v7396_v8 = vunpack.i.h.bf16 %v7394_v29 }
 0x403   :  { %v7404_v55 = vpop.permute.xlu0 %7403 }
 0x404   :  { %v7405_v45 = vunpack.i.l.bf16 %v7404_v55  ;;  %v7406_v25 = vunpack.i.h.bf16 %v7404_v55 }
 0x406   :  { %v4288_v5 = vsel %vm4285_vm10, %v7360_v1, %v7405_v45  ;;  %v4289_v57 = vsel %vm4285_vm10, %v7361_v14, %v7406_v25  ;;  %v4392_v14 = vsel %vm3575_vm4, %v7395_v18, %v7396_v8  ;;  %v7756_v8 = vld [vmem:[#allocation2 + $0x4c4] ss:$16 sps:$4 sm:$0xff]  }
 0x407   :  { %v4528_v1 = vsel %vm3575_vm4, %v4288_v5, %v7395_v18 }
 0x40e   :  { %v11850_v11 = vpop.permute.xlu1 %7373 }
 0x40f   :  { %v7376_v7 = vunpack.i.h.bf16 %v11850_v11  ;;  %v7375_v61 = vunpack.i.l.bf16 %v11850_v11 }
 0x411   :  { %v4524_v37 = vsel %vm4285_vm10, %v11582_v6, %v7375_v61  ;;  %v4525_v54 = vsel %vm4285_vm10, %v11635_v59, %v7376_v7  ;;  %v11865_v6 = vpop.permute.xlu0 %7413  ;;  %v4286_v59 = vsel %vm4285_vm10, %v7355_v35, %v7385_v27 }
 0x412   :  { %v7379_v34 = vpop.permute.xlu1 %7378  ;;  %v4558_v47 = vpack.c.bf16 %v4525_v54, %v4524_v37  ;;  %v4526_v35 = vsel %vm3575_vm4, %v4286_v59, %v7370_v30  ;;  %v7416_v36 = vunpack.i.h.bf16 %v11865_v6  ;;  %v7415_v29 = vunpack.i.l.bf16 %v11865_v6  ;;  %v7750_v30 = vld [vmem:[#allocation2 + $0x484] ss:$16 sps:$4 sm:$0xff]  }
 0x413   :  { %v7381_v21 = vunpack.i.h.bf16 %v7379_v34  ;;  %v7380_v22 = vunpack.i.l.bf16 %v7379_v34  ;;  %v7745_v34 = vld [vmem:[#allocation2 + $0x460] ss:$16 sps:$4 sm:$0xff]  }
 0x414   :  { %5116 = vmatprep.mubr.bf16.mxu0 %v4558_v47 }
 0x415   :  { %5117 = vmatmul.mubr.bf16.gmra.mrb[76].mxu0 %v4557_v48  ;;  %v4391_v48 = vsel %vm3575_vm4, %v7380_v22, %v7381_v21  ;;  %v4527_v44 = vsel %vm3575_vm4, %v4287_v43, %v7380_v22  ;;  %v7424_v32 = vpop.permute.xlu0 %7423  ;;  %v4394_v21 = vsel %vm3575_vm4, %v7415_v29, %v7416_v36 }
 0x416   :  { %v11867_v24 = vpop.permute.xlu1 %7388  ;;  %v4544_v12 = vpack.c.bf16 %v4527_v44, %v4526_v35  ;;  %v7426_v13 = vunpack.i.h.bf16 %v7424_v32  ;;  %v7425_v41 = vunpack.i.l.bf16 %v7424_v32 }
 0x417   :  { %v7391_v10 = vunpack.i.h.bf16 %v11867_v24  ;;  %v7390_v16 = vunpack.i.l.bf16 %v11867_v24 }
 0x418   :  { %v4290_v47 = vsel %vm4285_vm10, %v7365_v60, %v7425_v41  ;;  %v4291_v33 = vsel %vm4285_vm10, %v7366_v63, %v7426_v13 }
 0x419   :  { %v4534_v28 = vsel %vm3254_vm3, %v4390_v4, %v7390_v16  ;;  %v4535_v50 = vsel %vm3254_vm3, %v4391_v48, %v7391_v10  ;;  %v11907_v2 = vpop.permute.xlu0 %7433  ;;  %v4530_v43 = vsel %vm3575_vm4, %v4290_v47, %v7415_v29  ;;  %v7748_v4 = vld [vmem:[#allocation2 + $0x480] ss:$16 sps:$4 sm:$0xff]  }
 0x41a   :  { %v7399_v3 = vpop.permute.xlu1 %7398  ;;  %v4545_v9 = vpack.c.bf16 %v4535_v50, %v4534_v28  ;;  %v7753_v28 = vld [vmem:[#allocation2 + $0x4a4] ss:$16 sps:$4 sm:$0xff]   ;;  %v7436_v50 = vunpack.i.h.bf16 %v11907_v2  ;;  %v7435_v5 = vunpack.i.l.bf16 %v11907_v2 }
 0x41b   :  { %v7400_v62 = vunpack.i.l.bf16 %v7399_v3  ;;  %v7401_v17 = vunpack.i.h.bf16 %v7399_v3 }
 0x41c   :  { %5159 = vmatprep.mubr.bf16.mxu0 %v4545_v9 }
 0x41d   :  { %5160 = vmatmul.mubr.bf16.vlgmr.msra.gmra.mrb[64].mxu0 %v4544_v12  ;;  %v4529_v42 = vsel %vm3575_vm4, %v4289_v57, %v7400_v62  ;;  %v4393_v51 = vsel %vm3575_vm4, %v7400_v62, %v7401_v17  ;;  %v7439_v22 = vpop.permute.xlu0 %7438  ;;  %v4396_v57 = vsel %vm3575_vm4, %v7435_v5, %v7436_v50  ;;  %v12918_v50 = vld [vmem:[#allocation11_spill] sm:$0xff] }
 0x41e   :  { %v11895_v26 = vpop.permute.xlu1 %7408  ;;  %5201 = vmatpush1.bf16.msra.mxu0 %v7736_v39  ;;  %v4549_v53 = vpack.c.bf16 %v4529_v42, %v4528_v1  ;;  %v7441_v25 = vunpack.i.h.bf16 %v7439_v22  ;;  %v7440_v48 = vunpack.i.l.bf16 %v7439_v22  ;;  %v7751_v39 = vld [vmem:[#allocation2 + $0x4a0] ss:$16 sps:$4 sm:$0xff]  }
 0x41f   :  { %v7411_v52 = vunpack.i.h.bf16 %v11895_v26  ;;  %v7410_v49 = vunpack.i.l.bf16 %v11895_v26  ;;  %5202 = vmatprep.subr.bf16.mxu0 %v7741_v31  ;;  %v7762_v22 = vld [vmem:[#allocation4 + $0x4] ss:$12 sps:$4 sm:$0xff]  }
 0x420   :  { %v4293_v18 = vsel %vm4285_vm10, %v7376_v7, %v7441_v25  ;;  %v4292_v12 = vsel %vm4285_vm10, %v7375_v61, %v7440_v48  ;;  %5698 = vmatprep.subr.bf16.mxu1 %v7762_v22  ;;  %v7778_v25 = vld [vmem:[#allocation4 + $0x90] ss:$12 sps:$4 sm:$0xff]   ;;  %v4642_v48 = vld [vmem:[%s12202_s4] sm:$0xf] }
 0x421   :  { %v4536_v0 = vsel %vm3254_vm3, %v4392_v14, %v7410_v49  ;;  %v4537_v38 = vsel %vm3254_vm3, %v4393_v51, %v7411_v52  ;;  %v4532_v11 = vsel %vm3575_vm4, %v4292_v12, %v7435_v5  ;;  %v7454_v61 = vpop.permute.xlu0 %7453  ;;  %v11976_v5 = vrot.slane %v4642_v48, %v12918_v50 }
 0x422   :  { %v7419_v20 = vpop.permute.xlu1 %7418  ;;  %5203 = vmatpush1.bf16.msra.mxu0 %v7739_v15  ;;  %v4550_v40 = vpack.c.bf16 %v4537_v38, %v4536_v0  ;;  %v7754_v15 = vld [vmem:[#allocation2 + $0x4c0] ss:$16 sps:$4 sm:$0xff]   ;;  %v7456_v14 = vunpack.i.h.bf16 %v7454_v61  ;;  %v7455_v51 = vunpack.i.l.bf16 %v7454_v61  ;;  %v12916_v38 = vmov 0  }
 0x423   :  { %5204 = vmatprep.subr.bf16.mxu0 %v7744_v56  ;;  %v7421_v55 = vunpack.i.h.bf16 %v7419_v20  ;;  %v7420_v37 = vunpack.i.l.bf16 %v7419_v20  ;;  %v7759_v56 = vld [vmem:[#allocation2 + $0x4e4] ss:$16 sps:$4 sm:$0xff]   ;;  %v7757_v0 = vld [vmem:[#allocation2 + $0x4e0] ss:$16 sps:$4 sm:$0xff]  }
 0x424   :  { %5169 = vmatprep.mubr.bf16.mxu0 %v4550_v40  ;;  %v4494_v2 = vsel %vm3254_vm3, %v7390_v16, %v7455_v51  ;;  %v4495_v20 = vsel %vm3254_vm3, %v7391_v10, %v7456_v14 }
 0x425   :  { %5170 = vmatmul.mubr.bf16.gmra.mrb[68].mxu0 %v4549_v53  ;;  %v4395_v45 = vsel %vm3575_vm4, %v7420_v37, %v7421_v55  ;;  %v4531_v6 = vsel %vm3575_vm4, %v4291_v33, %v7420_v37  ;;  %v7464_v36 = vpop.permute.xlu0 %7463 }
 0x426   :  { %v11911_v54 = vpop.permute.xlu1 %7428  ;;  %5205 = vmatpush1.bf16.msra.mxu0 %v7742_v23  ;;  %v4554_v44 = vpack.c.bf16 %v4531_v6, %v4530_v43  ;;  %v4546_v23 = vpack.c.bf16 %v4495_v20, %v4494_v2  ;;  %v7466_v10 = vunpack.i.h.bf16 %v7464_v36  ;;  %v7465_v29 = vunpack.i.l.bf16 %v7464_v36  ;;  %v7771_v6 = vld [vmem:[#allocation4 + $0x4c] ss:$12 sps:$4 sm:$0xff]  }
 0x427   :  { %v7431_v27 = vunpack.i.h.bf16 %v11911_v54  ;;  %v7430_v58 = vunpack.i.l.bf16 %v11911_v54  ;;  %5206 = vmatprep.subr.bf16.mxu0 %v7747_v46  ;;  %v7763_v54 = vld [vmem:[#allocation4 + $0x18] ss:$12 sps:$4 sm:$0xff]  }
 0x428   :  { %v7775_v43 = vld [vmem:[#allocation4 + $0x78] ss:$12 sps:$4 sm:$0xff]  }
 0x429   :  { %v4538_v60 = vsel %vm3254_vm3, %v4394_v21, %v7430_v58  ;;  %v4539_v19 = vsel %vm3254_vm3, %v4395_v45, %v7431_v27  ;;  %v4498_v55 = vsel %vm3254_vm3, %v7430_v58, %v7465_v29  ;;  %v4499_v37 = vsel %vm3254_vm3, %v7431_v27, %v7466_v10  ;;  %v7760_v21 = vld [vmem:[#allocation4] ss:$12 sps:$4 sm:$0xff]   ;;  %v7765_v58 = vld [vmem:[#allocation4 + $0x1c] ss:$12 sps:$4 sm:$0xff]  }
 0x42a   :  { %v7444_v63 = vpop.permute.xlu1 %7443  ;;  %5207 = vmatpush1.bf16.msra.mxu0 %v7745_v34  ;;  %v4555_v59 = vpack.c.bf16 %v4539_v19, %v4538_v60  ;;  %v4556_v34 = vpack.c.bf16 %v4499_v37, %v4498_v55  ;;  %5699 = vmatpush1.bf16.msra.mxu1 %v7760_v21  ;;  %v7768_v27 = vld [vmem:[#allocation4 + $0x34] ss:$12 sps:$4 sm:$0xff]   ;;  %v7766_v45 = vld [vmem:[#allocation4 + $0x30] ss:$12 sps:$4 sm:$0xff]  }
 0x42b   :  { %5208 = vmatprep.subr.bf16.mxu0 %v7750_v30  ;;  %v7446_v35 = vunpack.i.h.bf16 %v7444_v63  ;;  %v7445_v3 = vunpack.i.l.bf16 %v7444_v63  ;;  %5700 = vmatprep.subr.bf16.mxu1 %v7765_v58  ;;  %v7769_v60 = vld [vmem:[#allocation4 + $0x48] ss:$12 sps:$4 sm:$0xff]   ;;  %v7774_v19 = vld [vmem:[#allocation4 + $0x64] ss:$12 sps:$4 sm:$0xff]   ;;  %v7772_v63 = vld [vmem:[#allocation4 + $0x60] ss:$12 sps:$4 sm:$0xff]  }
 0x42c   :  { %5179 = vmatprep.mubr.bf16.mxu0 %v4555_v59  ;;  %v7777_v59 = vld [vmem:[#allocation4 + $0x7c] ss:$12 sps:$4 sm:$0xff]  }
 0x42d   :  { %5180 = vmatmul.mubr.bf16.gmra.mrb[72].mxu0 %v4554_v44  ;;  %v4397_v32 = vsel %vm3575_vm4, %v7445_v3, %v7446_v35  ;;  %v4533_v17 = vsel %vm3575_vm4, %v4293_v18, %v7445_v3  ;;  %v12917_v44 = vld [vmem:[#allocation10_spill] sm:$0xff] }
 0x42e   :  { %v7449_v9 = vpop.permute.xlu1 %7448  ;;  %5209 = vmatpush1.bf16.msra.mxu0 %v7748_v4  ;;  %v4559_v53 = vpack.c.bf16 %v4533_v17, %v4532_v11  ;;  %5701 = vmatpush1.bf16.msra.mxu1 %v7763_v54  ;;  %v7780_v4 = vld [vmem:[#allocation4 + $0x94] ss:$12 sps:$4 sm:$0xff]  }
 0x42f   :  { %v7451_v62 = vunpack.i.h.bf16 %v7449_v9  ;;  %v7450_v31 = vunpack.i.l.bf16 %v7449_v9  ;;  %5210 = vmatprep.subr.bf16.mxu0 %v7753_v28  ;;  %5702 = vmatprep.subr.bf16.mxu1 %v7768_v27  ;;  %v11973_v28 = vrot.slane %v4642_v48, %v12917_v44 }
 0x431   :  { %v4540_v1 = vsel %vm3254_vm3, %v4396_v57, %v7450_v31  ;;  %v4541_v42 = vsel %vm3254_vm3, %v4397_v32, %v7451_v62 }
 0x432   :  { %5211 = vmatpush1.bf16.msra.mxu0 %v7751_v39  ;;  %v4560_v7 = vpack.c.bf16 %v4541_v42, %v4540_v1  ;;  %v7459_v40 = vpop.permute.xlu1 %7458  ;;  %5703 = vmatpush1.bf16.msra.mxu1 %v7766_v45 }
 0x433   :  { %5212 = vmatprep.subr.bf16.mxu0 %v7756_v8  ;;  %v7461_v13 = vunpack.i.h.bf16 %v7459_v40  ;;  %v7460_v41 = vunpack.i.l.bf16 %v7459_v40  ;;  %5704 = vmatprep.subr.bf16.mxu1 %v7771_v6 }
 0x434   :  { %5189 = vmatprep.mubr.bf16.mxu0 %v4560_v7 }
 0x435   :  { %5190 = vmatmul.mubr.bf16.gmra.mrb[76].mxu0 %v4559_v53  ;;  %v4496_v46 = vsel %vm3254_vm3, %v7410_v49, %v7460_v41  ;;  %v4497_v16 = vsel %vm3254_vm3, %v7411_v52, %v7461_v13 }
 0x436   :  { %5213 = vmatpush1.bf16.msra.mxu0 %v7754_v15  ;;  %5232 = vmatprep.mubr.bf16.mxu0 %v12916_v38  ;;  %v4551_v24 = vpack.c.bf16 %v4497_v16, %v4496_v46  ;;  %v7469_v49 = vpop.permute.xlu1 %7468 }
 0x437   :  { %5214 = vmatprep.subr.bf16.mxu0 %v7759_v56  ;;  %v7471_v26 = vunpack.i.h.bf16 %v7469_v49  ;;  %v7470_v47 = vunpack.i.l.bf16 %v7469_v49  ;;  %5705 = vmatpush1.bf16.msra.mxu1 %v7769_v60 }
 0x438   :  { %5706 = vmatprep.subr.bf16.mxu1 %v7774_v19 }
 0x439   :  { %v4500_v52 = vsel %vm3254_vm3, %v7450_v31, %v7470_v47  ;;  %v4501_v33 = vsel %vm3254_vm3, %v7451_v62, %v7471_v26 }
 0x43a   :  { %5215 = vmatpush1.bf16.msra.mxu0 %v7757_v0  ;;  %v4561_v30 = vpack.c.bf16 %v4501_v33, %v4500_v52 }
 0x43b   :  { %5707 = vmatpush1.bf16.msra.mxu1 %v7772_v63 }
 0x43c   :  { %5708 = vmatprep.subr.bf16.mxu1 %v7777_v59 }
 0x43d   :  { %5233 = vmatmul.mubr.bf16.vlgmr.msra.gmra.mrb[64].mxu0 %v4546_v23 }
 0x43e   :  { %5242 = vmatprep.mubr.bf16.mxu0 %v12916_v38 }
 0x43f   :  { %5709 = vmatpush1.bf16.msra.mxu1 %v7775_v43 }
 0x440   :  { %5710 = vmatprep.subr.bf16.mxu1 %v7780_v4 }
 0x443   :  { %5711 = vmatpush1.bf16.msra.mxu1 %v7778_v25 }
 0x445   :  { %5243 = vmatmul.mubr.bf16.gmra.mrb[68].mxu0 %v4551_v24 }
 0x446   :  { %5252 = vmatprep.mubr.bf16.mxu0 %v12916_v38 }
 0x44d   :  { %5253 = vmatmul.mubr.bf16.gmra.mrb[72].mxu0 %v4556_v34 }
 0x44e   :  { %5262 = vmatprep.mubr.bf16.mxu0 %v12916_v38 }
 0x455   :  { %5263 = vmatmul.mubr.bf16.gmra.mrb[76].mxu0 %v4561_v30 }
 0x510   :  { %v5234_v35 = vpop.f32.mrb[64].mxu0 }
 0x511   :  { %v6836_v3 = vadd.f32 %v5234_v35, %v11973_v28  ;;  %v5236_v9 = vpop.f32.mrb[65].mxu0 }
 0x512   :  { %v6837_v39 = vadd.f32 %v5236_v9, %v11976_v5  ;;  %v5238_v18 = vpop.f32.mrb[66].mxu0 }
 0x513   :  { %v5273_v12 = vmax.f32 %v6836_v3, 0.0  ;;  %v6838_v62 = vadd.f32 %v5238_v18, %v11973_v28  ;;  %v5240_v31 = vpop.f32.mrb[67].mxu0 }
 0x514   :  { %v5274_v8 = vmax.f32 %v6837_v39, 0.0  ;;  %v6839_v57 = vadd.f32 %v5240_v31, %v11976_v5 }
 0x515   :  { %v5305_v32 = vrot.slane %v5273_v12, 1  ;;  %v5275_v17 = vmax.f32 %v6838_v62, 0.0 }
 0x516   :  { %v5306_v1 = vrot.slane %v5274_v8, 1  ;;  %v5276_v42 = vmax.f32 %v6839_v57, 0.0 }
 0x517   :  { %v5337_v7 = vmax.f32 %v5273_v12, %v5305_v32  ;;  %v5307_v11 = vrot.slane %v5275_v17, 1 }
 0x518   :  { %v5338_v15 = vmax.f32 %v5274_v8, %v5306_v1  ;;  %v5308_v61 = vrot.slane %v5276_v42, 1  ;;  %v5244_v53 = vpop.f32.mrb[68].mxu0 }
 0x519   :  { %v5369_v56 = vrot.slane %v5337_v7, 2  ;;  %v5339_v14 = vmax.f32 %v5275_v17, %v5307_v11  ;;  %v6840_v51 = vadd.f32 %v5244_v53, %v11973_v28  ;;  %v5246_v0 = vpop.f32.mrb[69].mxu0 }
 0x51a   :  { %v5370_v2 = vrot.slane %v5338_v15, 2  ;;  %v5340_v20 = vmax.f32 %v5276_v42, %v5308_v61  ;;  %v6841_v40 = vadd.f32 %v5246_v0, %v11976_v5  ;;  %v5248_v23 = vpop.f32.mrb[70].mxu0 }
 0x51b   :  { %v5401_v13 = vmax.f32 %v5337_v7, %v5369_v56  ;;  %v5371_v41 = vrot.slane %v5339_v14, 2  ;;  %v5277_v46 = vmax.f32 %v6840_v51, 0.0  ;;  %v6842_v16 = vadd.f32 %v5248_v23, %v11973_v28  ;;  %v5250_v36 = vpop.f32.mrb[71].mxu0 }
 0x51c   :  { %v5402_v24 = vmax.f32 %v5338_v15, %v5370_v2  ;;  %v5372_v10 = vrot.slane %v5340_v20, 2  ;;  %v5278_v29 = vmax.f32 %v6841_v40, 0.0  ;;  %v6843_v55 = vadd.f32 %v5250_v36, %v11976_v5 }
 0x51d   :  { %v5403_v37 = vmax.f32 %v5339_v14, %v5371_v41  ;;  %v5309_v49 = vrot.slane %v5277_v46, 1  ;;  %v5279_v34 = vmax.f32 %v6842_v16, 0.0 }
 0x51e   :  { %v11986_v26 = vmax.f32 %v5401_v13, %v5402_v24  ;;  %v5404_v47 = vmax.f32 %v5340_v20, %v5372_v10  ;;  %v5310_v52 = vrot.slane %v5278_v29, 1  ;;  %v5280_v33 = vmax.f32 %v6843_v55, 0.0 }
 0x51f   :  { %v5341_v30 = vmax.f32 %v5277_v46, %v5309_v49  ;;  %v5311_v21 = vrot.slane %v5279_v34, 1 }
 0x520   :  { %v11988_v22 = vmax.f32 %v5403_v37, %v5404_v47  ;;  %v5342_v58 = vmax.f32 %v5278_v29, %v5310_v52  ;;  %v5312_v54 = vrot.slane %v5280_v33, 1  ;;  %v5254_v27 = vpop.f32.mrb[72].mxu0 }
 0x521   :  { %v5373_v45 = vrot.slane %v5341_v30, 2  ;;  %v5343_v6 = vmax.f32 %v5279_v34, %v5311_v21  ;;  %v6844_v60 = vadd.f32 %v5254_v27, %v11973_v28  ;;  %v5256_v19 = vpop.f32.mrb[73].mxu0 }
 0x522   :  { %v5374_v63 = vrot.slane %v5342_v58, 2  ;;  %v5344_v59 = vmax.f32 %v5280_v33, %v5312_v54  ;;  %v6845_v43 = vadd.f32 %v5256_v19, %v11976_v5  ;;  %v5258_v4 = vpop.f32.mrb[74].mxu0  ;;  %v5433_v20 = vrot.slane %v11988_v22, 7 }
 0x523   :  { %v5405_v25 = vmax.f32 %v5341_v30, %v5373_v45  ;;  %v5375_v48 = vrot.slane %v5343_v6, 2  ;;  %v5281_v35 = vmax.f32 %v6844_v60, 0.0  ;;  %v6846_v3 = vadd.f32 %v5258_v4, %v11973_v28  ;;  %v5260_v9 = vpop.f32.mrb[75].mxu0 }
 0x524   :  { %v5406_v39 = vmax.f32 %v5342_v58, %v5374_v63  ;;  %v5376_v18 = vrot.slane %v5344_v59, 2  ;;  %v5282_v12 = vmax.f32 %v6845_v43, 0.0  ;;  %v6847_v57 = vadd.f32 %v5260_v9, %v11976_v5 }
 0x525   :  { %v5407_v62 = vmax.f32 %v5343_v6, %v5375_v48  ;;  %v5313_v31 = vrot.slane %v5281_v35, 1  ;;  %v5283_v8 = vmax.f32 %v6846_v3, 0.0  ;;  %v5435_v45 = vsel %vm5434_vm11, %v5433_v20, %v11986_v26 }
 0x526   :  { %v11994_v32 = vmax.f32 %v5405_v25, %v5406_v39  ;;  %v5408_v17 = vmax.f32 %v5344_v59, %v5376_v18  ;;  %v5314_v1 = vrot.slane %v5282_v12, 1  ;;  %v5284_v11 = vmax.f32 %v6847_v57, 0.0 }
 0x527   :  { %v5345_v42 = vmax.f32 %v5281_v35, %v5313_v31  ;;  %v5315_v7 = vrot.slane %v5283_v8, 1 }
 0x528   :  { %v11996_v15 = vmax.f32 %v5407_v62, %v5408_v17  ;;  %v5346_v61 = vmax.f32 %v5282_v12, %v5314_v1  ;;  %v5264_v53 = vpop.f32.mrb[76].mxu0  ;;  %v5316_v51 = vrot.slane %v5284_v11, 1  ;;  %v5436_v49 = vrot.slane %v11994_v32, 6 }
 0x529   :  { %v5377_v56 = vrot.slane %v5345_v42, 2  ;;  %v5347_v14 = vmax.f32 %v5283_v8, %v5315_v7  ;;  %v6848_v0 = vadd.f32 %v5264_v53, %v11973_v28  ;;  %v5266_v2 = vpop.f32.mrb[77].mxu0  ;;  %v7783_v53 = vld [vmem:[#allocation4 + $0xac] ss:$12 sps:$4 sm:$0xff]  }
 0x52a   :  { %v5378_v40 = vrot.slane %v5346_v61, 2  ;;  %v6849_v23 = vadd.f32 %v5266_v2, %v11976_v5  ;;  %v5268_v13 = vpop.f32.mrb[78].mxu0  ;;  %v5348_v16 = vmax.f32 %v5284_v11, %v5316_v51  ;;  %v5438_v59 = vsel %vm5437_vm12, %v5436_v49, %v5435_v45  ;;  %5712 = vmatprep.subr.bf16.mxu1 %v7783_v53  ;;  %v7795_v53 = vld [vmem:[%s12205_s7 + $0x10] ss:$8 sps:$4 sm:$0xff]  }
 0x52b   :  { %v5409_v41 = vmax.f32 %v5345_v42, %v5377_v56  ;;  %v5379_v46 = vrot.slane %v5347_v14, 2  ;;  %v5285_v36 = vmax.f32 %v6848_v0, 0.0  ;;  %v5270_v24 = vpop.f32.mrb[79].mxu0  ;;  %v6850_v55 = vadd.f32 %v5268_v13, %v11973_v28 }
 0x52c   :  { %v5410_v10 = vmax.f32 %v5346_v61, %v5378_v40  ;;  %v5286_v29 = vmax.f32 %v6849_v23, 0.0  ;;  %v6851_v37 = vadd.f32 %v5270_v24, %v11976_v5  ;;  %v5380_v47 = vrot.slane %v5348_v16, 2  ;;  %v7781_v61 = vld [vmem:[#allocation4 + $0xa8] ss:$12 sps:$4 sm:$0xff]  }
 0x52d   :  { %v5411_v34 = vmax.f32 %v5347_v14, %v5379_v46  ;;  %v5317_v52 = vrot.slane %v5285_v36, 1  ;;  %v5287_v21 = vmax.f32 %v6850_v55, 0.0  ;;  %v5439_v5 = vrot.slane %v11996_v15, 5  ;;  %5713 = vmatpush1.bf16.msra.mxu1 %v7781_v61  ;;  %v7797_v61 = vld [vmem:[%s12205_s7 + $0x14] ss:$8 sps:$4 sm:$0xff]  }
 0x52e   :  { %v5421_v33 = vmax.f32 %v5409_v41, %v5410_v10  ;;  %v5318_v30 = vrot.slane %v5286_v29, 1  ;;  %v5288_v58 = vmax.f32 %v6851_v37, 0.0  ;;  %v5412_v54 = vmax.f32 %v5348_v16, %v5380_v47 }
 0x52f   :  { %v5349_v27 = vmax.f32 %v5285_v36, %v5317_v52  ;;  %v5319_v60 = vrot.slane %v5287_v21, 1  ;;  %v5441_v12 = vsel %vm5440_vm13, %v5439_v5, %v5438_v59  ;;  %v7966_v14 = vmov 0.0  }
 0x530   :  { %v5350_v6 = vmax.f32 %v5286_v29, %v5318_v30  ;;  %v5320_v28 = vrot.slane %v5288_v58, 1  ;;  %v5422_v19 = vmax.f32 %v5411_v34, %v5412_v54  ;;  %v5442_v43 = vrot.slane %v5421_v33, 4  ;;  %6688 = vmatprep.subr.bf16.mxu1 %v7966_v14 }
 0x531   :  { %v5381_v63 = vrot.slane %v5349_v27, 2  ;;  %v5351_v25 = vmax.f32 %v5287_v21, %v5319_v60 }
 0x532   :  { %v5382_v4 = vrot.slane %v5350_v6, 2  ;;  %v5352_v48 = vmax.f32 %v5288_v58, %v5320_v28  ;;  %v5445_v18 = vrot.slane %v5422_v19, 3  ;;  %v5444_v57 = vsel %vm5443_vm14, %v5442_v43, %v5441_v12 }
 0x533   :  { %v5413_v35 = vmax.f32 %v5349_v27, %v5381_v63  ;;  %v5383_v9 = vrot.slane %v5351_v25, 2 }
 0x534   :  { %v5414_v3 = vmax.f32 %v5350_v6, %v5382_v4  ;;  %v5384_v39 = vrot.slane %v5352_v48, 2  ;;  %v5447_v42 = vsel %vm5446_vm15, %v5445_v18, %v5444_v57  ;;  %v7784_v18 = vld [vmem:[#allocation4 + $0x8] ss:$12 sps:$4 sm:$0xff]  }
 0x535   :  { %v5415_v31 = vmax.f32 %v5351_v25, %v5383_v9  ;;  %v7788_v57 = vld [vmem:[#allocation4 + $0x68] ss:$12 sps:$4 sm:$0xff]  }
 0x536   :  { %v5423_v62 = vmax.f32 %v5413_v35, %v5414_v3  ;;  %v5416_v8 = vmax.f32 %v5352_v48, %v5384_v39 }
 0x538   :  { %v5424_v17 = vmax.f32 %v5415_v31, %v5416_v8  ;;  %v5448_v1 = vrot.slane %v5423_v62, 2  ;;  %v7786_v31 = vld [vmem:[#allocation4 + $0x38] ss:$12 sps:$4 sm:$0xff]   ;;  %v7787_v8 = vld [vmem:[#allocation4 + $0x50] ss:$12 sps:$4 sm:$0xff]  }
 0x53a   :  { %v5450_v7 = vsel %vm5449_vm0, %v5448_v1, %v5447_v42  ;;  %v5451_v11 = vrot.slane %v5424_v17, 1  ;;  %v7790_v1 = vld [vmem:[#allocation4 + $0x98] ss:$12 sps:$4 sm:$0xff]   ;;  %v7791_v42 = vld [vmem:[#allocation4 + $0xb0] ss:$12 sps:$4 sm:$0xff]  }
 0x53c   :  { %v5453_v56 = vsel %vm5452_vm1, %v5451_v11, %v5450_v7  ;;  %v7794_v7 = vld [vmem:[%s12205_s7 + $0x4] ss:$8 sps:$4 sm:$0xff]   ;;  %v7792_v11 = vld [vmem:[%s12205_s7] ss:$8 sps:$4 sm:$0xff]  }
 0x53d   :  { %5455 = vrot.lane.b32.xlu0 %v5453_v56, %s7961_s3  ;;  %v7800_v56 = vld [vmem:[%s12205_s7 + $0x24] ss:$8 sps:$4 sm:$0xff]  }
 0x5af   :  { %v5456_v51 = vpop.permute.xlu0 %5455 }
 0x5b0   :  { %v5458_v0 = vrot.slane %v5456_v51, 1  ;;  %v5459_v2 = vrot.slane %v5456_v51, 2  ;;  %v5460_v20 = vrot.slane %v5456_v51, 3  ;;  %v5461_v40 = vrot.slane %v5456_v51, 4 }
 0x5b1   :  { %v5462_v23 = vrot.slane %v5456_v51, 5  ;;  %v5463_v13 = vrot.slane %v5456_v51, 6  ;;  %v5464_v41 = vrot.slane %v5456_v51, 7  ;;  %v5473_v46 = vmax.f32 %v11986_v26, %v5456_v51  ;;  %v7803_v51 = vld [vmem:[%s12205_s7 + $0x34] ss:$8 sps:$4 sm:$0xff]  }
 0x5b2   :  { %v5474_v16 = vmax.f32 %v11988_v22, %v5458_v0  ;;  %v5475_v36 = vmax.f32 %v11994_v32, %v5459_v2  ;;  %v5476_v24 = vmax.f32 %v11996_v15, %v5460_v20  ;;  %v5477_v10 = vmax.f32 %v5421_v33, %v5461_v40  ;;  %v7801_v0 = vld [vmem:[%s12205_s7 + $0x30] ss:$8 sps:$4 sm:$0xff]   ;;  %v7806_v2 = vld [vmem:[%s12205_s7 + $0x44] ss:$8 sps:$4 sm:$0xff]   ;;  %v7804_v20 = vld [vmem:[%s12205_s7 + $0x40] ss:$8 sps:$4 sm:$0xff]  }
 0x5b3   :  { %v5478_v29 = vmax.f32 %v5422_v19, %v5462_v23  ;;  %v5481_v55 = vpack.c.bf16 %v5473_v46, %v5473_v46  ;;  %v5479_v37 = vmax.f32 %v5423_v62, %v5463_v13  ;;  %v5480_v49 = vmax.f32 %v5424_v17, %v5464_v41  ;;  %v7785_v62 = vld [vmem:[#allocation4 + $0x20] ss:$12 sps:$4 sm:$0xff]   ;;  %v7809_v40 = vld [vmem:[%s12205_s7 + $0x54] ss:$8 sps:$4 sm:$0xff]   ;;  %v7807_v23 = vld [vmem:[%s12205_s7 + $0x50] ss:$8 sps:$4 sm:$0xff]  }
 0x5b4   :  { %v5482_v34 = vpack.c.bf16 %v5474_v16, %v5474_v16  ;;  %v5483_v47 = vpack.c.bf16 %v5475_v36, %v5475_v36  ;;  %v5484_v52 = vpack.c.bf16 %v5476_v24, %v5476_v24  ;;  %v5485_v30 = vpack.c.bf16 %v5477_v10, %v5477_v10  ;;  %v7789_v17 = vld [vmem:[#allocation4 + $0x80] ss:$12 sps:$4 sm:$0xff]   ;;  %v7815_v46 = vld [vmem:[%s12205_s7 + $0x74] ss:$8 sps:$4 sm:$0xff]   ;;  %v7813_v16 = vld [vmem:[%s12205_s7 + $0x70] ss:$8 sps:$4 sm:$0xff]  }
 0x5b5   :  { %v5486_v21 = vpack.c.bf16 %v5478_v29, %v5478_v29  ;;  %v5487_v58 = vpack.c.bf16 %v5479_v37, %v5479_v37  ;;  %v5488_v45 = vpack.c.bf16 %v5480_v49, %v5480_v49  ;;  %v5546_v6 = vunpack.c.l.b16 %v5481_v55  ;;  %v7812_v13 = vld [vmem:[%s12205_s7 + $0x64] ss:$8 sps:$4 sm:$0xff]   ;;  %v7810_v41 = vld [vmem:[%s12205_s7 + $0x60] ss:$8 sps:$4 sm:$0xff]   ;;  %v7821_v10 = vld [vmem:[%s12205_s7 + $0x94] ss:$8 sps:$4 sm:$0xff]  }
 0x5b6   :  { %v5547_v54 = vunpack.c.l.b16 %v5482_v34  ;;  %v5548_v27 = vunpack.c.l.b16 %v5483_v47  ;;  %v5549_v26 = vunpack.c.l.b16 %v5484_v52  ;;  %v5550_v22 = vunpack.c.l.b16 %v5485_v30  ;;  %v7818_v36 = vld [vmem:[%s12205_s7 + $0x84] ss:$8 sps:$4 sm:$0xff]   ;;  %v7816_v24 = vld [vmem:[%s12205_s7 + $0x80] ss:$8 sps:$4 sm:$0xff]   ;;  %v7819_v29 = vld [vmem:[%s12205_s7 + $0x90] ss:$8 sps:$4 sm:$0xff]  }
 0x5b7   :  { %v5551_v15 = vunpack.c.l.b16 %v5486_v21  ;;  %v5552_v33 = vunpack.c.l.b16 %v5487_v58  ;;  %v5553_v19 = vunpack.c.l.b16 %v5488_v45  ;;  %v7824_v55 = vld [vmem:[%s12205_s7 + $0xa4] ss:$8 sps:$4 sm:$0xff]   ;;  %v7822_v37 = vld [vmem:[%s12205_s7 + $0xa0] ss:$8 sps:$4 sm:$0xff]   ;;  %v7827_v49 = vld [vmem:[%s12205_s7 + $0xb4] ss:$8 sps:$4 sm:$0xff]  }
 0x5b8   :  { %v5554_v32 = vrot.slane %v5547_v54, 7  ;;  %v5556_v60 = vrot.slane %v5548_v27, 6  ;;  %v5558_v5 = vrot.slane %v5549_v26, 5  ;;  %v5560_v63 = vrot.slane %v5550_v22, 4  ;;  %v7825_v34 = vld [vmem:[%s12205_s7 + $0xb0] ss:$8 sps:$4 sm:$0xff]  }
 0x5b9   :  { %v5562_v4 = vrot.slane %v5551_v15, 3  ;;  %v5564_v48 = vrot.slane %v5552_v33, 2  ;;  %v5566_v3 = vrot.slane %v5553_v19, 1  ;;  %v7830_v47 = vld [vmem:[%s12205_s7 + $0xc4] ss:$8 sps:$4 sm:$0xff]   ;;  %v7868_v15 = vld [vmem:[#allocation6 + $0x50] sm:$0xff]  }
 0x5ba   :  { %v5555_v28 = vsel %vm5434_vm11, %v5554_v32, %v5546_v6  ;;  %v7828_v52 = vld [vmem:[%s12205_s7 + $0xc0] ss:$8 sps:$4 sm:$0xff]   ;;  %v7833_v30 = vld [vmem:[%s12205_s7 + $0xd4] ss:$8 sps:$4 sm:$0xff]   ;;  %v7831_v21 = vld [vmem:[%s12205_s7 + $0xd0] ss:$8 sps:$4 sm:$0xff]  }
 0x5bb   :  { %v5557_v59 = vsel %vm5437_vm12, %v5556_v60, %v5555_v28  ;;  %v7834_v58 = vld [vmem:[%s12205_s7 + $0xe0] ss:$8 sps:$4 sm:$0xff]   ;;  %v7836_v54 = vld [vmem:[%s12205_s7 + $0xe4] ss:$8 sps:$4 sm:$0xff]   ;;  %v7839_v27 = vld [vmem:[%s12205_s7 + $0xf4] ss:$8 sps:$4 sm:$0xff]  }
 0x5bc   :  { %v5559_v43 = vsel %vm5440_vm13, %v5558_v5, %v5557_v59  ;;  %v7837_v26 = vld [vmem:[%s12205_s7 + $0xf0] ss:$8 sps:$4 sm:$0xff]   ;;  %v7842_v45 = vld [vmem:[%s12205_s7 + $0x104] ss:$8 sps:$4 sm:$0xff]  }
 0x5bd   :  { %v5561_v25 = vsel %vm5443_vm14, %v5560_v63, %v5559_v43  ;;  %v7864_v22 = vld [vmem:[#allocation6 + $0x40] sm:$0xff]   ;;  %v7866_v32 = vld [vmem:[#allocation6 + $0x48] sm:$0xff]   ;;  %v7869_v33 = vld [vmem:[#allocation6 + $0x10] sm:$0xff]  }
 0x5be   :  { %v5563_v35 = vsel %vm5446_vm15, %v5562_v4, %v5561_v25  ;;  %v7865_v6 = vld [vmem:[#allocation6] sm:$0xff]   ;;  %6666 = vmatprep.subr.bf16.mxu0 %v7864_v22  ;;  %v7867_v60 = vld [vmem:[#allocation6 + $0x8] sm:$0xff]   ;;  %v7870_v28 = vld [vmem:[#allocation6 + $0x58] sm:$0xff]  }
 0x5bf   :  { %v5565_v9 = vsel %vm5449_vm0, %v5564_v48, %v5563_v35  ;;  %6667 = vmatpush3.bf16.msra.mxu0 %v7865_v6  ;;  %v7871_v5 = vld [vmem:[#allocation6 + $0x18] sm:$0xff]   ;;  %v7872_v19 = vld [vmem:[#allocation6 + $0x60] sm:$0xff]   ;;  %v7874_v59 = vld [vmem:[#allocation6 + $0x68] sm:$0xff]  }
 0x5c0   :  { %v5567_v39 = vsel %vm5452_vm1, %v5566_v3, %v5565_v9  ;;  %6668 = vmatprep.subr.bf16.mxu0 %v7866_v32  ;;  %v7873_v63 = vld [vmem:[#allocation6 + $0x20] sm:$0xff]   ;;  %v7875_v43 = vld [vmem:[#allocation6 + $0x28] sm:$0xff]  }
 0x5c1   :  { %v5568_v12 = vpack.c.b16 %v5567_v39, %v5567_v39  ;;  %v5521_v4 = vld [vmem:[%s12204_s6] sm:$0x7] }
 0x5c2   :  { %v5526_v25 = vrot.slane %v5521_v4, %v12917_v44  ;;  %v5530_v48 = vrot.slane %v5521_v4, %v12918_v50 }
 0x5c3   :  { %5731 = vmatmul.mubr.bf16.vlgmr.msra.gmra.mrb[64].mxu1 %v5568_v12  ;;  %6669 = vmatpush3.bf16.msra.mxu0 %v7867_v60 }
 0x5c4   :  { %6689 = vmatpush3.bf16.msra.mxu1 %v7784_v18  ;;  %6704 = vmatprep.mubr.msk.bf16.mxu1 %vm7967_vm2, %v7966_v14 }
 0x5c5   :  { %6690 = vmatprep.subr.bf16.mxu1 %v7966_v14  ;;  %6670 = vmatprep.subr.bf16.mxu0 %v7868_v15 }
 0x5c7   :  { %6671 = vmatpush3.bf16.msra.mxu0 %v7869_v33  ;;  %v12921_v33 = vlaneseq }
 0x5c8   :  { %6691 = vmatpush3.bf16.msra.mxu1 %v7785_v62  ;;  %6672 = vmatprep.subr.bf16.mxu0 %v7870_v28 }
 0x5c9   :  { %6692 = vmatprep.subr.bf16.mxu1 %v7966_v14  ;;  %v6347_v28 = vand.u32 127, %v12921_v33 }
 0x5cb   :  { %6673 = vmatpush3.bf16.msra.mxu0 %v7871_v5  ;;  %vm6348_vm3 = vcmp.lt.s32.totalorder %v6347_v28, 10 }
 0x5cc   :  { %6693 = vmatpush3.bf16.msra.mxu1 %v7786_v31  ;;  %6674 = vmatprep.subr.bf16.mxu0 %v7872_v19 }
 0x5cd   :  { %6694 = vmatprep.subr.bf16.mxu1 %v7966_v14 }
 0x5cf   :  { %6675 = vmatpush3.bf16.msra.mxu0 %v7873_v63 }
 0x5d0   :  { %6695 = vmatpush3.bf16.msra.mxu1 %v7787_v8  ;;  %6676 = vmatprep.subr.bf16.mxu0 %v7874_v59 }
 0x5d1   :  { %6696 = vmatprep.subr.bf16.mxu1 %v7966_v14 }
 0x5d3   :  { %6677 = vmatpush3.bf16.msra.mxu0 %v7875_v43 }
 0x5d4   :  { %6697 = vmatpush3.bf16.msra.mxu1 %v7788_v57  ;;  %v7840_v57 = vld [vmem:[%s12205_s7 + $0x100] ss:$8 sps:$4 sm:$0xff]  }
 0x5d5   :  { %6698 = vmatprep.subr.bf16.mxu1 %v7966_v14 }
 0x5d8   :  { %6699 = vmatpush3.bf16.msra.mxu1 %v7789_v17 }
 0x5d9   :  { %6700 = vmatprep.subr.bf16.mxu1 %v7966_v14 }
 0x5dc   :  { %6701 = vmatpush3.bf16.msra.mxu1 %v7790_v1  ;;  %v7845_v1 = vld [vmem:[%s12205_s7 + $0x114] ss:$8 sps:$4 sm:$0xff]  }
 0x5dd   :  { %6702 = vmatprep.subr.bf16.mxu1 %v7966_v14  ;;  %v7798_v14 = vld [vmem:[%s12205_s7 + $0x20] ss:$8 sps:$4 sm:$0xff]  }
 0x5e0   :  { %6703 = vmatpush3.bf16.msra.mxu1 %v7791_v42  ;;  %v7843_v42 = vld [vmem:[%s12205_s7 + $0x110] ss:$8 sps:$4 sm:$0xff]  }
 0x5e1   :  { %6085 = vmatprep.subr.bf16.mxu1 %v7794_v7  ;;  %v7848_v7 = vld [vmem:[%s12205_s7 + $0x124] ss:$8 sps:$4 sm:$0xff]  }
 0x5e3   :  { %6705 = vmatmul.mubr.bf16.vlgmr.msra.gmra.mrb[68].mxu1 %v5568_v12 }
 0x5e4   :  { %6086 = vmatpush1.bf16.msra.mxu1 %v7792_v11  ;;  %v7846_v11 = vld [vmem:[%s12205_s7 + $0x120] ss:$8 sps:$4 sm:$0xff]  }
 0x5e5   :  { %6087 = vmatprep.subr.bf16.mxu1 %v7797_v61  ;;  %v7851_v61 = vld [vmem:[%s12205_s7 + $0x134] ss:$8 sps:$4 sm:$0xff]  }
 0x5e8   :  { %6088 = vmatpush1.bf16.msra.mxu1 %v7795_v53  ;;  %v7854_v53 = vld [vmem:[%s12205_s7 + $0x144] ss:$8 sps:$4 sm:$0xff]  }
 0x5e9   :  { %6089 = vmatprep.subr.bf16.mxu1 %v7800_v56  ;;  %v7852_v56 = vld [vmem:[%s12205_s7 + $0x140] ss:$8 sps:$4 sm:$0xff]  }
 0x5ec   :  { %6090 = vmatpush1.bf16.msra.mxu1 %v7798_v14  ;;  %v7857_v14 = vld [vmem:[%s12205_s7 + $0x154] ss:$8 sps:$4 sm:$0xff]  }
 0x5ed   :  { %6091 = vmatprep.subr.bf16.mxu1 %v7803_v51  ;;  %v7855_v51 = vld [vmem:[%s12205_s7 + $0x150] ss:$8 sps:$4 sm:$0xff]  }
 0x5f0   :  { %6092 = vmatpush1.bf16.msra.mxu1 %v7801_v0  ;;  %v7860_v0 = vld [vmem:[%s12205_s7 + $0x164] ss:$8 sps:$4 sm:$0xff]  }
 0x5f1   :  { %6093 = vmatprep.subr.bf16.mxu1 %v7806_v2  ;;  %v12919_v2 = vld [vmem:[#allocation9_spill] sm:$0xff] }
 0x5f4   :  { %6094 = vmatpush1.bf16.msra.mxu1 %v7804_v20  ;;  %v12920_v20 = vsub.s32 2, %v12919_v2 }
 0x5f5   :  { %6095 = vmatprep.subr.bf16.mxu1 %v7809_v40 }
 0x5f6   :  { %v5534_v40 = vrot.slane %v5521_v4, %v12920_v20 }
 0x5f8   :  { %6096 = vmatpush1.bf16.msra.mxu1 %v7807_v23  ;;  %v7858_v23 = vld [vmem:[%s12205_s7 + $0x160] ss:$8 sps:$4 sm:$0xff]  }
 0x5f9   :  { %6097 = vmatprep.subr.bf16.mxu1 %v7812_v13  ;;  %v7863_v13 = vld [vmem:[%s12205_s7 + $0x174] ss:$8 sps:$4 sm:$0xff]  }
 0x5fc   :  { %6098 = vmatpush1.bf16.msra.mxu1 %v7810_v41 }
 0x5fd   :  { %6099 = vmatprep.subr.bf16.mxu1 %v7815_v46 }
 0x600   :  { %6100 = vmatpush1.bf16.msra.mxu1 %v7813_v16 }
 0x601   :  { %6101 = vmatprep.subr.bf16.mxu1 %v7818_v36 }
 0x604   :  { %6102 = vmatpush1.bf16.msra.mxu1 %v7816_v24  ;;  %v7861_v24 = vld [vmem:[%s12205_s7 + $0x170] ss:$8 sps:$4 sm:$0xff]  }
 0x605   :  { %6103 = vmatprep.subr.bf16.mxu1 %v7821_v10 }
 0x608   :  { %6104 = vmatpush1.bf16.msra.mxu1 %v7819_v29 }
 0x609   :  { %6105 = vmatprep.subr.bf16.mxu1 %v7824_v55 }
 0x60c   :  { %6106 = vmatpush1.bf16.msra.mxu1 %v7822_v37  ;;  %v7876_v37 = vld [vmem:[#allocation6 + $0x70] sm:$0xff]  }
 0x60d   :  { %6107 = vmatprep.subr.bf16.mxu1 %v7827_v49  ;;  %v7877_v49 = vld [vmem:[#allocation6 + $0x30] sm:$0xff]   ;;  %6678 = vmatprep.subr.bf16.mxu0 %v7876_v37 }
 0x60e   :  { %6679 = vmatpush3.bf16.msra.mxu0 %v7877_v49 }
 0x610   :  { %6108 = vmatpush1.bf16.msra.mxu1 %v7825_v34  ;;  %v7878_v34 = vld [vmem:[#allocation6 + $0x78] sm:$0xff]  }
 0x611   :  { %6109 = vmatprep.subr.bf16.mxu1 %v7830_v47  ;;  %v7879_v47 = vld [vmem:[#allocation6 + $0x38] sm:$0xff]   ;;  %6680 = vmatprep.subr.bf16.mxu0 %v7878_v34 }
 0x612   :  { %6681 = vmatpush3.bf16.msra.mxu0 %v7879_v47 }
 0x614   :  { %6110 = vmatpush1.bf16.msra.mxu1 %v7828_v52  ;;  %v5833_v52 = vld [vmem:[%s12206_s8] sm:$0x3] }
 0x615   :  { %6111 = vmatprep.subr.bf16.mxu1 %v7833_v30  ;;  %v5838_v30 = vrot.slane %v5833_v52, %v12917_v44  ;;  %v6640_v44 = vld [vmem:[%s12208_s10] ss:$0 sm:$0xff] }
 0x618   :  { %6112 = vmatpush1.bf16.msra.mxu1 %v7831_v21  ;;  %v5842_v21 = vrot.slane %v5833_v52, %v12918_v50 }
 0x619   :  { %6113 = vmatprep.subr.bf16.mxu1 %v7836_v54 }
 0x61c   :  { %6114 = vmatpush1.bf16.msra.mxu1 %v7834_v58 }
 0x61d   :  { %6115 = vmatprep.subr.bf16.mxu1 %v7839_v27 }
 0x620   :  { %6116 = vmatpush1.bf16.msra.mxu1 %v7837_v26 }
 0x621   :  { %6126 = vmatprep.subr.bf16.mxu1 %v7842_v45 }
 0x696   :  { %v5732_v35 = vpop.f32.mrb[64].mxu1 }
 0x697   :  { %v5733_v3 = vadd.f32 %v5732_v35, %v5526_v25  ;;  %v5734_v9 = vpop.f32.mrb[65].mxu1 }
 0x698   :  { %v5735_v39 = vadd.f32 %v5734_v9, %v5530_v48  ;;  %v5736_v18 = vpop.f32.mrb[66].mxu1 }
 0x699   :  { %v5779_v12 = vmax.f32 %v5733_v3, 0.0  ;;  %v5737_v62 = vpop.f32.mrb[67].mxu1 }
 0x69a   :  { %v5780_v31 = vmax.f32 %v5735_v39, 0.0 }
 0x69b   :  { %v5782_v17 = vpack.c.bf16 %v5779_v12, %v5779_v12 }
 0x69c   :  { %v5783_v8 = vpack.c.bf16 %v5780_v31, %v5780_v31 }
 0x69e   :  { %6117 = vmatprep.mubr.bf16.mxu1 %v5783_v8 }
 0x69f   :  { %6118 = vmatmul.mubr.bf16.vlgmr.msra.gmra.mrb[72].mxu1 %v5782_v17 }
 0x6a0   :  { %6127 = vmatpush1.bf16.msra.mxu1 %v7840_v57  ;;  %6158 = vmatprep.mubr.bf16.mxu1 %v12916_v38  ;;  %v7849_v38 = vld [vmem:[%s12205_s7 + $0x130] ss:$8 sps:$4 sm:$0xff]  }
 0x6a1   :  { %6128 = vmatprep.subr.bf16.mxu1 %v7845_v1 }
 0x6a4   :  { %6129 = vmatpush1.bf16.msra.mxu1 %v7843_v42 }
 0x6a5   :  { %6130 = vmatprep.subr.bf16.mxu1 %v7848_v7 }
 0x6a8   :  { %6131 = vmatpush1.bf16.msra.mxu1 %v7846_v11 }
 0x6a9   :  { %6132 = vmatprep.subr.bf16.mxu1 %v7851_v61 }
 0x6ac   :  { %6133 = vmatpush1.bf16.msra.mxu1 %v7849_v38 }
 0x6ad   :  { %6134 = vmatprep.subr.bf16.mxu1 %v7854_v53 }
 0x6b0   :  { %6135 = vmatpush1.bf16.msra.mxu1 %v7852_v56 }
 0x6b1   :  { %6136 = vmatprep.subr.bf16.mxu1 %v7857_v14 }
 0x6b4   :  { %6137 = vmatpush1.bf16.msra.mxu1 %v7855_v51 }
 0x6b5   :  { %6138 = vmatprep.subr.bf16.mxu1 %v7860_v0 }
 0x6b6   :  { %v5773_v41 = vpop.f32.mrb[68].mxu1 }
 0x6b7   :  { %v5774_v46 = vadd.f32 %v5773_v41, %v5534_v40  ;;  %v6706_v16 = vpop.f32.mrb[69].mxu1 }
 0x6b8   :  { %v5776_v36 = vpop.f32.mrb[70].mxu1  ;;  %6139 = vmatpush1.bf16.msra.mxu1 %v7858_v23 }
 0x6b9   :  { %v5781_v10 = vmax.f32 %v5774_v46, 0.0  ;;  %v6707_v29 = vpop.f32.mrb[71].mxu1  ;;  %6140 = vmatprep.subr.bf16.mxu1 %v7863_v13 }
 0x6bb   :  { %v5784_v55 = vpack.c.bf16 %v5781_v10, %v5781_v10 }
 0x6bc   :  { %6141 = vmatpush1.bf16.msra.mxu1 %v7861_v24 }
 0x6bf   :  { %6159 = vmatmul.mubr.bf16.vlgmr.msra.gmra.mrb[72].mxu1 %v5784_v55 }
 0x792   :  { %v6160_v58 = vpop.f32.mrb[72].mxu1 }
 0x793   :  { %v6852_v54 = vadd.f32 %v6160_v58, %v5838_v30  ;;  %v6162_v27 = vpop.f32.mrb[73].mxu1 }
 0x794   :  { %v6853_v26 = vadd.f32 %v6162_v27, %v5842_v21  ;;  %v6164_v45 = vpop.f32.mrb[74].mxu1 }
 0x795   :  { %v6167_v22 = vmax.f32 %v6852_v54, 0.0  ;;  %v6165_v6 = vpop.f32.mrb[75].mxu1 }
 0x796   :  { %v6168_v32 = vmax.f32 %v6853_v26, 0.0 }
 0x797   :  { %v6169_v15 = vpack.c.bf16 %v6167_v22, %v6167_v22 }
 0x798   :  { %v6170_v60 = vpack.c.bf16 %v6168_v32, %v6168_v32 }
 0x79a   :  { %6338 = vmatprep.mubr.bf16.mxu0 %v6170_v60 }
 0x79b   :  { %6339 = vmatmul.mubr.bf16.vlgmr.msra.gmra.mrb[80].mxu0 %v6169_v15 }
 0x86e   :  { %v6682_v5 = vpop.f32.mrb[80].mxu0 }
 0x86f   :  { %v6683_v19 = vpop.f32.mrb[81].mxu0 }
 0x870   :  { %v6684_v50 = vadd.f32 %v6683_v19, %v6682_v5  ;;  %v6685_v63 = vpop.f32.mrb[82].mxu0 }
 0x871   :  { %v6686_v59 = vpop.f32.mrb[83].mxu0 }
 0x872   :  { %v6341_v43 = vadd.f32 %v6684_v50, %v6640_v44 }
 0x874   :  { %v6349_v4 = vsel %vm6348_vm3, %v6341_v43, -1e+30 }
 0x875   :  { %6350 = vmax.xlane.f32.xlu1 %v6349_v4 }
 0x902   :  { %v6351_v25 = vpop.xlane.xlu1 %6350 }
 0x903   :  { %v6352_v48 = vsub.f32 %v6349_v4, %v6351_v25 }
 0x905   :  { %v6353_v35 = vmul.f32 1.442695, %v6352_v48 }
 0x907   :  { %7880 = vpow2.f32 %v6353_v35 }
 0x911   :  { %v7881_v3 = vpop.eup %7880 }
 0x912   :  { %6355 = vadd.xlane.f32.xlu0 %v7881_v3 }
 0x99f   :  { %v6356_v9 = vpop.xlane.xlu0 %6355 }
 0x9a0   :  { %7882 = vlog2.f32 %v6356_v9 }
 0x9aa   :  { %v7883_v39 = vpop.eup %7882 }
 0x9ab   :  { %v6358_v18 = vmul.f32 0.6931472, %v7883_v39 }
 0x9ad   :  { %v6359_v12 = vadd.f32 %v6358_v18, %v6351_v25 }
 0x9af   :  { %v6360_v62 = vsub.f32 %v6341_v43, %v6359_v12 }
 0x9b1   :  { %6361 = vst [vmem:[%s12209_s11] sm:$0xff] %v6360_v62 }
 0x9b2   :  { %6366 = vsyncpa [#allocation3], 1 }
 0x9b3   :  { %6367 = vsyncpa [#allocation5], 1 }

</bundles_post_ra>
